<compile_context>
chip_gen: v6e
topology: v6e:2x2x1
jax: 0.10.0
libtpu: 0.0.40
codegen_flags: <defaults>
</compile_context>

<pallas_src>
import functools

import numpy as np
import jax
import jax.numpy as jnp
from jax.experimental import pallas as pl
from jax.experimental.pallas import tpu as pltpu


# ---------------------------------------------------------------------------
# Fused kernel (one batch tile of `bt` images)
# ---------------------------------------------------------------------------

def _lenet_kernel(bt, x_ref, a1_ref, b1_ref, a2_ref, b2_ref,
                  w1_ref, c1_ref, w2_ref, c2_ref, w3_ref, c3_ref, o_ref):
    f32 = jnp.float32

    def pool_bias_relu(a, b, half, bias):
        # H-pool (across the two row-parity groups) + W-pool (across lane
        # halves) + bias + ReLU.  Bias/ReLU commute with max (bias constant
        # over each pooling window, both monotone), so order matches PyTorch.
        t = jnp.maximum(a, b)
        t = jnp.maximum(t[:, :half], t[:, half:]) + bias
        return jnp.maximum(t, 0.0).astype(jnp.bfloat16)

    # ---- conv1: output rows grouped by (ho mod 4); 5 row taps each ---------
    xg = [x_ref[0, k] for k in range(4)]                 # 4 x (9*bt, 28) bf16
    lhs1 = {}
    for q in range(-2, 6):                               # q = m + kh - 2
        km, dt = q % 4, q // 4
        lhs1[q] = xg[km][(dt + 1) * bt:(dt + 8) * bt, :]   # (7*bt, 28)

    y1 = []
    for m in range(4):
        acc = None
        for kh in range(5):
            part = jnp.dot(lhs1[m + kh - 2], a1_ref[kh],
                           preferred_element_type=f32)
            acc = part if acc is None else acc + part
        y1.append(acc)                                   # (7*bt, 168) f32

    p1 = (pool_bias_relu(y1[0], y1[1], 84, b1_ref[...]),   # pooled rows 0,2,..,12
          pool_bias_relu(y1[2], y1[3], 84, b1_ref[...]))   # pooled rows 1,3,..,13

    # ---- conv2: output rows grouped by (ho2 mod 2); 5 row taps each --------
    y2 = []
    for v in range(2):
        acc = None
        for kh in range(5):
            q = v + kh
            src = p1[q % 2][(q // 2) * bt:(q // 2 + 5) * bt, :]   # (5*bt, 84)
            part = jnp.dot(src, a2_ref[kh], preferred_element_type=f32)
            acc = part if acc is None else acc + part
        y2.append(acc)                                   # (5*bt, 160) f32

    feat = pool_bias_relu(y2[0], y2[1], 80, b2_ref[...])   # (5*bt, 80) bf16

    # ---- fc1 (contracts over pooled row r and the 80 lanes) + ReLU ---------
    z = None
    for r in range(5):
        part = jnp.dot(feat[r * bt:(r + 1) * bt, :], w1_ref[r],
                       preferred_element_type=f32)
        z = part if z is None else z + part
    z = jnp.maximum(z + c1_ref[...], 0.0).astype(jnp.bfloat16)     # (bt, 120)

    # ---- fc2 + ReLU, fc3 (padded to 128 output lanes) ----------------------
    z = jnp.dot(z, w2_ref[...], preferred_element_type=f32) + c2_ref[...]
    z = jnp.maximum(z, 0.0).astype(jnp.bfloat16)                   # (bt, 84)
    o_ref[...] = (jnp.dot(z, w3_ref[...], preferred_element_type=f32)
                  + c3_ref[...]).astype(o_ref.dtype)               # (bt, 128)


# ---------------------------------------------------------------------------
# pallas_call wrapper
# ---------------------------------------------------------------------------

def _choose_bt(batch):
    if batch >= 128:
        return 128
    return ((batch + 15) // 16) * 16


def lenet_forward(x_nchw, prep, num_classes=10, bt=None):
    """x_nchw: (B, 1, 28, 28) float -> (B, num_classes) float32 logits."""
    B = x_nchw.shape[0]
    if bt is None:
        bt = _choose_bt(B)
    assert bt % 16 == 0
    nt = pl.cdiv(B, bt)
    Bp = nt * bt

    # One cheap XLA pass (replaces the old jnp.pad pass): pad the batch, add
    # the conv1 H zero-padding (rows -4..31), de-interleave rows mod 4 and
    # pre-tile the batch so every conv row-tap is a contiguous sublane slice.
    xi = x_nchw[:, 0, :, :].astype(jnp.bfloat16)             # (B, 28, 28)
    if Bp != B:
        xi = jnp.pad(xi, ((0, Bp - B), (0, 0), (0, 0)))
    xr = jnp.pad(xi, ((0, 0), (4, 4), (0, 0)))               # (Bp, 36, 28)
    xr = xr.reshape(nt, bt, 9, 4, 28).transpose(0, 3, 2, 1, 4)
    xr = xr.reshape(nt, 4, 9 * bt, 28)                       # (tile, k, t*bt+b, col)

    const3 = lambda i: (0, 0, 0)
    const2 = lambda i: (0, 0)
    out = pl.pallas_call(
        functools.partial(_lenet_kernel, bt),
        out_shape=jax.ShapeDtypeStruct((Bp, 128), jnp.float32),
        grid=(nt,),
        in_specs=[
            pl.BlockSpec((1, 4, 9 * bt, 28), lambda i: (i, 0, 0, 0)),
            pl.BlockSpec((5, 28, 168), const3),      # conv1 taps (kw folded)
            pl.BlockSpec((1, 84), const2),           # conv1 bias (lane-tiled)
            pl.BlockSpec((5, 84, 160), const3),      # conv2 taps (kw folded)
            pl.BlockSpec((1, 80), const2),           # conv2 bias (lane-tiled)
            pl.BlockSpec((5, 80, 120), const3),      # fc1, split per pooled row
            pl.BlockSpec((1, 120), const2),          # fc1 bias
            pl.BlockSpec((120, 84), const2),         # fc2
            pl.BlockSpec((1, 84), const2),           # fc2 bias
            pl.BlockSpec((84, 128), const2),         # fc3 (padded to 128 lanes)
            pl.BlockSpec((1, 128), const2),          # fc3 bias (padded)
        ],
        out_specs=pl.BlockSpec((bt, 128), lambda i: (i, 0)),
        compiler_params=pltpu.CompilerParams(
            dimension_semantics=("parallel",)),
    )(xr, prep["A1"], prep["b1"], prep["A2"], prep["b2"],
      prep["W1"], prep["c1"], prep["W2"], prep["c2"],
      prep["W3"], prep["c3"])
    return out[:B, :num_classes]


# ---------------------------------------------------------------------------
# One-time offline parameter preparation (numpy, outside jit)
# ---------------------------------------------------------------------------

def prepare_params(p):
    w1 = np.asarray(p["conv1_w"], np.float32)            # (6, 1, 5, 5)
    b1 = np.asarray(p["conv1_b"], np.float32)            # (6,)
    w2 = np.asarray(p["conv2_w"], np.float32)            # (16, 6, 5, 5)
    b2 = np.asarray(p["conv2_b"], np.float32)            # (16,)
    f1w = np.asarray(p["fc1_w"], np.float32)             # (120, 400)
    f1b = np.asarray(p["fc1_b"], np.float32)
    f2w = np.asarray(p["fc2_w"], np.float32)              # (84, 120)
    f2b = np.asarray(p["fc2_b"], np.float32)
    f3w = np.asarray(p["fc3_w"], np.float32)               # (C, 84)
    f3b = np.asarray(p["fc3_b"], np.float32)
    C = f3w.shape[0]

    # conv1 taps: kw + W zero-pad + W-pool parity folded.
    # lane = wpar*84 + wp*6 + co   (output col wo = 2*wp + wpar)
    A1 = np.zeros((5, 28, 2, 14, 6), np.float32)
    for kh in range(5):
        for wpar in range(2):
            for wp in range(14):
                wo = 2 * wp + wpar
                for kw in range(5):
                    c = wo + kw - 2
                    if 0 <= c < 28:
                        A1[kh, c, wpar, wp, :] = w1[:, 0, kh, kw]
    A1 = A1.reshape(5, 28, 168)
    b1t = np.tile(b1, 14).reshape(1, 84)                 # lane = wp*6 + co

    # conv2 taps: input lane = wp*6 + ci, output lane = vpar*80 + wq*16 + co
    # (output col wo2 = 2*wq + vpar)
    A2 = np.zeros((5, 14, 6, 2, 5, 16), np.float32)
    for kh in range(5):
        for vpar in range(2):
            for wq in range(5):
                wo2 = 2 * wq + vpar
                for kw in range(5):
                    wp = wo2 + kw
                    if wp < 14:
                        A2[kh, wp, :, vpar, wq, :] = w2[:, :, kh, kw].T  # (ci, co)
    A2 = A2.reshape(5, 84, 160)
    b2t = np.tile(b2, 5).reshape(1, 80)                  # lane = wq*16 + co

    # fc1 split into 5 per-pooled-row matrices; columns permuted to the
    # kernel's (wq, co) lane order, replacing the NCHW flatten transpose.
    W1 = np.zeros((5, 5, 16, 120), np.float32)           # [r, wq, co, n]
    for r in range(5):
        for wq in range(5):
            for co in range(16):
                W1[r, wq, co, :] = f1w[:, co * 25 + r * 5 + wq]
    W1 = W1.reshape(5, 80, 120)

    # fc3 zero-padded to 128 output lanes (lane-dense final store).
    W3 = np.zeros((84, 128), np.float32)
    W3[:, :C] = f3w.T
    c3 = np.zeros((1, 128), np.float32)
    c3[0, :C] = f3b

    bf16 = jnp.bfloat16
    return dict(
        A1=jnp.asarray(A1, bf16), b1=jnp.asarray(b1t),
        A2=jnp.asarray(A2, bf16), b2=jnp.asarray(b2t),
        W1=jnp.asarray(W1, bf16), c1=jnp.asarray(f1b.reshape(1, 120)),
        W2=jnp.asarray(np.ascontiguousarray(f2w.T), bf16),
        c2=jnp.asarray(f2b.reshape(1, 84)),
        W3=jnp.asarray(W3, bf16), c3=jnp.asarray(c3),
    )


# ---------------------------------------------------------------------------
# Pure-numpy (float64) reference for a sanity check
# ---------------------------------------------------------------------------

def _conv2d_ref(x, w, b, pad):
    B, Ci, H, W = x.shape
    Co, _, KH, KW = w.shape
    xp = np.pad(x, ((0, 0), (0, 0), (pad, pad), (pad, pad)))
    Ho, Wo = H + 2 * pad - KH + 1, W + 2 * pad - KW + 1
    out = np.zeros((B, Co, Ho, Wo), dtype=np.float64)
    for i in range(KH):
        for j in range(KW):
            patch = xp[:, :, i:i + Ho, j:j + Wo]
            out += np.einsum('bchw,oc->bohw', patch, w[:, :, i, j])
    return out + b[None, :, None, None]


def _pool2_ref(x):
    B, C, H, W = x.shape
    return x.reshape(B, C, H // 2, 2, W // 2, 2).max(axis=(3, 5))


def lenet_reference(x, p):
    h = np.maximum(_conv2d_ref(x, p["conv1_w"], p["conv1_b"], 2), 0.0)
    h = _pool2_ref(h)
    h = np.maximum(_conv2d_ref(h, p["conv2_w"], p["conv2_b"], 0), 0.0)
    h = _pool2_ref(h)
    h = h.reshape(h.shape[0], -1)
    h = np.maximum(h @ p["fc1_w"].T + p["fc1_b"], 0.0)
    h = np.maximum(h @ p["fc2_w"].T + p["fc2_b"], 0.0)
    return h @ p["fc3_w"].T + p["fc3_b"]


# ---------------------------------------------------------------------------
# Driver
# ---------------------------------------------------------------------------

if __name__ == "__main__":
    key = jax.random.PRNGKey(0)
    keys = jax.random.split(key, 11)

    def uinit(k, shape, fan_in):
        bound = 1.0 / (fan_in ** 0.5)
        return jax.random.uniform(k, shape, jnp.float32, -bound, bound)

    params = {
        "conv1_w": uinit(keys[0], (6, 1, 5, 5), 1 * 5 * 5),
        "conv1_b": uinit(keys[1], (6,), 1 * 5 * 5),
        "conv2_w": uinit(keys[2], (16, 6, 5, 5), 6 * 5 * 5),
        "conv2_b": uinit(keys[3], (16,), 6 * 5 * 5),
        "fc1_w":  uinit(keys[4], (120, 400), 400),
        "fc1_b":  uinit(keys[5], (120,), 400),
        "fc2_w":  uinit(keys[6], (84, 120), 120),
        "fc2_b":  uinit(keys[7], (84,), 120),
        "fc3_w":  uinit(keys[8], (10, 84), 84),
        "fc3_b":  uinit(keys[9], (10,), 84),
    }

    # LeNet default: input_size=28, nc=1, num_classes=10 -> x is (B, 1, 28, 28)
    x = jax.random.normal(keys[10], (4, 1, 28, 28), jnp.float32)

    params_np = {k: np.asarray(jax.device_get(v)) for k, v in params.items()}
    prep = prepare_params(params_np)

    fwd = jax.jit(lenet_forward)
    out = jax.block_until_ready(fwd(x, prep))
    assert out.shape == (4, 10), out.shape

    # Numerical sanity check against a float64 numpy reference (bf16 matmuls).
    ref = lenet_reference(
        np.asarray(jax.device_get(x), np.float64),
        {k: v.astype(np.float64) for k, v in params_np.items()})
    out_np = np.asarray(jax.device_get(out), np.float64)
    if not np.allclose(out_np, ref, rtol=2e-2, atol=2e-2):
        raise AssertionError(
            "mismatch vs reference: max abs err = %g"
            % float(np.max(np.abs(out_np - ref))))

    print("KERNEL_OK")
</pallas_src>

<mosaic_0001>
module attributes {stable_mosaic.version = 11 : i64} {
  func.func @_lenet_kernel(%arg0: i32, %arg1: memref<1x4x144x28xbf16, #tpu.memory_space<vmem>>, %arg2: memref<5x28x168xbf16, #tpu.memory_space<vmem>>, %arg3: memref<1x84xf32, #tpu.memory_space<vmem>>, %arg4: memref<5x84x160xbf16, #tpu.memory_space<vmem>>, %arg5: memref<1x80xf32, #tpu.memory_space<vmem>>, %arg6: memref<5x80x120xbf16, #tpu.memory_space<vmem>>, %arg7: memref<1x120xf32, #tpu.memory_space<vmem>>, %arg8: memref<120x84xbf16, #tpu.memory_space<vmem>>, %arg9: memref<1x84xf32, #tpu.memory_space<vmem>>, %arg10: memref<84x128xbf16, #tpu.memory_space<vmem>>, %arg11: memref<1x128xf32, #tpu.memory_space<vmem>>, %arg12: memref<16x128xf32, #tpu.memory_space<vmem>>) attributes {dimension_semantics = [#tpu.dimension_semantics<parallel>], iteration_bounds = array<i64: 1>, scalar_prefetch = 0 : i64, scratch_operands = 0 : i64, tpu.core_type = #tpu.core_type<tc>, window_params = [{transform_indices = @transform_0, window_bounds = array<i64: 1, 4, 144, 28>}, {pipeline_mode = #tpu.pipeline_mode<synchronous>, transform_indices = @transform_1, window_bounds = array<i64: 5, 28, 168>}, {pipeline_mode = #tpu.pipeline_mode<synchronous>, transform_indices = @transform_2, window_bounds = array<i64: 1, 84>}, {pipeline_mode = #tpu.pipeline_mode<synchronous>, transform_indices = @transform_3, window_bounds = array<i64: 5, 84, 160>}, {pipeline_mode = #tpu.pipeline_mode<synchronous>, transform_indices = @transform_4, window_bounds = array<i64: 1, 80>}, {pipeline_mode = #tpu.pipeline_mode<synchronous>, transform_indices = @transform_5, window_bounds = array<i64: 5, 80, 120>}, {pipeline_mode = #tpu.pipeline_mode<synchronous>, transform_indices = @transform_6, window_bounds = array<i64: 1, 120>}, {pipeline_mode = #tpu.pipeline_mode<synchronous>, transform_indices = @transform_7, window_bounds = array<i64: 120, 84>}, {pipeline_mode = #tpu.pipeline_mode<synchronous>, transform_indices = @transform_8, window_bounds = array<i64: 1, 84>}, {pipeline_mode = #tpu.pipeline_mode<synchronous>, transform_indices = @transform_9, window_bounds = array<i64: 84, 128>}, {pipeline_mode = #tpu.pipeline_mode<synchronous>, transform_indices = @transform_10, window_bounds = array<i64: 1, 128>}, {transform_indices = @transform_11, window_bounds = array<i64: 16, 128>}]} {
    %c0 = arith.constant 0 : index
    %c0_0 = arith.constant 0 : index
    %c0_1 = arith.constant 0 : index
    %c0_2 = arith.constant 0 : index
    %0 = vector.load %arg1[%c0, %c0_0, %c0_1, %c0_2] : memref<1x4x144x28xbf16, #tpu.memory_space<vmem>>, vector<1x1x144x28xbf16>
    %1 = vector.shape_cast %0 : vector<1x1x144x28xbf16> to vector<144x28xbf16>
    %c0_3 = arith.constant 0 : index
    %c1 = arith.constant 1 : index
    %c0_4 = arith.constant 0 : index
    %c0_5 = arith.constant 0 : index
    %2 = vector.load %arg1[%c0_3, %c1, %c0_4, %c0_5] : memref<1x4x144x28xbf16, #tpu.memory_space<vmem>>, vector<1x1x144x28xbf16>
    %3 = vector.shape_cast %2 : vector<1x1x144x28xbf16> to vector<144x28xbf16>
    %c0_6 = arith.constant 0 : index
    %c2 = arith.constant 2 : index
    %c0_7 = arith.constant 0 : index
    %c0_8 = arith.constant 0 : index
    %4 = vector.load %arg1[%c0_6, %c2, %c0_7, %c0_8] : memref<1x4x144x28xbf16, #tpu.memory_space<vmem>>, vector<1x1x144x28xbf16>
    %5 = vector.shape_cast %4 : vector<1x1x144x28xbf16> to vector<144x28xbf16>
    %c0_9 = arith.constant 0 : index
    %c3 = arith.constant 3 : index
    %c0_10 = arith.constant 0 : index
    %c0_11 = arith.constant 0 : index
    %6 = vector.load %arg1[%c0_9, %c3, %c0_10, %c0_11] : memref<1x4x144x28xbf16, #tpu.memory_space<vmem>>, vector<1x1x144x28xbf16>
    %7 = vector.shape_cast %6 : vector<1x1x144x28xbf16> to vector<144x28xbf16>
    %8 = vector.extract_strided_slice %5 {offsets = [0, 0], sizes = [112, 28], strides = [1, 1]} : vector<144x28xbf16> to vector<112x28xbf16>
    %9 = vector.extract_strided_slice %7 {offsets = [0, 0], sizes = [112, 28], strides = [1, 1]} : vector<144x28xbf16> to vector<112x28xbf16>
    %10 = vector.extract_strided_slice %1 {offsets = [16, 0], sizes = [112, 28], strides = [1, 1]} : vector<144x28xbf16> to vector<112x28xbf16>
    %11 = vector.extract_strided_slice %3 {offsets = [16, 0], sizes = [112, 28], strides = [1, 1]} : vector<144x28xbf16> to vector<112x28xbf16>
    %12 = vector.extract_strided_slice %5 {offsets = [16, 0], sizes = [112, 28], strides = [1, 1]} : vector<144x28xbf16> to vector<112x28xbf16>
    %13 = vector.extract_strided_slice %7 {offsets = [16, 0], sizes = [112, 28], strides = [1, 1]} : vector<144x28xbf16> to vector<112x28xbf16>
    %14 = vector.extract_strided_slice %1 {offsets = [32, 0], sizes = [112, 28], strides = [1, 1]} : vector<144x28xbf16> to vector<112x28xbf16>
    %15 = vector.extract_strided_slice %3 {offsets = [32, 0], sizes = [112, 28], strides = [1, 1]} : vector<144x28xbf16> to vector<112x28xbf16>
    %c0_12 = arith.constant 0 : index
    %c0_13 = arith.constant 0 : index
    %c0_14 = arith.constant 0 : index
    %16 = vector.load %arg2[%c0_12, %c0_13, %c0_14] : memref<5x28x168xbf16, #tpu.memory_space<vmem>>, vector<1x28x168xbf16>
    %17 = vector.shape_cast %16 : vector<1x28x168xbf16> to vector<28x168xbf16>
    %cst = arith.constant dense<0.000000e+00> : vector<112x168xf32>
    %18 = tpu.matmul %8, %17, %cst {dimension_numbers = #tpu.dot_dimension_numbers<[1], [0], [0], [1], [0, 0, 1, 1], [], []>} : vector<112x28xbf16>, vector<28x168xbf16>, vector<112x168xf32> -> vector<112x168xf32>
    %c1_15 = arith.constant 1 : index
    %c0_16 = arith.constant 0 : index
    %c0_17 = arith.constant 0 : index
    %19 = vector.load %arg2[%c1_15, %c0_16, %c0_17] : memref<5x28x168xbf16, #tpu.memory_space<vmem>>, vector<1x28x168xbf16>
    %20 = vector.shape_cast %19 : vector<1x28x168xbf16> to vector<28x168xbf16>
    %cst_18 = arith.constant dense<0.000000e+00> : vector<112x168xf32>
    %21 = tpu.matmul %9, %20, %cst_18 {dimension_numbers = #tpu.dot_dimension_numbers<[1], [0], [0], [1], [0, 0, 1, 1], [], []>} : vector<112x28xbf16>, vector<28x168xbf16>, vector<112x168xf32> -> vector<112x168xf32>
    %22 = arith.addf %18, %21 : vector<112x168xf32>
    %c2_19 = arith.constant 2 : index
    %c0_20 = arith.constant 0 : index
    %c0_21 = arith.constant 0 : index
    %23 = vector.load %arg2[%c2_19, %c0_20, %c0_21] : memref<5x28x168xbf16, #tpu.memory_space<vmem>>, vector<1x28x168xbf16>
    %24 = vector.shape_cast %23 : vector<1x28x168xbf16> to vector<28x168xbf16>
    %cst_22 = arith.constant dense<0.000000e+00> : vector<112x168xf32>
    %25 = tpu.matmul %10, %24, %cst_22 {dimension_numbers = #tpu.dot_dimension_numbers<[1], [0], [0], [1], [0, 0, 1, 1], [], []>} : vector<112x28xbf16>, vector<28x168xbf16>, vector<112x168xf32> -> vector<112x168xf32>
    %26 = arith.addf %22, %25 : vector<112x168xf32>
    %c3_23 = arith.constant 3 : index
    %c0_24 = arith.constant 0 : index
    %c0_25 = arith.constant 0 : index
    %27 = vector.load %arg2[%c3_23, %c0_24, %c0_25] : memref<5x28x168xbf16, #tpu.memory_space<vmem>>, vector<1x28x168xbf16>
    %28 = vector.shape_cast %27 : vector<1x28x168xbf16> to vector<28x168xbf16>
    %cst_26 = arith.constant dense<0.000000e+00> : vector<112x168xf32>
    %29 = tpu.matmul %11, %28, %cst_26 {dimension_numbers = #tpu.dot_dimension_numbers<[1], [0], [0], [1], [0, 0, 1, 1], [], []>} : vector<112x28xbf16>, vector<28x168xbf16>, vector<112x168xf32> -> vector<112x168xf32>
    %30 = arith.addf %26, %29 : vector<112x168xf32>
    %c4 = arith.constant 4 : index
    %c0_27 = arith.constant 0 : index
    %c0_28 = arith.constant 0 : index
    %31 = vector.load %arg2[%c4, %c0_27, %c0_28] : memref<5x28x168xbf16, #tpu.memory_space<vmem>>, vector<1x28x168xbf16>
    %32 = vector.shape_cast %31 : vector<1x28x168xbf16> to vector<28x168xbf16>
    %cst_29 = arith.constant dense<0.000000e+00> : vector<112x168xf32>
    %33 = tpu.matmul %12, %32, %cst_29 {dimension_numbers = #tpu.dot_dimension_numbers<[1], [0], [0], [1], [0, 0, 1, 1], [], []>} : vector<112x28xbf16>, vector<28x168xbf16>, vector<112x168xf32> -> vector<112x168xf32>
    %34 = arith.addf %30, %33 : vector<112x168xf32>
    %c0_30 = arith.constant 0 : index
    %c0_31 = arith.constant 0 : index
    %c0_32 = arith.constant 0 : index
    %35 = vector.load %arg2[%c0_30, %c0_31, %c0_32] : memref<5x28x168xbf16, #tpu.memory_space<vmem>>, vector<1x28x168xbf16>
    %36 = vector.shape_cast %35 : vector<1x28x168xbf16> to vector<28x168xbf16>
    %cst_33 = arith.constant dense<0.000000e+00> : vector<112x168xf32>
    %37 = tpu.matmul %9, %36, %cst_33 {dimension_numbers = #tpu.dot_dimension_numbers<[1], [0], [0], [1], [0, 0, 1, 1], [], []>} : vector<112x28xbf16>, vector<28x168xbf16>, vector<112x168xf32> -> vector<112x168xf32>
    %c1_34 = arith.constant 1 : index
    %c0_35 = arith.constant 0 : index
    %c0_36 = arith.constant 0 : index
    %38 = vector.load %arg2[%c1_34, %c0_35, %c0_36] : memref<5x28x168xbf16, #tpu.memory_space<vmem>>, vector<1x28x168xbf16>
    %39 = vector.shape_cast %38 : vector<1x28x168xbf16> to vector<28x168xbf16>
    %cst_37 = arith.constant dense<0.000000e+00> : vector<112x168xf32>
    %40 = tpu.matmul %10, %39, %cst_37 {dimension_numbers = #tpu.dot_dimension_numbers<[1], [0], [0], [1], [0, 0, 1, 1], [], []>} : vector<112x28xbf16>, vector<28x168xbf16>, vector<112x168xf32> -> vector<112x168xf32>
    %41 = arith.addf %37, %40 : vector<112x168xf32>
    %c2_38 = arith.constant 2 : index
    %c0_39 = arith.constant 0 : index
    %c0_40 = arith.constant 0 : index
    %42 = vector.load %arg2[%c2_38, %c0_39, %c0_40] : memref<5x28x168xbf16, #tpu.memory_space<vmem>>, vector<1x28x168xbf16>
    %43 = vector.shape_cast %42 : vector<1x28x168xbf16> to vector<28x168xbf16>
    %cst_41 = arith.constant dense<0.000000e+00> : vector<112x168xf32>
    %44 = tpu.matmul %11, %43, %cst_41 {dimension_numbers = #tpu.dot_dimension_numbers<[1], [0], [0], [1], [0, 0, 1, 1], [], []>} : vector<112x28xbf16>, vector<28x168xbf16>, vector<112x168xf32> -> vector<112x168xf32>
    %45 = arith.addf %41, %44 : vector<112x168xf32>
    %c3_42 = arith.constant 3 : index
    %c0_43 = arith.constant 0 : index
    %c0_44 = arith.constant 0 : index
    %46 = vector.load %arg2[%c3_42, %c0_43, %c0_44] : memref<5x28x168xbf16, #tpu.memory_space<vmem>>, vector<1x28x168xbf16>
    %47 = vector.shape_cast %46 : vector<1x28x168xbf16> to vector<28x168xbf16>
    %cst_45 = arith.constant dense<0.000000e+00> : vector<112x168xf32>
    %48 = tpu.matmul %12, %47, %cst_45 {dimension_numbers = #tpu.dot_dimension_numbers<[1], [0], [0], [1], [0, 0, 1, 1], [], []>} : vector<112x28xbf16>, vector<28x168xbf16>, vector<112x168xf32> -> vector<112x168xf32>
    %49 = arith.addf %45, %48 : vector<112x168xf32>
    %c4_46 = arith.constant 4 : index
    %c0_47 = arith.constant 0 : index
    %c0_48 = arith.constant 0 : index
    %50 = vector.load %arg2[%c4_46, %c0_47, %c0_48] : memref<5x28x168xbf16, #tpu.memory_space<vmem>>, vector<1x28x168xbf16>
    %51 = vector.shape_cast %50 : vector<1x28x168xbf16> to vector<28x168xbf16>
    %cst_49 = arith.constant dense<0.000000e+00> : vector<112x168xf32>
    %52 = tpu.matmul %13, %51, %cst_49 {dimension_numbers = #tpu.dot_dimension_numbers<[1], [0], [0], [1], [0, 0, 1, 1], [], []>} : vector<112x28xbf16>, vector<28x168xbf16>, vector<112x168xf32> -> vector<112x168xf32>
    %53 = arith.addf %49, %52 : vector<112x168xf32>
    %c0_50 = arith.constant 0 : index
    %c0_51 = arith.constant 0 : index
    %c0_52 = arith.constant 0 : index
    %54 = vector.load %arg2[%c0_50, %c0_51, %c0_52] : memref<5x28x168xbf16, #tpu.memory_space<vmem>>, vector<1x28x168xbf16>
    %55 = vector.shape_cast %54 : vector<1x28x168xbf16> to vector<28x168xbf16>
    %cst_53 = arith.constant dense<0.000000e+00> : vector<112x168xf32>
    %56 = tpu.matmul %10, %55, %cst_53 {dimension_numbers = #tpu.dot_dimension_numbers<[1], [0], [0], [1], [0, 0, 1, 1], [], []>} : vector<112x28xbf16>, vector<28x168xbf16>, vector<112x168xf32> -> vector<112x168xf32>
    %c1_54 = arith.constant 1 : index
    %c0_55 = arith.constant 0 : index
    %c0_56 = arith.constant 0 : index
    %57 = vector.load %arg2[%c1_54, %c0_55, %c0_56] : memref<5x28x168xbf16, #tpu.memory_space<vmem>>, vector<1x28x168xbf16>
    %58 = vector.shape_cast %57 : vector<1x28x168xbf16> to vector<28x168xbf16>
    %cst_57 = arith.constant dense<0.000000e+00> : vector<112x168xf32>
    %59 = tpu.matmul %11, %58, %cst_57 {dimension_numbers = #tpu.dot_dimension_numbers<[1], [0], [0], [1], [0, 0, 1, 1], [], []>} : vector<112x28xbf16>, vector<28x168xbf16>, vector<112x168xf32> -> vector<112x168xf32>
    %60 = arith.addf %56, %59 : vector<112x168xf32>
    %c2_58 = arith.constant 2 : index
    %c0_59 = arith.constant 0 : index
    %c0_60 = arith.constant 0 : index
    %61 = vector.load %arg2[%c2_58, %c0_59, %c0_60] : memref<5x28x168xbf16, #tpu.memory_space<vmem>>, vector<1x28x168xbf16>
    %62 = vector.shape_cast %61 : vector<1x28x168xbf16> to vector<28x168xbf16>
    %cst_61 = arith.constant dense<0.000000e+00> : vector<112x168xf32>
    %63 = tpu.matmul %12, %62, %cst_61 {dimension_numbers = #tpu.dot_dimension_numbers<[1], [0], [0], [1], [0, 0, 1, 1], [], []>} : vector<112x28xbf16>, vector<28x168xbf16>, vector<112x168xf32> -> vector<112x168xf32>
    %64 = arith.addf %60, %63 : vector<112x168xf32>
    %c3_62 = arith.constant 3 : index
    %c0_63 = arith.constant 0 : index
    %c0_64 = arith.constant 0 : index
    %65 = vector.load %arg2[%c3_62, %c0_63, %c0_64] : memref<5x28x168xbf16, #tpu.memory_space<vmem>>, vector<1x28x168xbf16>
    %66 = vector.shape_cast %65 : vector<1x28x168xbf16> to vector<28x168xbf16>
    %cst_65 = arith.constant dense<0.000000e+00> : vector<112x168xf32>
    %67 = tpu.matmul %13, %66, %cst_65 {dimension_numbers = #tpu.dot_dimension_numbers<[1], [0], [0], [1], [0, 0, 1, 1], [], []>} : vector<112x28xbf16>, vector<28x168xbf16>, vector<112x168xf32> -> vector<112x168xf32>
    %68 = arith.addf %64, %67 : vector<112x168xf32>
    %c4_66 = arith.constant 4 : index
    %c0_67 = arith.constant 0 : index
    %c0_68 = arith.constant 0 : index
    %69 = vector.load %arg2[%c4_66, %c0_67, %c0_68] : memref<5x28x168xbf16, #tpu.memory_space<vmem>>, vector<1x28x168xbf16>
    %70 = vector.shape_cast %69 : vector<1x28x168xbf16> to vector<28x168xbf16>
    %cst_69 = arith.constant dense<0.000000e+00> : vector<112x168xf32>
    %71 = tpu.matmul %14, %70, %cst_69 {dimension_numbers = #tpu.dot_dimension_numbers<[1], [0], [0], [1], [0, 0, 1, 1], [], []>} : vector<112x28xbf16>, vector<28x168xbf16>, vector<112x168xf32> -> vector<112x168xf32>
    %72 = arith.addf %68, %71 : vector<112x168xf32>
    %c0_70 = arith.constant 0 : index
    %c0_71 = arith.constant 0 : index
    %c0_72 = arith.constant 0 : index
    %73 = vector.load %arg2[%c0_70, %c0_71, %c0_72] : memref<5x28x168xbf16, #tpu.memory_space<vmem>>, vector<1x28x168xbf16>
    %74 = vector.shape_cast %73 : vector<1x28x168xbf16> to vector<28x168xbf16>
    %cst_73 = arith.constant dense<0.000000e+00> : vector<112x168xf32>
    %75 = tpu.matmul %11, %74, %cst_73 {dimension_numbers = #tpu.dot_dimension_numbers<[1], [0], [0], [1], [0, 0, 1, 1], [], []>} : vector<112x28xbf16>, vector<28x168xbf16>, vector<112x168xf32> -> vector<112x168xf32>
    %c1_74 = arith.constant 1 : index
    %c0_75 = arith.constant 0 : index
    %c0_76 = arith.constant 0 : index
    %76 = vector.load %arg2[%c1_74, %c0_75, %c0_76] : memref<5x28x168xbf16, #tpu.memory_space<vmem>>, vector<1x28x168xbf16>
    %77 = vector.shape_cast %76 : vector<1x28x168xbf16> to vector<28x168xbf16>
    %cst_77 = arith.constant dense<0.000000e+00> : vector<112x168xf32>
    %78 = tpu.matmul %12, %77, %cst_77 {dimension_numbers = #tpu.dot_dimension_numbers<[1], [0], [0], [1], [0, 0, 1, 1], [], []>} : vector<112x28xbf16>, vector<28x168xbf16>, vector<112x168xf32> -> vector<112x168xf32>
    %79 = arith.addf %75, %78 : vector<112x168xf32>
    %c2_78 = arith.constant 2 : index
    %c0_79 = arith.constant 0 : index
    %c0_80 = arith.constant 0 : index
    %80 = vector.load %arg2[%c2_78, %c0_79, %c0_80] : memref<5x28x168xbf16, #tpu.memory_space<vmem>>, vector<1x28x168xbf16>
    %81 = vector.shape_cast %80 : vector<1x28x168xbf16> to vector<28x168xbf16>
    %cst_81 = arith.constant dense<0.000000e+00> : vector<112x168xf32>
    %82 = tpu.matmul %13, %81, %cst_81 {dimension_numbers = #tpu.dot_dimension_numbers<[1], [0], [0], [1], [0, 0, 1, 1], [], []>} : vector<112x28xbf16>, vector<28x168xbf16>, vector<112x168xf32> -> vector<112x168xf32>
    %83 = arith.addf %79, %82 : vector<112x168xf32>
    %c3_82 = arith.constant 3 : index
    %c0_83 = arith.constant 0 : index
    %c0_84 = arith.constant 0 : index
    %84 = vector.load %arg2[%c3_82, %c0_83, %c0_84] : memref<5x28x168xbf16, #tpu.memory_space<vmem>>, vector<1x28x168xbf16>
    %85 = vector.shape_cast %84 : vector<1x28x168xbf16> to vector<28x168xbf16>
    %cst_85 = arith.constant dense<0.000000e+00> : vector<112x168xf32>
    %86 = tpu.matmul %14, %85, %cst_85 {dimension_numbers = #tpu.dot_dimension_numbers<[1], [0], [0], [1], [0, 0, 1, 1], [], []>} : vector<112x28xbf16>, vector<28x168xbf16>, vector<112x168xf32> -> vector<112x168xf32>
    %87 = arith.addf %83, %86 : vector<112x168xf32>
    %c4_86 = arith.constant 4 : index
    %c0_87 = arith.constant 0 : index
    %c0_88 = arith.constant 0 : index
    %88 = vector.load %arg2[%c4_86, %c0_87, %c0_88] : memref<5x28x168xbf16, #tpu.memory_space<vmem>>, vector<1x28x168xbf16>
    %89 = vector.shape_cast %88 : vector<1x28x168xbf16> to vector<28x168xbf16>
    %cst_89 = arith.constant dense<0.000000e+00> : vector<112x168xf32>
    %90 = tpu.matmul %15, %89, %cst_89 {dimension_numbers = #tpu.dot_dimension_numbers<[1], [0], [0], [1], [0, 0, 1, 1], [], []>} : vector<112x28xbf16>, vector<28x168xbf16>, vector<112x168xf32> -> vector<112x168xf32>
    %91 = arith.addf %87, %90 : vector<112x168xf32>
    %c0_90 = arith.constant 0 : index
    %c0_91 = arith.constant 0 : index
    %92 = vector.load %arg3[%c0_90, %c0_91] : memref<1x84xf32, #tpu.memory_space<vmem>>, vector<1x84xf32>
    %93 = arith.maximumf %34, %53 : vector<112x168xf32>
    %94 = vector.extract_strided_slice %93 {offsets = [0, 0], sizes = [112, 84], strides = [1, 1]} : vector<112x168xf32> to vector<112x84xf32>
    %95 = vector.extract_strided_slice %93 {offsets = [0, 84], sizes = [112, 84], strides = [1, 1]} : vector<112x168xf32> to vector<112x84xf32>
    %96 = arith.maximumf %94, %95 : vector<112x84xf32>
    %97 = vector.broadcast %92 : vector<1x84xf32> to vector<112x84xf32>
    %98 = arith.addf %96, %97 : vector<112x84xf32>
    %cst_92 = arith.constant 0.000000e+00 : f32
    %99 = vector.broadcast %cst_92 : f32 to vector<112x84xf32>
    %100 = arith.maximumf %98, %99 : vector<112x84xf32>
    %101 = arith.truncf %100 : vector<112x84xf32> to vector<112x84xbf16>
    %c0_93 = arith.constant 0 : index
    %c0_94 = arith.constant 0 : index
    %102 = vector.load %arg3[%c0_93, %c0_94] : memref<1x84xf32, #tpu.memory_space<vmem>>, vector<1x84xf32>
    %103 = arith.maximumf %72, %91 : vector<112x168xf32>
    %104 = vector.extract_strided_slice %103 {offsets = [0, 0], sizes = [112, 84], strides = [1, 1]} : vector<112x168xf32> to vector<112x84xf32>
    %105 = vector.extract_strided_slice %103 {offsets = [0, 84], sizes = [112, 84], strides = [1, 1]} : vector<112x168xf32> to vector<112x84xf32>
    %106 = arith.maximumf %104, %105 : vector<112x84xf32>
    %107 = vector.broadcast %102 : vector<1x84xf32> to vector<112x84xf32>
    %108 = arith.addf %106, %107 : vector<112x84xf32>
    %cst_95 = arith.constant 0.000000e+00 : f32
    %109 = vector.broadcast %cst_95 : f32 to vector<112x84xf32>
    %110 = arith.maximumf %108, %109 : vector<112x84xf32>
    %111 = arith.truncf %110 : vector<112x84xf32> to vector<112x84xbf16>
    %112 = vector.extract_strided_slice %101 {offsets = [0, 0], sizes = [80, 84], strides = [1, 1]} : vector<112x84xbf16> to vector<80x84xbf16>
    %c0_96 = arith.constant 0 : index
    %c0_97 = arith.constant 0 : index
    %c0_98 = arith.constant 0 : index
    %113 = vector.load %arg4[%c0_96, %c0_97, %c0_98] : memref<5x84x160xbf16, #tpu.memory_space<vmem>>, vector<1x84x160xbf16>
    %114 = vector.shape_cast %113 : vector<1x84x160xbf16> to vector<84x160xbf16>
    %cst_99 = arith.constant dense<0.000000e+00> : vector<80x160xf32>
    %115 = tpu.matmul %112, %114, %cst_99 {dimension_numbers = #tpu.dot_dimension_numbers<[1], [0], [0], [1], [0, 0, 1, 1], [], []>} : vector<80x84xbf16>, vector<84x160xbf16>, vector<80x160xf32> -> vector<80x160xf32>
    %116 = vector.extract_strided_slice %111 {offsets = [0, 0], sizes = [80, 84], strides = [1, 1]} : vector<112x84xbf16> to vector<80x84xbf16>
    %c1_100 = arith.constant 1 : index
    %c0_101 = arith.constant 0 : index
    %c0_102 = arith.constant 0 : index
    %117 = vector.load %arg4[%c1_100, %c0_101, %c0_102] : memref<5x84x160xbf16, #tpu.memory_space<vmem>>, vector<1x84x160xbf16>
    %118 = vector.shape_cast %117 : vector<1x84x160xbf16> to vector<84x160xbf16>
    %cst_103 = arith.constant dense<0.000000e+00> : vector<80x160xf32>
    %119 = tpu.matmul %116, %118, %cst_103 {dimension_numbers = #tpu.dot_dimension_numbers<[1], [0], [0], [1], [0, 0, 1, 1], [], []>} : vector<80x84xbf16>, vector<84x160xbf16>, vector<80x160xf32> -> vector<80x160xf32>
    %120 = arith.addf %115, %119 : vector<80x160xf32>
    %121 = vector.extract_strided_slice %101 {offsets = [16, 0], sizes = [80, 84], strides = [1, 1]} : vector<112x84xbf16> to vector<80x84xbf16>
    %c2_104 = arith.constant 2 : index
    %c0_105 = arith.constant 0 : index
    %c0_106 = arith.constant 0 : index
    %122 = vector.load %arg4[%c2_104, %c0_105, %c0_106] : memref<5x84x160xbf16, #tpu.memory_space<vmem>>, vector<1x84x160xbf16>
    %123 = vector.shape_cast %122 : vector<1x84x160xbf16> to vector<84x160xbf16>
    %cst_107 = arith.constant dense<0.000000e+00> : vector<80x160xf32>
    %124 = tpu.matmul %121, %123, %cst_107 {dimension_numbers = #tpu.dot_dimension_numbers<[1], [0], [0], [1], [0, 0, 1, 1], [], []>} : vector<80x84xbf16>, vector<84x160xbf16>, vector<80x160xf32> -> vector<80x160xf32>
    %125 = arith.addf %120, %124 : vector<80x160xf32>
    %126 = vector.extract_strided_slice %111 {offsets = [16, 0], sizes = [80, 84], strides = [1, 1]} : vector<112x84xbf16> to vector<80x84xbf16>
    %c3_108 = arith.constant 3 : index
    %c0_109 = arith.constant 0 : index
    %c0_110 = arith.constant 0 : index
    %127 = vector.load %arg4[%c3_108, %c0_109, %c0_110] : memref<5x84x160xbf16, #tpu.memory_space<vmem>>, vector<1x84x160xbf16>
    %128 = vector.shape_cast %127 : vector<1x84x160xbf16> to vector<84x160xbf16>
    %cst_111 = arith.constant dense<0.000000e+00> : vector<80x160xf32>
    %129 = tpu.matmul %126, %128, %cst_111 {dimension_numbers = #tpu.dot_dimension_numbers<[1], [0], [0], [1], [0, 0, 1, 1], [], []>} : vector<80x84xbf16>, vector<84x160xbf16>, vector<80x160xf32> -> vector<80x160xf32>
    %130 = arith.addf %125, %129 : vector<80x160xf32>
    %131 = vector.extract_strided_slice %101 {offsets = [32, 0], sizes = [80, 84], strides = [1, 1]} : vector<112x84xbf16> to vector<80x84xbf16>
    %c4_112 = arith.constant 4 : index
    %c0_113 = arith.constant 0 : index
    %c0_114 = arith.constant 0 : index
    %132 = vector.load %arg4[%c4_112, %c0_113, %c0_114] : memref<5x84x160xbf16, #tpu.memory_space<vmem>>, vector<1x84x160xbf16>
    %133 = vector.shape_cast %132 : vector<1x84x160xbf16> to vector<84x160xbf16>
    %cst_115 = arith.constant dense<0.000000e+00> : vector<80x160xf32>
    %134 = tpu.matmul %131, %133, %cst_115 {dimension_numbers = #tpu.dot_dimension_numbers<[1], [0], [0], [1], [0, 0, 1, 1], [], []>} : vector<80x84xbf16>, vector<84x160xbf16>, vector<80x160xf32> -> vector<80x160xf32>
    %135 = arith.addf %130, %134 : vector<80x160xf32>
    %136 = vector.extract_strided_slice %111 {offsets = [0, 0], sizes = [80, 84], strides = [1, 1]} : vector<112x84xbf16> to vector<80x84xbf16>
    %c0_116 = arith.constant 0 : index
    %c0_117 = arith.constant 0 : index
    %c0_118 = arith.constant 0 : index
    %137 = vector.load %arg4[%c0_116, %c0_117, %c0_118] : memref<5x84x160xbf16, #tpu.memory_space<vmem>>, vector<1x84x160xbf16>
    %138 = vector.shape_cast %137 : vector<1x84x160xbf16> to vector<84x160xbf16>
    %cst_119 = arith.constant dense<0.000000e+00> : vector<80x160xf32>
    %139 = tpu.matmul %136, %138, %cst_119 {dimension_numbers = #tpu.dot_dimension_numbers<[1], [0], [0], [1], [0, 0, 1, 1], [], []>} : vector<80x84xbf16>, vector<84x160xbf16>, vector<80x160xf32> -> vector<80x160xf32>
    %140 = vector.extract_strided_slice %101 {offsets = [16, 0], sizes = [80, 84], strides = [1, 1]} : vector<112x84xbf16> to vector<80x84xbf16>
    %c1_120 = arith.constant 1 : index
    %c0_121 = arith.constant 0 : index
    %c0_122 = arith.constant 0 : index
    %141 = vector.load %arg4[%c1_120, %c0_121, %c0_122] : memref<5x84x160xbf16, #tpu.memory_space<vmem>>, vector<1x84x160xbf16>
    %142 = vector.shape_cast %141 : vector<1x84x160xbf16> to vector<84x160xbf16>
    %cst_123 = arith.constant dense<0.000000e+00> : vector<80x160xf32>
    %143 = tpu.matmul %140, %142, %cst_123 {dimension_numbers = #tpu.dot_dimension_numbers<[1], [0], [0], [1], [0, 0, 1, 1], [], []>} : vector<80x84xbf16>, vector<84x160xbf16>, vector<80x160xf32> -> vector<80x160xf32>
    %144 = arith.addf %139, %143 : vector<80x160xf32>
    %145 = vector.extract_strided_slice %111 {offsets = [16, 0], sizes = [80, 84], strides = [1, 1]} : vector<112x84xbf16> to vector<80x84xbf16>
    %c2_124 = arith.constant 2 : index
    %c0_125 = arith.constant 0 : index
    %c0_126 = arith.constant 0 : index
    %146 = vector.load %arg4[%c2_124, %c0_125, %c0_126] : memref<5x84x160xbf16, #tpu.memory_space<vmem>>, vector<1x84x160xbf16>
    %147 = vector.shape_cast %146 : vector<1x84x160xbf16> to vector<84x160xbf16>
    %cst_127 = arith.constant dense<0.000000e+00> : vector<80x160xf32>
    %148 = tpu.matmul %145, %147, %cst_127 {dimension_numbers = #tpu.dot_dimension_numbers<[1], [0], [0], [1], [0, 0, 1, 1], [], []>} : vector<80x84xbf16>, vector<84x160xbf16>, vector<80x160xf32> -> vector<80x160xf32>
    %149 = arith.addf %144, %148 : vector<80x160xf32>
    %150 = vector.extract_strided_slice %101 {offsets = [32, 0], sizes = [80, 84], strides = [1, 1]} : vector<112x84xbf16> to vector<80x84xbf16>
    %c3_128 = arith.constant 3 : index
    %c0_129 = arith.constant 0 : index
    %c0_130 = arith.constant 0 : index
    %151 = vector.load %arg4[%c3_128, %c0_129, %c0_130] : memref<5x84x160xbf16, #tpu.memory_space<vmem>>, vector<1x84x160xbf16>
    %152 = vector.shape_cast %151 : vector<1x84x160xbf16> to vector<84x160xbf16>
    %cst_131 = arith.constant dense<0.000000e+00> : vector<80x160xf32>
    %153 = tpu.matmul %150, %152, %cst_131 {dimension_numbers = #tpu.dot_dimension_numbers<[1], [0], [0], [1], [0, 0, 1, 1], [], []>} : vector<80x84xbf16>, vector<84x160xbf16>, vector<80x160xf32> -> vector<80x160xf32>
    %154 = arith.addf %149, %153 : vector<80x160xf32>
    %155 = vector.extract_strided_slice %111 {offsets = [32, 0], sizes = [80, 84], strides = [1, 1]} : vector<112x84xbf16> to vector<80x84xbf16>
    %c4_132 = arith.constant 4 : index
    %c0_133 = arith.constant 0 : index
    %c0_134 = arith.constant 0 : index
    %156 = vector.load %arg4[%c4_132, %c0_133, %c0_134] : memref<5x84x160xbf16, #tpu.memory_space<vmem>>, vector<1x84x160xbf16>
    %157 = vector.shape_cast %156 : vector<1x84x160xbf16> to vector<84x160xbf16>
    %cst_135 = arith.constant dense<0.000000e+00> : vector<80x160xf32>
    %158 = tpu.matmul %155, %157, %cst_135 {dimension_numbers = #tpu.dot_dimension_numbers<[1], [0], [0], [1], [0, 0, 1, 1], [], []>} : vector<80x84xbf16>, vector<84x160xbf16>, vector<80x160xf32> -> vector<80x160xf32>
    %159 = arith.addf %154, %158 : vector<80x160xf32>
    %c0_136 = arith.constant 0 : index
    %c0_137 = arith.constant 0 : index
    %160 = vector.load %arg5[%c0_136, %c0_137] : memref<1x80xf32, #tpu.memory_space<vmem>>, vector<1x80xf32>
    %161 = arith.maximumf %135, %159 : vector<80x160xf32>
    %162 = vector.extract_strided_slice %161 {offsets = [0, 0], sizes = [80, 80], strides = [1, 1]} : vector<80x160xf32> to vector<80x80xf32>
    %163 = vector.extract_strided_slice %161 {offsets = [0, 80], sizes = [80, 80], strides = [1, 1]} : vector<80x160xf32> to vector<80x80xf32>
    %164 = arith.maximumf %162, %163 : vector<80x80xf32>
    %165 = vector.broadcast %160 : vector<1x80xf32> to vector<80x80xf32>
    %166 = arith.addf %164, %165 : vector<80x80xf32>
    %cst_138 = arith.constant 0.000000e+00 : f32
    %167 = vector.broadcast %cst_138 : f32 to vector<80x80xf32>
    %168 = arith.maximumf %166, %167 : vector<80x80xf32>
    %169 = arith.truncf %168 : vector<80x80xf32> to vector<80x80xbf16>
    %170 = vector.extract_strided_slice %169 {offsets = [0, 0], sizes = [16, 80], strides = [1, 1]} : vector<80x80xbf16> to vector<16x80xbf16>
    %c0_139 = arith.constant 0 : index
    %c0_140 = arith.constant 0 : index
    %c0_141 = arith.constant 0 : index
    %171 = vector.load %arg6[%c0_139, %c0_140, %c0_141] : memref<5x80x120xbf16, #tpu.memory_space<vmem>>, vector<1x80x120xbf16>
    %172 = vector.shape_cast %171 : vector<1x80x120xbf16> to vector<80x120xbf16>
    %cst_142 = arith.constant dense<0.000000e+00> : vector<16x120xf32>
    %173 = tpu.matmul %170, %172, %cst_142 {dimension_numbers = #tpu.dot_dimension_numbers<[1], [0], [0], [1], [0, 0, 1, 1], [], []>} : vector<16x80xbf16>, vector<80x120xbf16>, vector<16x120xf32> -> vector<16x120xf32>
    %174 = vector.extract_strided_slice %169 {offsets = [16, 0], sizes = [16, 80], strides = [1, 1]} : vector<80x80xbf16> to vector<16x80xbf16>
    %c1_143 = arith.constant 1 : index
    %c0_144 = arith.constant 0 : index
    %c0_145 = arith.constant 0 : index
    %175 = vector.load %arg6[%c1_143, %c0_144, %c0_145] : memref<5x80x120xbf16, #tpu.memory_space<vmem>>, vector<1x80x120xbf16>
    %176 = vector.shape_cast %175 : vector<1x80x120xbf16> to vector<80x120xbf16>
    %cst_146 = arith.constant dense<0.000000e+00> : vector<16x120xf32>
    %177 = tpu.matmul %174, %176, %cst_146 {dimension_numbers = #tpu.dot_dimension_numbers<[1], [0], [0], [1], [0, 0, 1, 1], [], []>} : vector<16x80xbf16>, vector<80x120xbf16>, vector<16x120xf32> -> vector<16x120xf32>
    %178 = arith.addf %173, %177 : vector<16x120xf32>
    %179 = vector.extract_strided_slice %169 {offsets = [32, 0], sizes = [16, 80], strides = [1, 1]} : vector<80x80xbf16> to vector<16x80xbf16>
    %c2_147 = arith.constant 2 : index
    %c0_148 = arith.constant 0 : index
    %c0_149 = arith.constant 0 : index
    %180 = vector.load %arg6[%c2_147, %c0_148, %c0_149] : memref<5x80x120xbf16, #tpu.memory_space<vmem>>, vector<1x80x120xbf16>
    %181 = vector.shape_cast %180 : vector<1x80x120xbf16> to vector<80x120xbf16>
    %cst_150 = arith.constant dense<0.000000e+00> : vector<16x120xf32>
    %182 = tpu.matmul %179, %181, %cst_150 {dimension_numbers = #tpu.dot_dimension_numbers<[1], [0], [0], [1], [0, 0, 1, 1], [], []>} : vector<16x80xbf16>, vector<80x120xbf16>, vector<16x120xf32> -> vector<16x120xf32>
    %183 = arith.addf %178, %182 : vector<16x120xf32>
    %184 = vector.extract_strided_slice %169 {offsets = [48, 0], sizes = [16, 80], strides = [1, 1]} : vector<80x80xbf16> to vector<16x80xbf16>
    %c3_151 = arith.constant 3 : index
    %c0_152 = arith.constant 0 : index
    %c0_153 = arith.constant 0 : index
    %185 = vector.load %arg6[%c3_151, %c0_152, %c0_153] : memref<5x80x120xbf16, #tpu.memory_space<vmem>>, vector<1x80x120xbf16>
    %186 = vector.shape_cast %185 : vector<1x80x120xbf16> to vector<80x120xbf16>
    %cst_154 = arith.constant dense<0.000000e+00> : vector<16x120xf32>
    %187 = tpu.matmul %184, %186, %cst_154 {dimension_numbers = #tpu.dot_dimension_numbers<[1], [0], [0], [1], [0, 0, 1, 1], [], []>} : vector<16x80xbf16>, vector<80x120xbf16>, vector<16x120xf32> -> vector<16x120xf32>
    %188 = arith.addf %183, %187 : vector<16x120xf32>
    %189 = vector.extract_strided_slice %169 {offsets = [64, 0], sizes = [16, 80], strides = [1, 1]} : vector<80x80xbf16> to vector<16x80xbf16>
    %c4_155 = arith.constant 4 : index
    %c0_156 = arith.constant 0 : index
    %c0_157 = arith.constant 0 : index
    %190 = vector.load %arg6[%c4_155, %c0_156, %c0_157] : memref<5x80x120xbf16, #tpu.memory_space<vmem>>, vector<1x80x120xbf16>
    %191 = vector.shape_cast %190 : vector<1x80x120xbf16> to vector<80x120xbf16>
    %cst_158 = arith.constant dense<0.000000e+00> : vector<16x120xf32>
    %192 = tpu.matmul %189, %191, %cst_158 {dimension_numbers = #tpu.dot_dimension_numbers<[1], [0], [0], [1], [0, 0, 1, 1], [], []>} : vector<16x80xbf16>, vector<80x120xbf16>, vector<16x120xf32> -> vector<16x120xf32>
    %193 = arith.addf %188, %192 : vector<16x120xf32>
    %c0_159 = arith.constant 0 : index
    %c0_160 = arith.constant 0 : index
    %194 = vector.load %arg7[%c0_159, %c0_160] : memref<1x120xf32, #tpu.memory_space<vmem>>, vector<1x120xf32>
    %195 = vector.broadcast %194 : vector<1x120xf32> to vector<16x120xf32>
    %196 = arith.addf %193, %195 : vector<16x120xf32>
    %cst_161 = arith.constant 0.000000e+00 : f32
    %197 = vector.broadcast %cst_161 : f32 to vector<16x120xf32>
    %198 = arith.maximumf %196, %197 : vector<16x120xf32>
    %199 = arith.truncf %198 : vector<16x120xf32> to vector<16x120xbf16>
    %c0_162 = arith.constant 0 : index
    %c0_163 = arith.constant 0 : index
    %200 = vector.load %arg8[%c0_162, %c0_163] : memref<120x84xbf16, #tpu.memory_space<vmem>>, vector<120x84xbf16>
    %cst_164 = arith.constant dense<0.000000e+00> : vector<16x84xf32>
    %201 = tpu.matmul %199, %200, %cst_164 {dimension_numbers = #tpu.dot_dimension_numbers<[1], [0], [0], [1], [0, 0, 1, 1], [], []>} : vector<16x120xbf16>, vector<120x84xbf16>, vector<16x84xf32> -> vector<16x84xf32>
    %c0_165 = arith.constant 0 : index
    %c0_166 = arith.constant 0 : index
    %202 = vector.load %arg9[%c0_165, %c0_166] : memref<1x84xf32, #tpu.memory_space<vmem>>, vector<1x84xf32>
    %203 = vector.broadcast %202 : vector<1x84xf32> to vector<16x84xf32>
    %204 = arith.addf %201, %203 : vector<16x84xf32>
    %cst_167 = arith.constant 0.000000e+00 : f32
    %205 = vector.broadcast %cst_167 : f32 to vector<16x84xf32>
    %206 = arith.maximumf %204, %205 : vector<16x84xf32>
    %207 = arith.truncf %206 : vector<16x84xf32> to vector<16x84xbf16>
    %c0_168 = arith.constant 0 : index
    %c0_169 = arith.constant 0 : index
    %208 = vector.load %arg10[%c0_168, %c0_169] : memref<84x128xbf16, #tpu.memory_space<vmem>>, vector<84x128xbf16>
    %cst_170 = arith.constant dense<0.000000e+00> : vector<16x128xf32>
    %209 = tpu.matmul %207, %208, %cst_170 {dimension_numbers = #tpu.dot_dimension_numbers<[1], [0], [0], [1], [0, 0, 1, 1], [], []>} : vector<16x84xbf16>, vector<84x128xbf16>, vector<16x128xf32> -> vector<16x128xf32>
    %c0_171 = arith.constant 0 : index
    %c0_172 = arith.constant 0 : index
    %210 = vector.load %arg11[%c0_171, %c0_172] : memref<1x128xf32, #tpu.memory_space<vmem>>, vector<1x128xf32>
    %211 = vector.broadcast %210 : vector<1x128xf32> to vector<16x128xf32>
    %212 = arith.addf %209, %211 : vector<16x128xf32>
    %c0_173 = arith.constant 0 : index
    %c0_174 = arith.constant 0 : index
    %213 = vector.load %arg12[%c0_173, %c0_174] : memref<16x128xf32, #tpu.memory_space<vmem>>, vector<16x128xf32>
    tpu.vector_store %arg12[%c0_173, %c0_174], %212 {strides = array<i32>} : memref<16x128xf32, #tpu.memory_space<vmem>>, vector<16x128xf32>,
    return
  }
  func.func @transform_0(%arg0: i32) -> (i32, i32, i32, i32) {
    %c0_i32 = arith.constant 0 : i32
    %c0_i32_0 = arith.constant 0 : i32
    %c0_i32_1 = arith.constant 0 : i32
    %c0_i32_2 = arith.constant 0 : i32
    return %arg0, %c0_i32, %c0_i32_0, %c0_i32_1 : i32, i32, i32, i32
  }
  func.func @transform_1(%arg0: i32) -> (i32, i32, i32) {
    %c0_i32 = arith.constant 0 : i32
    %c0_i32_0 = arith.constant 0 : i32
    %c0_i32_1 = arith.constant 0 : i32
    %c0_i32_2 = arith.constant 0 : i32
    return %c0_i32, %c0_i32_0, %c0_i32_1 : i32, i32, i32
  }
  func.func @transform_2(%arg0: i32) -> (i32, i32) {
    %c0_i32 = arith.constant 0 : i32
    %c0_i32_0 = arith.constant 0 : i32
    %c0_i32_1 = arith.constant 0 : i32
    return %c0_i32, %c0_i32_0 : i32, i32
  }
  func.func @transform_3(%arg0: i32) -> (i32, i32, i32) {
    %c0_i32 = arith.constant 0 : i32
    %c0_i32_0 = arith.constant 0 : i32
    %c0_i32_1 = arith.constant 0 : i32
    %c0_i32_2 = arith.constant 0 : i32
    return %c0_i32, %c0_i32_0, %c0_i32_1 : i32, i32, i32
  }
  func.func @transform_4(%arg0: i32) -> (i32, i32) {
    %c0_i32 = arith.constant 0 : i32
    %c0_i32_0 = arith.constant 0 : i32
    %c0_i32_1 = arith.constant 0 : i32
    return %c0_i32, %c0_i32_0 : i32, i32
  }
  func.func @transform_5(%arg0: i32) -> (i32, i32, i32) {
    %c0_i32 = arith.constant 0 : i32
    %c0_i32_0 = arith.constant 0 : i32
    %c0_i32_1 = arith.constant 0 : i32
    %c0_i32_2 = arith.constant 0 : i32
    return %c0_i32, %c0_i32_0, %c0_i32_1 : i32, i32, i32
  }
  func.func @transform_6(%arg0: i32) -> (i32, i32) {
    %c0_i32 = arith.constant 0 : i32
    %c0_i32_0 = arith.constant 0 : i32
    %c0_i32_1 = arith.constant 0 : i32
    return %c0_i32, %c0_i32_0 : i32, i32
  }
  func.func @transform_7(%arg0: i32) -> (i32, i32) {
    %c0_i32 = arith.constant 0 : i32
    %c0_i32_0 = arith.constant 0 : i32
    %c0_i32_1 = arith.constant 0 : i32
    return %c0_i32, %c0_i32_0 : i32, i32
  }
  func.func @transform_8(%arg0: i32) -> (i32, i32) {
    %c0_i32 = arith.constant 0 : i32
    %c0_i32_0 = arith.constant 0 : i32
    %c0_i32_1 = arith.constant 0 : i32
    return %c0_i32, %c0_i32_0 : i32, i32
  }
  func.func @transform_9(%arg0: i32) -> (i32, i32) {
    %c0_i32 = arith.constant 0 : i32
    %c0_i32_0 = arith.constant 0 : i32
    %c0_i32_1 = arith.constant 0 : i32
    return %c0_i32, %c0_i32_0 : i32, i32
  }
  func.func @transform_10(%arg0: i32) -> (i32, i32) {
    %c0_i32 = arith.constant 0 : i32
    %c0_i32_0 = arith.constant 0 : i32
    %c0_i32_1 = arith.constant 0 : i32
    return %c0_i32, %c0_i32_0 : i32, i32
  }
  func.func @transform_11(%arg0: i32) -> (i32, i32) {
    %c0_i32 = arith.constant 0 : i32
    %c0_i32_0 = arith.constant 0 : i32
    return %arg0, %c0_i32 : i32, i32
  }
}

</mosaic_0001>

<bundles_post_ra>
// kernel: lenet_forward.1
= control target key start
LH: loop header
LB: loop body
LE: loop exit
PB: predicated region body
PF: predicated region fallthrough
CT: control target
= control target key end

     0   :  { %vm190_vm0 = vcmask 1045504   ;;  %v9863_v1 = vmov 0   ;;  %vm168_vm1 = vcmask 228352   ;;  %s6384_s17 = smov 44   ;;  %vm3384_vm2 = vcmask 1041408   ;;  %s6386_s16 = smov 48   ;;  %s9839_s1 = inlined_call_operand.vmem [shape: bf16[5,28,168], index: 1, kind: input, shape index: {}]   ;;  %s9840_s0 = inlined_call_operand.vmem [shape: bf16[1,4,144,28], index: 0, kind: input, shape index: {}]   ;;  %s9841_s3 = inlined_call_operand.vmem [shape: bf16[5,84,160], index: 3, kind: input, shape index: {}]   ;;  %s9842_s2 = inlined_call_operand.vmem [shape: f32[1,84], index: 2, kind: input, shape index: {}]   ;;  %s9843_s5 = inlined_call_operand.vmem [shape: bf16[5,80,120], index: 5, kind: input, shape index: {}]   ;;  %s9844_s4 = inlined_call_operand.vmem [shape: f32[1,80], index: 4, kind: input, shape index: {}]   ;;  %s9845_s7 = inlined_call_operand.vmem [shape: bf16[120,84], index: 7, kind: input, shape index: {}]   ;;  %s9846_s9 = inlined_call_operand.vmem [shape: bf16[84,128], index: 9, kind: input, shape index: {}]   ;;  %s9847_s6 = inlined_call_operand.vmem [shape: f32[1,120], index: 6, kind: input, shape index: {}]   ;;  %s9848_s8 = inlined_call_operand.vmem [shape: f32[1,84], index: 8, kind: input, shape index: {}]   ;;  %s9849_s10 = inlined_call_operand.vmem [shape: f32[1,128], index: 10, kind: input, shape index: {}]   ;;  %s9850_s11 = inlined_call_operand.vmem [shape: f32[16,128], index: 11, kind: output, shape index: {}]  }
   0x1   :  { %v6451_v0 = vld [vmem:[%s9839_s1 + $0x34] ss:$8 sps:$4 sm:$0x3f]   ;;  %229 = vmatprep.mubr.bf16.mxu0 %v9863_v1  ;;  %412 = vmatprep.mubr.bf16.mxu1 %v9863_v1  ;;  %v6149_v3 = vld [vmem:[%s9839_s1 + $0x30] ss:$8 sps:$4 sm:$0x3f]  }
   0x2   :  { %v6458_v2 = vld [vmem:[%s9839_s1 + $0x14] ss:$8 sps:$4 sm:$0x3f]   ;;  %5520 = vmatprep.subr.msk.bf16.mxu0 %vm190_vm0, %v6451_v0  ;;  %v6150_v4 = vld [vmem:[%s9839_s1 + $0x10] ss:$8 sps:$4 sm:$0x3f]  }
   0x3   :  { %5539 = vmatprep.subr.msk.bf16.mxu1 %vm190_vm0, %v6458_v2  ;;  %v6473_v5 = vld [vmem:[%s9839_s1 + $0x24] ss:$8 sps:$4 sm:$0xff]   ;;  %v6476_v6 = vsel %vm190_vm0, %v6149_v3, 0  ;;  %v6479_v7 = vsel %vm190_vm0, %v6150_v4, 0  ;;  %v6491_v9 = vld [vmem:[%s9839_s1 + $0x20] ss:$8 sps:$4 sm:$0xff]  }
   0x4   :  { %9916 = vst [vmem:[#allocation2_spill] sm:$0xff] %v6476_v6  ;;  %9917 = vst [vmem:[#allocation3_spill] sm:$0xff] %v6479_v7  ;;  %v6484_v8 = vld [vmem:[%s9839_s1 + $0x4] ss:$8 sps:$4 sm:$0xff]   ;;  %210 = vmatpush1.bf16.msra.mxu0 %v6476_v6  ;;  %393 = vmatpush1.bf16.msra.mxu1 %v6479_v7  ;;  %v6496_v10 = vld [vmem:[%s9839_s1] ss:$8 sps:$4 sm:$0xff]  }
   0x5   :  { %211 = vmatprep.subr.bf16.mxu0 %v6473_v5  ;;  %394 = vmatprep.subr.bf16.mxu1 %v6484_v8  ;;  %v6503_v11 = vld [vmem:[%s9840_s0 + $0xd8] sm:$0xff]   ;;  %v6158_v12 = vld [vmem:[%s9840_s0 + $0x90] sm:$0xff]   ;;  %v6546_v19 = vld [vmem:[%s9840_s0 + $0xe0] sm:$0xff]   ;;  %vm3017_vm3 = vcmask 359424   ;;  %vm3368_vm4 = vcmask 687104   ;;  %vm6387_vm5 = vmmov 0  }
   0x6   :  { %v6511_v13 = vld [vmem:[%s9839_s1 + $0x54] ss:$8 sps:$4 sm:$0x3f]   ;;  %v6161_v14 = vld [vmem:[%s9839_s1 + $0x50] ss:$8 sps:$4 sm:$0x3f]  }
   0x7   :  { %v6523_v15 = vld [vmem:[%s9839_s1 + $0x74] ss:$8 sps:$4 sm:$0x3f]   ;;  %v6164_v16 = vld [vmem:[%s9839_s1 + $0x70] ss:$8 sps:$4 sm:$0x3f]  }
   0x8   :  { %212 = vmatpush1.bf16.msra.mxu0 %v6491_v9  ;;  %395 = vmatpush1.bf16.msra.mxu1 %v6496_v10  ;;  %v6529_v17 = vsel %vm190_vm0, %v6161_v14, 0  ;;  %v6535_v18 = vsel %vm190_vm0, %v6164_v16, 0  ;;  %v6551_v20 = vld [vmem:[%s9840_s0 + $0x98] sm:$0xff]   ;;  %v6556_v21 = vld [vmem:[%s9839_s1 + $0x44] ss:$8 sps:$4 sm:$0xff]   ;;  %v6611_v28 = vld [vmem:[%s9840_s0 + $0xf0] sm:$0xff]  }
   0x9   :  { %5562 = vmatprep.subr.msk.bf16.mxu0 %vm190_vm0, %v6511_v13  ;;  %9918 = vst [vmem:[#allocation4_spill] sm:$0xff] %v6535_v18  ;;  %5585 = vmatprep.subr.msk.bf16.mxu1 %vm190_vm0, %v6523_v15  ;;  %v6561_v22 = vld [vmem:[%s9839_s1 + $0x40] ss:$8 sps:$4 sm:$0xff]   ;;  %v6566_v23 = vld [vmem:[%s9839_s1 + $0x64] ss:$8 sps:$4 sm:$0xff]   ;;  %v6627_v30 = vld [vmem:[%s9840_s0 + $0xf8] sm:$0xff]  }
   0xa   :  { %v6572_v24 = vld [vmem:[%s9839_s1 + $0x60] ss:$8 sps:$4 sm:$0xff]   ;;  %v6602_v27 = vld [vmem:[%s9839_s1 + $0x94] ss:$8 sps:$4 sm:$0x3f]   ;;  %vm4729_vm6 = vcmask 392192  }
   0xb   :  { %5521 = vmatmul.mubr.msk.bf16.vlgmr.msra.gmra.mxu0 %vm168_vm1, %v6503_v11  ;;  %5540 = vmatmul.mubr.msk.bf16.vlgmr.msra.gmra.mxu1 %vm168_vm1, %v6158_v12  ;;  %v6585_v25 = vld [vmem:[%s9840_s0 + $0xe8] sm:$0xff]   ;;  %v6591_v26 = vld [vmem:[%s9840_s0 + $0xa0] sm:$0xff]   ;;  %v6632_v31 = vld [vmem:[%s9840_s0 + $0xb0] sm:$0xff]   ;;  %vm4842_vm7 = vcmask 654336   ;;  %vm5305_vm8 = vcmask 1043456   ;;  %vm5301_vm9 = vcmask 982016  }
   0xc   :  { %581 = vmatpush1.bf16.msra.mxu0 %v6529_v17  ;;  %797 = vmatpush1.bf16.msra.mxu1 %v6535_v18  ;;  %v6616_v29 = vld [vmem:[%s9840_s0 + $0xa8] sm:$0xff]   ;;  %v6643_v32 = vld [vmem:[%s9840_s0 + $0x100] sm:$0xff]   ;;  %v6648_v33 = vld [vmem:[%s9840_s0 + $0xb8] sm:$0xff]  }
   0xd   :  { %239 = vmatprep.mubr.bf16.mxu0 %v9863_v1  ;;  %422 = vmatprep.mubr.bf16.mxu1 %v9863_v1  ;;  %v6659_v34 = vld [vmem:[%s9840_s0 + $0x108] sm:$0xff]   ;;  %v6664_v35 = vld [vmem:[%s9840_s0 + $0xc0] sm:$0xff]   ;;  %v6187_v36 = vld [vmem:[%s9839_s1 + $0x90] ss:$8 sps:$4 sm:$0x3f]  }
   0xe   :  { %582 = vmatprep.subr.bf16.mxu0 %v6556_v21  ;;  %798 = vmatprep.subr.bf16.mxu1 %v6566_v23  ;;  %v6678_v37 = vld [vmem:[%s9840_s0 + $0x8] sm:$0xff]   ;;  %v6683_v38 = vld [vmem:[%s9840_s0 + $0x50] sm:$0xff]   ;;  %v6686_v39 = vsel %vm190_vm0, %v6187_v36, 0  ;;  %v6716_v43 = vld [vmem:[%s9840_s0 + $0x58] sm:$0xff]  }
   0xf   :  { %9919 = vst [vmem:[#allocation5_spill] sm:$0xff] %v6686_v39  ;;  %v6691_v40 = vld [vmem:[%s9839_s1 + $0x84] ss:$8 sps:$4 sm:$0xff]   ;;  %v6702_v41 = vld [vmem:[%s9839_s1 + $0x80] ss:$8 sps:$4 sm:$0xff]   ;;  %v6711_v42 = vld [vmem:[%s9840_s0 + $0x10] sm:$0xff]  }
  0x10   :  { %583 = vmatpush1.bf16.msra.mxu0 %v6561_v22  ;;  %799 = vmatpush1.bf16.msra.mxu1 %v6572_v24  ;;  %9920 = vst [vmem:[#allocation6_spill] sm:$0xff] %v6691_v40  ;;  %9921 = vst [vmem:[#allocation7_spill] sm:$0xff] %v6702_v41  ;;  %v6733_v44 = vld [vmem:[%s9840_s0 + $0x18] sm:$0xff]   ;;  %v6738_v45 = vld [vmem:[%s9840_s0 + $0x60] sm:$0xff]  }
  0x11   :  { %5610 = vmatprep.subr.msk.bf16.mxu1 %vm190_vm0, %v6451_v0  ;;  %5602 = vmatprep.subr.msk.bf16.mxu0 %vm190_vm0, %v6602_v27  ;;  %v6749_v46 = vld [vmem:[%s9840_s0 + $0x20] sm:$0xff]   ;;  %v6754_v47 = vld [vmem:[%s9840_s0 + $0x68] sm:$0xff]   ;;  %v6770_v49 = vld [vmem:[%s9840_s0 + $0x70] sm:$0xff]  }
  0x12   :  { %v6765_v48 = vld [vmem:[%s9840_s0 + $0x28] sm:$0xff]   ;;  %9923 = vst [vmem:[#allocation9_spill] sm:$0xff] %v6770_v49  ;;  %v6781_v50 = vld [vmem:[%s9840_s0 + $0x30] sm:$0xff]   ;;  %v6786_v51 = vld [vmem:[%s9840_s0 + $0x78] sm:$0xff]  }
  0x13   :  { %5522 = vmatmul.mubr.msk.bf16.gmra.mxu0 %vm168_vm1, %v6546_v19  ;;  %5541 = vmatmul.mubr.msk.bf16.gmra.mxu1 %vm168_vm1, %v6551_v20  ;;  %9922 = vst [vmem:[#allocation8_spill] sm:$0xff] %v6765_v48  ;;  %9924 = vst [vmem:[#allocation10_spill] sm:$0xff] %v6781_v50  ;;  %v6797_v52 = vld [vmem:[%s9840_s0 + $0x38] sm:$0xff]   ;;  %v6802_v53 = vld [vmem:[%s9840_s0 + $0x80] sm:$0xff]  }
  0x14   :  { %249 = vmatprep.mubr.bf16.mxu0 %v9863_v1  ;;  %432 = vmatprep.mubr.bf16.mxu1 %v9863_v1  ;;  %9925 = vst [vmem:[#allocation11_spill] sm:$0xff] %v6786_v51  ;;  %9926 = vst [vmem:[#allocation12_spill] sm:$0xff] %v6797_v52  ;;  %v6859_v54 = vld [vmem:[%s9840_s0 + $0xc8] sm:$0xff]  }
  0x15   :  { %9927 = vst [vmem:[#allocation13_spill] sm:$0xff] %v6802_v53 }
  0x1b   :  { %5523 = vmatmul.mubr.msk.bf16.gmra.mxu0 %vm168_vm1, %v6585_v25  ;;  %5542 = vmatmul.mubr.msk.bf16.gmra.mxu1 %vm168_vm1, %v6591_v26 }
  0x1c   :  { %259 = vmatprep.mubr.bf16.mxu0 %v9863_v1  ;;  %442 = vmatprep.mubr.bf16.mxu1 %v9863_v1 }
  0x23   :  { %5524 = vmatmul.mubr.msk.bf16.gmra.mxu0 %vm168_vm1, %v6611_v28  ;;  %5543 = vmatmul.mubr.msk.bf16.gmra.mxu1 %vm168_vm1, %v6616_v29 }
  0x24   :  { %269 = vmatprep.mubr.bf16.mxu0 %v9863_v1  ;;  %452 = vmatprep.mubr.bf16.mxu1 %v9863_v1 }
  0x2b   :  { %5525 = vmatmul.mubr.msk.bf16.gmra.mxu0 %vm168_vm1, %v6627_v30  ;;  %5544 = vmatmul.mubr.msk.bf16.gmra.mxu1 %vm168_vm1, %v6632_v31 }
  0x2c   :  { %279 = vmatprep.mubr.bf16.mxu0 %v9863_v1  ;;  %462 = vmatprep.mubr.bf16.mxu1 %v9863_v1 }
  0x33   :  { %5526 = vmatmul.mubr.msk.bf16.gmra.mxu0 %vm168_vm1, %v6643_v32  ;;  %5545 = vmatmul.mubr.msk.bf16.gmra.mxu1 %vm168_vm1, %v6648_v33 }
  0x34   :  { %289 = vmatprep.mubr.bf16.mxu0 %v9863_v1  ;;  %472 = vmatprep.mubr.bf16.mxu1 %v9863_v1 }
  0x3b   :  { %5527 = vmatmul.mubr.msk.bf16.gmra.mxu0 %vm168_vm1, %v6659_v34  ;;  %5546 = vmatmul.mubr.msk.bf16.gmra.mxu1 %vm168_vm1, %v6664_v35 }
  0x3c   :  { %600 = vmatprep.mubr.bf16.mxu0 %v9863_v1  ;;  %816 = vmatprep.mubr.bf16.mxu1 %v9863_v1 }
  0x43   :  { %5563 = vmatmul.mubr.msk.bf16.vlgmr.msra.gmra.mxu0 %vm168_vm1, %v6678_v37  ;;  %5586 = vmatmul.mubr.msk.bf16.vlgmr.msra.gmra.mxu1 %vm168_vm1, %v6683_v38 }
  0x44   :  { %965 = vmatpush1.bf16.msra.mxu0 %v6686_v39  ;;  %1096 = vmatpush1.bf16.msra.mxu1 %v6476_v6 }
  0x45   :  { %610 = vmatprep.mubr.bf16.mxu0 %v9863_v1  ;;  %826 = vmatprep.mubr.bf16.mxu1 %v9863_v1 }
  0x46   :  { %966 = vmatprep.subr.bf16.mxu0 %v6691_v40  ;;  %1097 = vmatprep.subr.bf16.mxu1 %v6473_v5 }
  0x48   :  { %967 = vmatpush1.bf16.msra.mxu0 %v6702_v41  ;;  %1098 = vmatpush1.bf16.msra.mxu1 %v6491_v9 }
  0x49   :  { %5618 = vmatprep.subr.msk.bf16.mxu0 %vm190_vm0, %v6458_v2  ;;  %5626 = vmatprep.subr.msk.bf16.mxu1 %vm190_vm0, %v6511_v13 }
  0x4b   :  { %5564 = vmatmul.mubr.msk.bf16.gmra.mxu0 %vm168_vm1, %v6711_v42  ;;  %5587 = vmatmul.mubr.msk.bf16.gmra.mxu1 %vm168_vm1, %v6716_v43 }
  0x4c   :  { %620 = vmatprep.mubr.bf16.mxu0 %v9863_v1  ;;  %836 = vmatprep.mubr.bf16.mxu1 %v9863_v1 }
  0x53   :  { %5565 = vmatmul.mubr.msk.bf16.gmra.mxu0 %vm168_vm1, %v6733_v44  ;;  %5588 = vmatmul.mubr.msk.bf16.gmra.mxu1 %vm168_vm1, %v6738_v45 }
  0x54   :  { %630 = vmatprep.mubr.bf16.mxu0 %v9863_v1  ;;  %846 = vmatprep.mubr.bf16.mxu1 %v9863_v1 }
  0x5b   :  { %5566 = vmatmul.mubr.msk.bf16.gmra.mxu0 %vm168_vm1, %v6749_v46  ;;  %5589 = vmatmul.mubr.msk.bf16.gmra.mxu1 %vm168_vm1, %v6754_v47 }
  0x5c   :  { %640 = vmatprep.mubr.bf16.mxu0 %v9863_v1  ;;  %856 = vmatprep.mubr.bf16.mxu1 %v9863_v1 }
  0x63   :  { %5567 = vmatmul.mubr.msk.bf16.gmra.mxu0 %vm168_vm1, %v6765_v48  ;;  %5590 = vmatmul.mubr.msk.bf16.gmra.mxu1 %vm168_vm1, %v6770_v49 }
  0x64   :  { %650 = vmatprep.mubr.bf16.mxu0 %v9863_v1  ;;  %866 = vmatprep.mubr.bf16.mxu1 %v9863_v1 }
  0x6b   :  { %5568 = vmatmul.mubr.msk.bf16.gmra.mxu0 %vm168_vm1, %v6781_v50  ;;  %5591 = vmatmul.mubr.msk.bf16.gmra.mxu1 %vm168_vm1, %v6786_v51 }
  0x6c   :  { %660 = vmatprep.mubr.bf16.mxu0 %v9863_v1  ;;  %876 = vmatprep.mubr.bf16.mxu1 %v9863_v1 }
  0x73   :  { %5569 = vmatmul.mubr.msk.bf16.gmra.mxu0 %vm168_vm1, %v6797_v52  ;;  %5592 = vmatmul.mubr.msk.bf16.gmra.mxu1 %vm168_vm1, %v6802_v53 }
  0x74   :  { %984 = vmatprep.mubr.bf16.mxu0 %v9863_v1  ;;  %1115 = vmatprep.mubr.bf16.mxu1 %v9863_v1 }
  0x7b   :  { %5603 = vmatmul.mubr.msk.bf16.vlgmr.msra.gmra.mxu0 %vm168_vm1, %v6551_v20  ;;  %5611 = vmatmul.mubr.msk.bf16.vlgmr.msra.gmra.mxu1 %vm168_vm1, %v6678_v37 }
  0x7c   :  { %1199 = vmatpush1.bf16.msra.mxu0 %v6479_v7  ;;  %1302 = vmatpush1.bf16.msra.mxu1 %v6529_v17 }
  0x7d   :  { %994 = vmatprep.mubr.bf16.mxu0 %v9863_v1  ;;  %1125 = vmatprep.mubr.bf16.mxu1 %v9863_v1 }
  0x7e   :  { %1200 = vmatprep.subr.bf16.mxu0 %v6484_v8  ;;  %1303 = vmatprep.subr.bf16.mxu1 %v6556_v21 }
  0x80   :  { %1201 = vmatpush1.bf16.msra.mxu0 %v6496_v10  ;;  %1304 = vmatpush1.bf16.msra.mxu1 %v6561_v22 }
  0x81   :  { %5634 = vmatprep.subr.msk.bf16.mxu0 %vm190_vm0, %v6523_v15  ;;  %5643 = vmatprep.subr.msk.bf16.mxu1 %vm190_vm0, %v6602_v27 }
  0x83   :  { %5604 = vmatmul.mubr.msk.bf16.gmra.mxu0 %vm168_vm1, %v6591_v26  ;;  %5612 = vmatmul.mubr.msk.bf16.gmra.mxu1 %vm168_vm1, %v6711_v42 }
  0x84   :  { %1004 = vmatprep.mubr.bf16.mxu0 %v9863_v1  ;;  %1135 = vmatprep.mubr.bf16.mxu1 %v9863_v1 }
  0x8b   :  { %5605 = vmatmul.mubr.msk.bf16.gmra.mxu0 %vm168_vm1, %v6616_v29  ;;  %5613 = vmatmul.mubr.msk.bf16.gmra.mxu1 %vm168_vm1, %v6733_v44 }
  0x8c   :  { %1014 = vmatprep.mubr.bf16.mxu0 %v9863_v1  ;;  %1145 = vmatprep.mubr.bf16.mxu1 %v9863_v1 }
  0x93   :  { %5606 = vmatmul.mubr.msk.bf16.gmra.mxu0 %vm168_vm1, %v6632_v31  ;;  %5614 = vmatmul.mubr.msk.bf16.gmra.mxu1 %vm168_vm1, %v6749_v46 }
  0x94   :  { %1024 = vmatprep.mubr.bf16.mxu0 %v9863_v1  ;;  %1155 = vmatprep.mubr.bf16.mxu1 %v9863_v1 }
  0x9b   :  { %5607 = vmatmul.mubr.msk.bf16.gmra.mxu0 %vm168_vm1, %v6648_v33  ;;  %5615 = vmatmul.mubr.msk.bf16.gmra.mxu1 %vm168_vm1, %v6765_v48 }
  0x9c   :  { %1034 = vmatprep.mubr.bf16.mxu0 %v9863_v1  ;;  %1165 = vmatprep.mubr.bf16.mxu1 %v9863_v1 }
  0xa3   :  { %5608 = vmatmul.mubr.msk.bf16.gmra.mxu0 %vm168_vm1, %v6664_v35  ;;  %5616 = vmatmul.mubr.msk.bf16.gmra.mxu1 %vm168_vm1, %v6781_v50 }
  0xa4   :  { %1044 = vmatprep.mubr.bf16.mxu0 %v9863_v1  ;;  %1175 = vmatprep.mubr.bf16.mxu1 %v9863_v1 }
  0xab   :  { %5609 = vmatmul.mubr.msk.bf16.gmra.mxu0 %vm168_vm1, %v6859_v54  ;;  %5617 = vmatmul.mubr.msk.bf16.gmra.mxu1 %vm168_vm1, %v6797_v52 }
  0xac   :  { %1218 = vmatprep.mubr.bf16.mxu0 %v9863_v1  ;;  %1321 = vmatprep.mubr.bf16.mxu1 %v9863_v1 }
  0xb3   :  { %5619 = vmatmul.mubr.msk.bf16.vlgmr.msra.gmra.mxu0 %vm168_vm1, %v6503_v11  ;;  %5627 = vmatmul.mubr.msk.bf16.vlgmr.msra.gmra.mxu1 %vm168_vm1, %v6683_v38 }
  0xb4   :  { %1433 = vmatpush1.bf16.msra.mxu0 %v6535_v18  ;;  %1572 = vmatpush1.bf16.msra.mxu1 %v6686_v39 }
  0xb5   :  { %1228 = vmatprep.mubr.bf16.mxu0 %v9863_v1  ;;  %1331 = vmatprep.mubr.bf16.mxu1 %v9863_v1 }
  0xb6   :  { %1434 = vmatprep.subr.bf16.mxu0 %v6566_v23  ;;  %1573 = vmatprep.subr.bf16.mxu1 %v6691_v40 }
  0xb8   :  { %1435 = vmatpush1.bf16.msra.mxu0 %v6572_v24  ;;  %1574 = vmatpush1.bf16.msra.mxu1 %v6702_v41 }
  0xb9   :  { %5651 = vmatprep.subr.msk.bf16.mxu0 %vm190_vm0, %v6451_v0  ;;  %5659 = vmatprep.subr.msk.bf16.mxu1 %vm190_vm0, %v6458_v2 }
  0xbb   :  { %5620 = vmatmul.mubr.msk.bf16.gmra.mxu0 %vm168_vm1, %v6546_v19  ;;  %5628 = vmatmul.mubr.msk.bf16.gmra.mxu1 %vm168_vm1, %v6716_v43 }
  0xbc   :  { %1238 = vmatprep.mubr.bf16.mxu0 %v9863_v1  ;;  %1341 = vmatprep.mubr.bf16.mxu1 %v9863_v1 }
  0xc3   :  { %5621 = vmatmul.mubr.msk.bf16.gmra.mxu0 %vm168_vm1, %v6585_v25  ;;  %5629 = vmatmul.mubr.msk.bf16.gmra.mxu1 %vm168_vm1, %v6738_v45 }
  0xc4   :  { %1248 = vmatprep.mubr.bf16.mxu0 %v9863_v1  ;;  %1351 = vmatprep.mubr.bf16.mxu1 %v9863_v1 }
  0xcb   :  { %v231_v55 = vpop.f32.mrf.mxu0  ;;  %v414_v56 = vpop.f32.mrf.mxu1  ;;  %5622 = vmatmul.mubr.msk.bf16.gmra.mxu0 %vm168_vm1, %v6611_v28  ;;  %5630 = vmatmul.mubr.msk.bf16.gmra.mxu1 %vm168_vm1, %v6754_v47 }
  0xcc   :  { %v6899_v57 = vadd.f32 %v414_v56, %v231_v55  ;;  %1258 = vmatprep.mubr.bf16.mxu0 %v9863_v1  ;;  %1361 = vmatprep.mubr.bf16.mxu1 %v9863_v1 }
  0xcd   :  { %v233_v58 = vpop.f32.mrf.mxu0  ;;  %v416_v59 = vpop.f32.mrf.mxu1 }
  0xce   :  { %v6903_v60 = vadd.f32 %v416_v59, %v233_v58 }
  0xcf   :  { %v235_v61 = vpop.f32.mrf.mxu0  ;;  %v418_v62 = vpop.f32.mrf.mxu1 }
  0xd0   :  { %v6905_v63 = vadd.f32 %v418_v62, %v235_v61 }
  0xd1   :  { %v237_v2 = vpop.f32.mrf.mxu0  ;;  %v420_v3 = vpop.f32.mrf.mxu1 }
  0xd2   :  { %v6907_v4 = vadd.f32 %v420_v3, %v237_v2 }
  0xd3   :  { %v241_v11 = vpop.f32.mrf.mxu0  ;;  %v424_v12 = vpop.f32.mrf.mxu1  ;;  %5623 = vmatmul.mubr.msk.bf16.gmra.mxu0 %vm168_vm1, %v6627_v30  ;;  %5631 = vmatmul.mubr.msk.bf16.gmra.mxu1 %vm168_vm1, %v6770_v49 }
  0xd4   :  { %v6913_v14 = vadd.f32 %v424_v12, %v241_v11  ;;  %1268 = vmatprep.mubr.bf16.mxu0 %v9863_v1  ;;  %1371 = vmatprep.mubr.bf16.mxu1 %v9863_v1 }
  0xd5   :  { %v243_v16 = vpop.f32.mrf.mxu0  ;;  %v426_v36 = vpop.f32.mrf.mxu1 }
  0xd6   :  { %v6917_v55 = vadd.f32 %v426_v36, %v243_v16 }
  0xd7   :  { %v245_v56 = vpop.f32.mrf.mxu0  ;;  %v428_v58 = vpop.f32.mrf.mxu1 }
  0xd8   :  { %v6919_v59 = vadd.f32 %v428_v58, %v245_v56 }
  0xd9   :  { %v247_v61 = vpop.f32.mrf.mxu0  ;;  %v430_v62 = vpop.f32.mrf.mxu1 }
  0xda   :  { %v6921_v2 = vadd.f32 %v430_v62, %v247_v61 }
  0xdb   :  { %v251_v3 = vpop.f32.mrf.mxu0  ;;  %v434_v41 = vpop.f32.mrf.mxu1  ;;  %5624 = vmatmul.mubr.msk.bf16.gmra.mxu0 %vm168_vm1, %v6643_v32  ;;  %5632 = vmatmul.mubr.msk.bf16.gmra.mxu1 %vm168_vm1, %v6786_v51 }
  0xdc   :  { %v6927_v11 = vadd.f32 %v434_v41, %v251_v3  ;;  %1278 = vmatprep.mubr.bf16.mxu0 %v9863_v1  ;;  %1381 = vmatprep.mubr.bf16.mxu1 %v9863_v1 }
  0xdd   :  { %v253_v12 = vpop.f32.mrf.mxu0  ;;  %v436_v16 = vpop.f32.mrf.mxu1 }
  0xde   :  { %v6931_v36 = vadd.f32 %v436_v16, %v253_v12 }
  0xdf   :  { %v255_v56 = vpop.f32.mrf.mxu0  ;;  %v438_v58 = vpop.f32.mrf.mxu1 }
  0xe0   :  { %v6933_v61 = vadd.f32 %v438_v58, %v255_v56 }
  0xe1   :  { %v257_v62 = vpop.f32.mrf.mxu0  ;;  %v440_v40 = vpop.f32.mrf.mxu1 }
  0xe2   :  { %v6935_v39 = vadd.f32 %v440_v40, %v257_v62 }
  0xe3   :  { %v261_v52 = vpop.f32.mrf.mxu0  ;;  %v444_v50 = vpop.f32.mrf.mxu1  ;;  %5625 = vmatmul.mubr.msk.bf16.gmra.mxu0 %vm168_vm1, %v6659_v34  ;;  %5633 = vmatmul.mubr.msk.bf16.gmra.mxu1 %vm168_vm1, %v6802_v53 }
  0xe4   :  { %v6941_v41 = vadd.f32 %v444_v50, %v261_v52  ;;  %1452 = vmatprep.mubr.bf16.mxu0 %v9863_v1  ;;  %1591 = vmatprep.mubr.bf16.mxu1 %v9863_v1 }
  0xe5   :  { %v263_v3 = vpop.f32.mrf.mxu0  ;;  %v446_v12 = vpop.f32.mrf.mxu1 }
  0xe6   :  { %v6945_v16 = vadd.f32 %v446_v12, %v263_v3 }
  0xe7   :  { %v265_v40 = vpop.f32.mrf.mxu0  ;;  %v448_v56 = vpop.f32.mrf.mxu1 }
  0xe8   :  { %v6947_v58 = vadd.f32 %v448_v56, %v265_v40 }
  0xe9   :  { %v267_v62 = vpop.f32.mrf.mxu0  ;;  %v450_v51 = vpop.f32.mrf.mxu1 }
  0xea   :  { %v6949_v48 = vadd.f32 %v450_v51, %v267_v62 }
  0xeb   :  { %v271_v49 = vpop.f32.mrf.mxu0  ;;  %v454_v53 = vpop.f32.mrf.mxu1  ;;  %5635 = vmatmul.mubr.msk.bf16.vlgmr.msra.gmra.mxu0 %vm168_vm1, %v6551_v20  ;;  %5644 = vmatmul.mubr.msk.bf16.vlgmr.msra.gmra.mxu1 %vm168_vm1, %v6546_v19 }
  0xec   :  { %v6955_v50 = vadd.f32 %v454_v53, %v271_v49  ;;  %1703 = vmatpush1.bf16.msra.mxu0 %v6476_v6  ;;  %1806 = vmatpush1.bf16.msra.mxu1 %v6479_v7 }
  0xed   :  { %v273_v52 = vpop.f32.mrf.mxu0  ;;  %v456_v3 = vpop.f32.mrf.mxu1  ;;  %1462 = vmatprep.mubr.bf16.mxu0 %v9863_v1  ;;  %1601 = vmatprep.mubr.bf16.mxu1 %v9863_v1 }
  0xee   :  { %v6961_v51 = vadd.f32 %v456_v3, %v273_v52  ;;  %1704 = vmatprep.subr.bf16.mxu0 %v6473_v5  ;;  %1807 = vmatprep.subr.bf16.mxu1 %v6484_v8 }
  0xef   :  { %v275_v20 = vpop.f32.mrf.mxu0  ;;  %v458_v19 = vpop.f32.mrf.mxu1 }
  0xf0   :  { %v6965_v49 = vadd.f32 %v458_v19, %v275_v20  ;;  %1705 = vmatpush1.bf16.msra.mxu0 %v6491_v9  ;;  %1808 = vmatpush1.bf16.msra.mxu1 %v6496_v10 }
  0xf1   :  { %v277_v53 = vpop.f32.mrf.mxu0  ;;  %v460_v12 = vpop.f32.mrf.mxu1  ;;  %5667 = vmatprep.subr.msk.bf16.mxu0 %vm190_vm0, %v6511_v13  ;;  %5675 = vmatprep.subr.msk.bf16.mxu1 %vm190_vm0, %v6523_v15 }
  0xf2   :  { %v6973_v40 = vadd.f32 %v460_v12, %v277_v53 }
  0xf3   :  { %v281_v5 = vpop.f32.mrf.mxu0  ;;  %v464_v8 = vpop.f32.mrf.mxu1  ;;  %5636 = vmatmul.mubr.msk.bf16.gmra.mxu0 %vm168_vm1, %v6591_v26  ;;  %5645 = vmatmul.mubr.msk.bf16.gmra.mxu1 %vm168_vm1, %v6585_v25 }
  0xf4   :  { %v6979_v9 = vadd.f32 %v464_v8, %v281_v5  ;;  %1472 = vmatprep.mubr.bf16.mxu0 %v9863_v1  ;;  %1611 = vmatprep.mubr.bf16.mxu1 %v9863_v1 }
  0xf5   :  { %v283_v10 = vpop.f32.mrf.mxu0  ;;  %v466_v13 = vpop.f32.mrf.mxu1 }
  0xf6   :  { %v6983_v56 = vadd.f32 %v466_v13, %v283_v10 }
  0xf7   :  { %v285_v15 = vpop.f32.mrf.mxu0  ;;  %v468_v62 = vpop.f32.mrf.mxu1 }
  0xf8   :  { %v6985_v52 = vadd.f32 %v468_v62, %v285_v15 }
  0xf9   :  { %v287_v3 = vpop.f32.mrf.mxu0  ;;  %v470_v20 = vpop.f32.mrf.mxu1 }
  0xfa   :  { %v6987_v26 = vadd.f32 %v470_v20, %v287_v3 }
  0xfb   :  { %v291_v19 = vpop.f32.mrf.mxu0  ;;  %v474_v25 = vpop.f32.mrf.mxu1  ;;  %5637 = vmatmul.mubr.msk.bf16.gmra.mxu0 %vm168_vm1, %v6616_v29  ;;  %5646 = vmatmul.mubr.msk.bf16.gmra.mxu1 %vm168_vm1, %v6611_v28 }
  0xfc   :  { %v6993_v53 = vadd.f32 %v474_v25, %v291_v19  ;;  %1482 = vmatprep.mubr.bf16.mxu0 %v9863_v1  ;;  %1621 = vmatprep.mubr.bf16.mxu1 %v9863_v1 }
  0xfd   :  { %v293_v12 = vpop.f32.mrf.mxu0  ;;  %v476_v5 = vpop.f32.mrf.mxu1 }
  0xfe   :  { %v6997_v8 = vadd.f32 %v476_v5, %v293_v12 }
  0xff   :  { %v295_v10 = vpop.f32.mrf.mxu0  ;;  %v478_v13 = vpop.f32.mrf.mxu1 }
 0x100   :  { %v6999_v15 = vadd.f32 %v478_v13, %v295_v10 }
 0x101   :  { %v297_v62 = vpop.f32.mrf.mxu0  ;;  %v480_v3 = vpop.f32.mrf.mxu1 }
 0x102   :  { %v7001_v29 = vadd.f32 %v480_v3, %v297_v62 }
 0x103   :  { %v602_v20 = vpop.f32.mrf.mxu0  ;;  %v818_v28 = vpop.f32.mrf.mxu1  ;;  %5638 = vmatmul.mubr.msk.bf16.gmra.mxu0 %vm168_vm1, %v6632_v31  ;;  %5647 = vmatmul.mubr.msk.bf16.gmra.mxu1 %vm168_vm1, %v6627_v30 }
 0x104   :  { %v671_v19 = vadd.f32 %v602_v20, %v6899_v57  ;;  %1492 = vmatprep.mubr.bf16.mxu0 %v9863_v1  ;;  %1631 = vmatprep.mubr.bf16.mxu1 %v9863_v1 }
 0x105   :  { %v604_v25 = vpop.f32.mrf.mxu0  ;;  %v820_v12 = vpop.f32.mrf.mxu1 }
 0x106   :  { %v7010_v5 = vadd.f32 %v818_v28, %v671_v19  ;;  %v672_v10 = vadd.f32 %v604_v25, %v6903_v60  ;;  %v9928_v19 = vmov 0  }
 0x107   :  { %v606_v13 = vpop.f32.mrf.mxu0  ;;  %v822_v62 = vpop.f32.mrf.mxu1 }
 0x108   :  { %v7013_v3 = vadd.f32 %v820_v12, %v672_v10  ;;  %v673_v31 = vadd.f32 %v606_v13, %v6905_v63 }
 0x109   :  { %v608_v7 = vpop.f32.mrf.mxu0  ;;  %v824_v30 = vpop.f32.mrf.mxu1 }
 0x10a   :  { %v7016_v6 = vadd.f32 %v822_v62, %v673_v31  ;;  %v674_v57 = vadd.f32 %v608_v7, %v6907_v4 }
 0x10b   :  { %v612_v20 = vpop.f32.mrf.mxu0  ;;  %v828_v1 = vpop.f32.mrf.mxu1  ;;  %5639 = vmatmul.mubr.msk.bf16.gmra.mxu0 %vm168_vm1, %v6648_v33  ;;  %5648 = vmatmul.mubr.msk.bf16.gmra.mxu1 %vm168_vm1, %v6643_v32 }
 0x10c   :  { %v7023_v60 = vadd.f32 %v824_v30, %v674_v57  ;;  %v675_v28 = vadd.f32 %v612_v20, %v6913_v14  ;;  %1502 = vmatprep.mubr.bf16.mxu0 %v9928_v19  ;;  %1641 = vmatprep.mubr.bf16.mxu1 %v9928_v19 }
 0x10d   :  { %v614_v63 = vpop.f32.mrf.mxu0  ;;  %v830_v25 = vpop.f32.mrf.mxu1 }
 0x10e   :  { %v7028_v12 = vadd.f32 %v828_v1, %v675_v28  ;;  %v676_v7 = vadd.f32 %v614_v63, %v6917_v55 }
 0x10f   :  { %v616_v4 = vpop.f32.mrf.mxu0  ;;  %v832_v10 = vpop.f32.mrf.mxu1 }
 0x110   :  { %v7031_v33 = vadd.f32 %v830_v25, %v676_v7  ;;  %v677_v32 = vadd.f32 %v616_v4, %v6919_v59 }
 0x111   :  { %v618_v13 = vpop.f32.mrf.mxu0  ;;  %v834_v62 = vpop.f32.mrf.mxu1 }
 0x112   :  { %v7034_v31 = vadd.f32 %v832_v10, %v677_v32  ;;  %v678_v14 = vadd.f32 %v618_v13, %v6921_v2 }
 0x113   :  { %v622_v30 = vpop.f32.mrf.mxu0  ;;  %v838_v57 = vpop.f32.mrf.mxu1  ;;  %5640 = vmatmul.mubr.msk.bf16.gmra.mxu0 %vm168_vm1, %v6664_v35  ;;  %5649 = vmatmul.mubr.msk.bf16.gmra.mxu1 %vm168_vm1, %v6659_v34  ;;  %v7052_v34 = vld [vmem:[%s9840_s0 + $0x110] sm:$0xff]  }
 0x114   :  { %v7041_v1 = vadd.f32 %v834_v62, %v678_v14  ;;  %v679_v55 = vadd.f32 %v622_v30, %v6927_v11  ;;  %1512 = vmatprep.mubr.bf16.mxu0 %v9928_v19  ;;  %1651 = vmatprep.mubr.bf16.mxu1 %v9928_v19 }
 0x115   :  { %v624_v59 = vpop.f32.mrf.mxu0  ;;  %v840_v20 = vpop.f32.mrf.mxu1 }
 0x116   :  { %v7046_v28 = vadd.f32 %v838_v57, %v679_v55  ;;  %v680_v2 = vadd.f32 %v624_v59, %v6931_v36 }
 0x117   :  { %v626_v63 = vpop.f32.mrf.mxu0  ;;  %v842_v25 = vpop.f32.mrf.mxu1 }
 0x118   :  { %v7054_v35 = vadd.f32 %v840_v20, %v680_v2  ;;  %v681_v11 = vadd.f32 %v626_v63, %v6933_v61 }
 0x119   :  { %v628_v7 = vpop.f32.mrf.mxu0  ;;  %v844_v4 = vpop.f32.mrf.mxu1 }
 0x11a   :  { %v7057_v10 = vadd.f32 %v842_v25, %v681_v11  ;;  %v682_v32 = vadd.f32 %v628_v7, %v6935_v39 }
 0x11b   :  { %v632_v13 = vpop.f32.mrf.mxu0  ;;  %v848_v62 = vpop.f32.mrf.mxu1  ;;  %5641 = vmatmul.mubr.msk.bf16.gmra.mxu0 %vm168_vm1, %v6859_v54  ;;  %5650 = vmatmul.mubr.msk.bf16.gmra.mxu1 %vm168_vm1, %v7052_v34 }
 0x11c   :  { %v7064_v36 = vadd.f32 %v844_v4, %v682_v32  ;;  %v683_v14 = vadd.f32 %v632_v13, %v6941_v41  ;;  %1722 = vmatprep.mubr.bf16.mxu0 %v9928_v19  ;;  %1825 = vmatprep.mubr.bf16.mxu1 %v9928_v19 }
 0x11d   :  { %v634_v61 = vpop.f32.mrf.mxu0  ;;  %v850_v30 = vpop.f32.mrf.mxu1 }
 0x11e   :  { %v7069_v57 = vadd.f32 %v848_v62, %v683_v14  ;;  %v684_v39 = vadd.f32 %v634_v61, %v6945_v16 }
 0x11f   :  { %v636_v55 = vpop.f32.mrf.mxu0  ;;  %v852_v59 = vpop.f32.mrf.mxu1 }
 0x120   :  { %v7072_v20 = vadd.f32 %v850_v30, %v684_v39  ;;  %v685_v2 = vadd.f32 %v636_v55, %v6947_v58 }
 0x121   :  { %v638_v63 = vpop.f32.mrf.mxu0  ;;  %v854_v25 = vpop.f32.mrf.mxu1 }
 0x122   :  { %v7075_v11 = vadd.f32 %v852_v59, %v685_v2  ;;  %v686_v41 = vadd.f32 %v638_v63, %v6949_v48 }
 0x123   :  { %v642_v7 = vpop.f32.mrf.mxu0  ;;  %v858_v4 = vpop.f32.mrf.mxu1  ;;  %5652 = vmatmul.mubr.msk.bf16.vlgmr.msra.gmra.mxu0 %vm168_vm1, %v6683_v38  ;;  %5660 = vmatmul.mubr.msk.bf16.vlgmr.msra.gmra.mxu1 %vm168_vm1, %v6678_v37 }
 0x124   :  { %v7082_v16 = vadd.f32 %v854_v25, %v686_v41  ;;  %v687_v32 = vadd.f32 %v642_v7, %v6955_v50  ;;  %1909 = vmatpush1.bf16.msra.mxu0 %v6529_v17  ;;  %2040 = vmatpush1.bf16.msra.mxu1 %v6535_v18  ;;  %v7420_v18 = vld [vmem:[%s9840_s0 + $0x100] sm:$0xff]  }
 0x125   :  { %v644_v58 = vpop.f32.mrf.mxu0  ;;  %v860_v13 = vpop.f32.mrf.mxu1  ;;  %1732 = vmatprep.mubr.bf16.mxu0 %v9928_v19  ;;  %1835 = vmatprep.mubr.bf16.mxu1 %v9928_v19  ;;  %9972 = vst [vmem:[#allocation38_spill] sm:$0xff] %v7420_v18 }
 0x126   :  { %v7089_v48 = vadd.f32 %v858_v4, %v687_v32  ;;  %v688_v38 = vadd.f32 %v644_v58, %v6961_v51  ;;  %1910 = vmatprep.subr.bf16.mxu0 %v6556_v21  ;;  %2041 = vmatprep.subr.bf16.mxu1 %v6566_v23 }
 0x127   :  { %v646_v37 = vpop.f32.mrf.mxu0  ;;  %v862_v50 = vpop.f32.mrf.mxu1 }
 0x128   :  { %v7094_v62 = vadd.f32 %v860_v13, %v688_v38  ;;  %v689_v14 = vadd.f32 %v646_v37, %v6965_v49  ;;  %1911 = vmatpush1.bf16.msra.mxu0 %v6561_v22  ;;  %2042 = vmatpush1.bf16.msra.mxu1 %v6572_v24 }
 0x129   :  { %v648_v61 = vpop.f32.mrf.mxu0  ;;  %v864_v30 = vpop.f32.mrf.mxu1  ;;  %5684 = vmatprep.subr.msk.bf16.mxu0 %vm190_vm0, %v6602_v27  ;;  %5692 = vmatprep.subr.msk.bf16.mxu1 %vm190_vm0, %v6451_v0 }
 0x12a   :  { %v7103_v21 = vadd.f32 %v862_v50, %v689_v14  ;;  %v690_v23 = vadd.f32 %v648_v61, %v6973_v40 }
 0x12b   :  { %v652_v51 = vpop.f32.mrf.mxu0  ;;  %v868_v39 = vpop.f32.mrf.mxu1  ;;  %5653 = vmatmul.mubr.msk.bf16.gmra.mxu0 %vm168_vm1, %v6716_v43  ;;  %5661 = vmatmul.mubr.msk.bf16.gmra.mxu1 %vm168_vm1, %v6711_v42 }
 0x12c   :  { %v7110_v22 = vadd.f32 %v864_v30, %v690_v23  ;;  %v691_v24 = vadd.f32 %v652_v51, %v6979_v9  ;;  %1742 = vmatprep.mubr.bf16.mxu0 %v9928_v19  ;;  %1845 = vmatprep.mubr.bf16.mxu1 %v9928_v19 }
 0x12d   :  { %v654_v0 = vpop.f32.mrf.mxu0  ;;  %v870_v27 = vpop.f32.mrf.mxu1 }
 0x12e   :  { %v7115_v49 = vadd.f32 %v868_v39, %v691_v24  ;;  %v692_v40 = vadd.f32 %v654_v0, %v6983_v56 }
 0x12f   :  { %v656_v55 = vpop.f32.mrf.mxu0  ;;  %v872_v59 = vpop.f32.mrf.mxu1 }
 0x130   :  { %v7118_v43 = vadd.f32 %v870_v27, %v692_v40  ;;  %v693_v42 = vadd.f32 %v656_v55, %v6985_v52  ;;  %v9929_v55 = vld [vmem:[#allocation9_spill] sm:$0xff] }
 0x131   :  { %v658_v2 = vpop.f32.mrf.mxu0  ;;  %v874_v63 = vpop.f32.mrf.mxu1 }
 0x132   :  { %v7121_v25 = vadd.f32 %v872_v59, %v693_v42  ;;  %v694_v9 = vadd.f32 %v658_v2, %v6987_v26 }
 0x133   :  { %v662_v41 = vpop.f32.mrf.mxu0  ;;  %v878_v7 = vpop.f32.mrf.mxu1  ;;  %5654 = vmatmul.mubr.msk.bf16.gmra.mxu0 %vm168_vm1, %v6738_v45  ;;  %5662 = vmatmul.mubr.msk.bf16.gmra.mxu1 %vm168_vm1, %v6733_v44 }
 0x134   :  { %v7128_v56 = vadd.f32 %v874_v63, %v694_v9  ;;  %v695_v4 = vadd.f32 %v662_v41, %v6993_v53  ;;  %1752 = vmatprep.mubr.bf16.mxu0 %v9928_v19  ;;  %1855 = vmatprep.mubr.bf16.mxu1 %v9928_v19 }
 0x135   :  { %v664_v52 = vpop.f32.mrf.mxu0  ;;  %v880_v32 = vpop.f32.mrf.mxu1 }
 0x136   :  { %v7133_v58 = vadd.f32 %v878_v7, %v695_v4  ;;  %v696_v26 = vadd.f32 %v664_v52, %v6997_v8 }
 0x137   :  { %v666_v13 = vpop.f32.mrf.mxu0  ;;  %v882_v38 = vpop.f32.mrf.mxu1 }
 0x138   :  { %v7136_v45 = vadd.f32 %v880_v32, %v696_v26  ;;  %v697_v44 = vadd.f32 %v666_v13, %v6999_v15  ;;  %v9933_v32 = vld [vmem:[#allocation11_spill] sm:$0xff] }
 0x139   :  { %v668_v37 = vpop.f32.mrf.mxu0  ;;  %v884_v50 = vpop.f32.mrf.mxu1 }
 0x13a   :  { %v7139_v14 = vadd.f32 %v882_v38, %v697_v44  ;;  %v698_v53 = vadd.f32 %v668_v37, %v7001_v29 }
 0x13b   :  { %v986_v61 = vpop.f32.mrf.mxu0  ;;  %v7142_v30 = vpop.f32.mrf.mxu1  ;;  %5655 = vmatmul.mubr.msk.bf16.gmra.mxu0 %vm168_vm1, %v6754_v47  ;;  %5663 = vmatmul.mubr.msk.bf16.gmra.mxu1 %vm168_vm1, %v6749_v46 }
 0x13c   :  { %v7148_v8 = vadd.f32 %v884_v50, %v698_v53  ;;  %v7151_v23 = vadd.f32 %v986_v61, %v7010_v5  ;;  %1762 = vmatprep.mubr.bf16.mxu0 %v9928_v19  ;;  %1865 = vmatprep.mubr.bf16.mxu1 %v9928_v19 }
 0x13d   :  { %v988_v15 = vpop.f32.mrf.mxu0  ;;  %v7155_v29 = vpop.f32.mrf.mxu1 }
 0x13e   :  { %v7158_v51 = vadd.f32 %v988_v15, %v7013_v3  ;;  %v9930_v3 = vld [vmem:[#allocation8_spill] sm:$0xff] }
 0x13f   :  { %v990_v39 = vpop.f32.mrf.mxu0  ;;  %v7160_v47 = vpop.f32.mrf.mxu1 }
 0x140   :  { %v7163_v46 = vadd.f32 %v990_v39, %v7016_v6  ;;  %v9941_v39 = vld [vmem:[#allocation13_spill] sm:$0xff] }
 0x141   :  { %v992_v24 = vpop.f32.mrf.mxu0  ;;  %v7165_v0 = vpop.f32.mrf.mxu1 }
 0x142   :  { %v7168_v5 = vadd.f32 %v992_v24, %v7023_v60 }
 0x143   :  { %v996_v27 = vpop.f32.mrf.mxu0  ;;  %v7170_v40 = vpop.f32.mrf.mxu1  ;;  %5656 = vmatmul.mubr.msk.bf16.gmra.mxu0 %vm168_vm1, %v9929_v55  ;;  %5664 = vmatmul.mubr.msk.bf16.gmra.mxu1 %vm168_vm1, %v9930_v3 }
 0x144   :  { %v7177_v59 = vadd.f32 %v996_v27, %v7028_v12  ;;  %1772 = vmatprep.mubr.bf16.mxu0 %v9928_v19  ;;  %1875 = vmatprep.mubr.bf16.mxu1 %v9928_v19 }
 0x145   :  { %v998_v6 = vpop.f32.mrf.mxu0  ;;  %v7181_v42 = vpop.f32.mrf.mxu1 }
 0x146   :  { %v7184_v60 = vadd.f32 %v998_v6, %v7031_v33  ;;  %v9934_v33 = vld [vmem:[#allocation10_spill] sm:$0xff] }
 0x147   :  { %v1000_v2 = vpop.f32.mrf.mxu0  ;;  %v7186_v63 = vpop.f32.mrf.mxu1 }
 0x148   :  { %v7189_v9 = vadd.f32 %v1000_v2, %v7034_v31 }
 0x149   :  { %v1002_v41 = vpop.f32.mrf.mxu0  ;;  %v7191_v7 = vpop.f32.mrf.mxu1 }
 0x14a   :  { %9931 = vst [vmem:[#allocation9_spill] sm:$0xff] %v7189_v9  ;;  %v7194_v12 = vadd.f32 %v1002_v41, %v7041_v1 }
 0x14b   :  { %v1006_v4 = vpop.f32.mrf.mxu0  ;;  %v7196_v52 = vpop.f32.mrf.mxu1  ;;  %5657 = vmatmul.mubr.msk.bf16.gmra.mxu0 %vm168_vm1, %v9933_v32  ;;  %5665 = vmatmul.mubr.msk.bf16.gmra.mxu1 %vm168_vm1, %v9934_v33  ;;  %v9953_v33 = vld [vmem:[#allocation5_spill] sm:$0xff] }
 0x14c   :  { %9932 = vst [vmem:[#allocation8_spill] sm:$0xff] %v7194_v12  ;;  %v7203_v26 = vadd.f32 %v1006_v4, %v7046_v28  ;;  %1782 = vmatprep.mubr.bf16.mxu0 %v9928_v19  ;;  %1885 = vmatprep.mubr.bf16.mxu1 %v9928_v19 }
 0x14d   :  { %v1008_v31 = vpop.f32.mrf.mxu0  ;;  %v7207_v13 = vpop.f32.mrf.mxu1 }
 0x14e   :  { %9935 = vst [vmem:[#allocation11_spill] sm:$0xff] %v7203_v26  ;;  %v7210_v1 = vadd.f32 %v1008_v31, %v7054_v35  ;;  %v9942_v35 = vld [vmem:[#allocation12_spill] sm:$0xff]  ;;  %v9954_v31 = vld [vmem:[#allocation2_spill] sm:$0xff] }
 0x14f   :  { %v1010_v38 = vpop.f32.mrf.mxu0  ;;  %v7212_v44 = vpop.f32.mrf.mxu1 }
 0x150   :  { %9936 = vst [vmem:[#allocation10_spill] sm:$0xff] %v7210_v1  ;;  %v7215_v37 = vadd.f32 %v1010_v38, %v7057_v10 }
 0x151   :  { %v1012_v50 = vpop.f32.mrf.mxu0  ;;  %v7217_v53 = vpop.f32.mrf.mxu1 }
 0x152   :  { %9937 = vst [vmem:[#allocation14_spill] sm:$0xff] %v7215_v37  ;;  %9938 = vst [vmem:[#allocation15_spill] sm:$0xff] %v7217_v53  ;;  %v7220_v28 = vadd.f32 %v1012_v50, %v7064_v36 }
 0x153   :  { %v1016_v61 = vpop.f32.mrf.mxu0  ;;  %v7222_v15 = vpop.f32.mrf.mxu1  ;;  %5658 = vmatmul.mubr.msk.bf16.gmra.mxu0 %vm168_vm1, %v9941_v39  ;;  %5666 = vmatmul.mubr.msk.bf16.gmra.mxu1 %vm168_vm1, %v9942_v35  ;;  %v9957_v39 = vld [vmem:[#allocation6_spill] sm:$0xff] }
 0x154   :  { %9939 = vst [vmem:[#allocation16_spill] sm:$0xff] %v7220_v28  ;;  %9940 = vst [vmem:[#allocation17_spill] sm:$0xff] %v7222_v15  ;;  %v7229_v24 = vadd.f32 %v1016_v61, %v7069_v57  ;;  %1928 = vmatprep.mubr.bf16.mxu0 %v9928_v19  ;;  %2059 = vmatprep.mubr.bf16.mxu1 %v9928_v19 }
 0x155   :  { %v1018_v10 = vpop.f32.mrf.mxu0  ;;  %v7233_v27 = vpop.f32.mrf.mxu1 }
 0x156   :  { %9943 = vst [vmem:[#allocation13_spill] sm:$0xff] %v7229_v24  ;;  %9944 = vst [vmem:[#allocation12_spill] sm:$0xff] %v7233_v27  ;;  %v7236_v36 = vadd.f32 %v1018_v10, %v7072_v20  ;;  %v7253_v20 = vld [vmem:[%s9840_s0 + $0x98] sm:$0xff]  }
 0x157   :  { %v1020_v55 = vpop.f32.mrf.mxu0  ;;  %v7238_v3 = vpop.f32.mrf.mxu1 }
 0x158   :  { %9945 = vst [vmem:[#allocation18_spill] sm:$0xff] %v7236_v36  ;;  %9946 = vst [vmem:[#allocation19_spill] sm:$0xff] %v7238_v3  ;;  %v7241_v6 = vadd.f32 %v1020_v55, %v7075_v11  ;;  %v7260_v11 = vld [vmem:[%s9840_s0 + $0xe0] sm:$0xff]  }
 0x159   :  { %v1022_v2 = vpop.f32.mrf.mxu0  ;;  %v7243_v41 = vpop.f32.mrf.mxu1  ;;  %9951 = vst [vmem:[#allocation24_spill] sm:$0xff] %v7260_v11 }
 0x15a   :  { %9947 = vst [vmem:[#allocation20_spill] sm:$0xff] %v7241_v6  ;;  %9948 = vst [vmem:[#allocation21_spill] sm:$0xff] %v7243_v41  ;;  %v7246_v57 = vadd.f32 %v1022_v2, %v7082_v16  ;;  %v9959_v2 = vld [vmem:[#allocation7_spill] sm:$0xff] }
 0x15b   :  { %v1026_v4 = vpop.f32.mrf.mxu0  ;;  %v7248_v32 = vpop.f32.mrf.mxu1  ;;  %5668 = vmatmul.mubr.msk.bf16.vlgmr.msra.gmra.mxu0 %vm168_vm1, %v7253_v20  ;;  %5676 = vmatmul.mubr.msk.bf16.vlgmr.msra.gmra.mxu1 %vm168_vm1, %v7260_v11  ;;  %v7452_v41 = vld [vmem:[%s9840_s0 + $0x108] sm:$0xff]  }
 0x15c   :  { %9949 = vst [vmem:[#allocation22_spill] sm:$0xff] %v7246_v57  ;;  %9950 = vst [vmem:[#allocation23_spill] sm:$0xff] %v7248_v32  ;;  %v7265_v16 = vadd.f32 %v1026_v4, %v7089_v48  ;;  %2179 = vmatpush1.bf16.msra.mxu0 %v9953_v33  ;;  %2310 = vmatpush1.bf16.msra.mxu1 %v9954_v31  ;;  %v6333_v48 = vld [vmem:[%s9839_s1 + $0x24] ss:$8 sps:$4 sm:$0xff]  }
 0x15d   :  { %v1028_v38 = vpop.f32.mrf.mxu0  ;;  %v7269_v50 = vpop.f32.mrf.mxu1  ;;  %1938 = vmatprep.mubr.bf16.mxu0 %v9928_v19  ;;  %2069 = vmatprep.mubr.bf16.mxu1 %v9928_v19  ;;  %9974 = vst [vmem:[#allocation40_spill] sm:$0xff] %v7452_v41 }
 0x15e   :  { %9952 = vst [vmem:[#allocation25_spill] sm:$0xff] %v7265_v16  ;;  %9955 = vst [vmem:[#allocation2_spill] sm:$0xff] %v7269_v50  ;;  %v7274_v61 = vadd.f32 %v1028_v38, %v7094_v62  ;;  %2180 = vmatprep.subr.bf16.mxu0 %v9957_v39  ;;  %2311 = vmatprep.subr.bf16.mxu1 %v6333_v48  ;;  %v6334_v62 = vld [vmem:[%s9839_s1 + $0x20] ss:$8 sps:$4 sm:$0xff]  }
 0x15f   :  { %v1030_v35 = vpop.f32.mrf.mxu0  ;;  %v7280_v10 = vpop.f32.mrf.mxu1  ;;  %v6335_v38 = vld [vmem:[%s9839_s1 + $0x14] ss:$8 sps:$4 sm:$0x3f]  }
 0x160   :  { %9956 = vst [vmem:[#allocation26_spill] sm:$0xff] %v7274_v61  ;;  %v7283_v55 = vadd.f32 %v1030_v35, %v7103_v21  ;;  %2181 = vmatpush1.bf16.msra.mxu0 %v9959_v2  ;;  %2312 = vmatpush1.bf16.msra.mxu1 %v6334_v62  ;;  %v6336_v21 = vld [vmem:[%s9839_s1 + $0x54] ss:$8 sps:$4 sm:$0x3f]   ;;  %v7307_v2 = vld [vmem:[%s9840_s0 + $0xa0] sm:$0xff]   ;;  %v7314_v62 = vld [vmem:[%s9840_s0 + $0xe8] sm:$0xff]  }
 0x161   :  { %v1032_v4 = vpop.f32.mrf.mxu0  ;;  %v7289_v31 = vpop.f32.mrf.mxu1  ;;  %5700 = vmatprep.subr.msk.bf16.mxu0 %vm190_vm0, %v6335_v38  ;;  %5708 = vmatprep.subr.msk.bf16.mxu1 %vm190_vm0, %v6336_v21  ;;  %9961 = vst [vmem:[#allocation27_spill] sm:$0xff] %v7314_v62 }
 0x162   :  { %9958 = vst [vmem:[#allocation6_spill] sm:$0xff] %v7283_v55  ;;  %v7300_v39 = vadd.f32 %v1032_v4, %v7110_v22 }
 0x163   :  { %v1036_v48 = vpop.f32.mrf.mxu0  ;;  %v7302_v35 = vpop.f32.mrf.mxu1  ;;  %5669 = vmatmul.mubr.msk.bf16.gmra.mxu0 %vm168_vm1, %v7307_v2  ;;  %5677 = vmatmul.mubr.msk.bf16.gmra.mxu1 %vm168_vm1, %v7314_v62 }
 0x164   :  { %9960 = vst [vmem:[#allocation7_spill] sm:$0xff] %v7300_v39  ;;  %v7319_v22 = vadd.f32 %v1036_v48, %v7115_v49  ;;  %1948 = vmatprep.mubr.bf16.mxu0 %v9928_v19  ;;  %2079 = vmatprep.mubr.bf16.mxu1 %v9928_v19 }
 0x165   :  { %v1038_v4 = vpop.f32.mrf.mxu0  ;;  %v7323_v38 = vpop.f32.mrf.mxu1 }
 0x166   :  { %9962 = vst [vmem:[#allocation28_spill] sm:$0xff] %v7319_v22  ;;  %v7326_v21 = vadd.f32 %v1038_v4, %v7118_v43  ;;  %v7343_v43 = vld [vmem:[%s9840_s0 + $0xa8] sm:$0xff]  }
 0x167   :  { %v1040_v39 = vpop.f32.mrf.mxu0  ;;  %v7328_v55 = vpop.f32.mrf.mxu1 }
 0x168   :  { %9963 = vst [vmem:[#allocation29_spill] sm:$0xff] %v7326_v21  ;;  %v7331_v61 = vadd.f32 %v1040_v39, %v7121_v25  ;;  %v7350_v25 = vld [vmem:[%s9840_s0 + $0xf0] sm:$0xff]  }
 0x169   :  { %v1042_v62 = vpop.f32.mrf.mxu0  ;;  %v7333_v16 = vpop.f32.mrf.mxu1  ;;  %9966 = vst [vmem:[#allocation32_spill] sm:$0xff] %v7350_v25 }
 0x16a   :  { %9964 = vst [vmem:[#allocation30_spill] sm:$0xff] %v7331_v61  ;;  %v7336_v49 = vadd.f32 %v1042_v62, %v7128_v56 }
 0x16b   :  { %v1046_v48 = vpop.f32.mrf.mxu0  ;;  %v7338_v22 = vpop.f32.mrf.mxu1  ;;  %5670 = vmatmul.mubr.msk.bf16.gmra.mxu0 %vm168_vm1, %v7343_v43  ;;  %5678 = vmatmul.mubr.msk.bf16.gmra.mxu1 %vm168_vm1, %v7350_v25 }
 0x16c   :  { %9965 = vst [vmem:[#allocation31_spill] sm:$0xff] %v7336_v49  ;;  %v7355_v56 = vadd.f32 %v1046_v48, %v7133_v58  ;;  %1958 = vmatprep.mubr.bf16.mxu0 %v9928_v19  ;;  %2089 = vmatprep.mubr.bf16.mxu1 %v9928_v19 }
 0x16d   :  { %v1048_v39 = vpop.f32.mrf.mxu0  ;;  %v7359_v62 = vpop.f32.mrf.mxu1 }
 0x16e   :  { %9967 = vst [vmem:[#allocation33_spill] sm:$0xff] %v7355_v56  ;;  %v7362_v4 = vadd.f32 %v1048_v39, %v7136_v45  ;;  %v7381_v45 = vld [vmem:[%s9840_s0 + $0xb0] sm:$0xff]  }
 0x16f   :  { %v1050_v49 = vpop.f32.mrf.mxu0  ;;  %v7364_v61 = vpop.f32.mrf.mxu1 }
 0x170   :  { %9968 = vst [vmem:[#allocation34_spill] sm:$0xff] %v7362_v4  ;;  %v7367_v21 = vadd.f32 %v1050_v49, %v7139_v14  ;;  %v7388_v14 = vld [vmem:[%s9840_s0 + $0xf8] sm:$0xff]  }
 0x171   :  { %v1052_v25 = vpop.f32.mrf.mxu0  ;;  %v7369_v57 = vpop.f32.mrf.mxu1  ;;  %9971 = vst [vmem:[#allocation37_spill] sm:$0xff] %v7388_v14 }
 0x172   :  { %9969 = vst [vmem:[#allocation35_spill] sm:$0xff] %v7367_v21  ;;  %v7372_v58 = vadd.f32 %v1052_v25, %v7148_v8 }
 0x173   :  { %v7374_v48 = vpop.f32.mrf.mxu0  ;;  %v7376_v56 = vpop.f32.mrf.mxu1  ;;  %5671 = vmatmul.mubr.msk.bf16.gmra.mxu0 %vm168_vm1, %v7381_v45  ;;  %5679 = vmatmul.mubr.msk.bf16.gmra.mxu1 %vm168_vm1, %v7388_v14  ;;  %v7413_v14 = vld [vmem:[%s9840_s0 + $0xb8] sm:$0xff]  }
 0x174   :  { %9970 = vst [vmem:[#allocation36_spill] sm:$0xff] %v7372_v58  ;;  %1968 = vmatprep.mubr.bf16.mxu0 %v9928_v19  ;;  %2099 = vmatprep.mubr.bf16.mxu1 %v9928_v19 }
 0x175   :  { %v7394_v8 = vpop.f32.mrf.mxu0  ;;  %v7396_v49 = vpop.f32.mrf.mxu1 }
 0x177   :  { %v7398_v25 = vpop.f32.mrf.mxu0  ;;  %v7400_v39 = vpop.f32.mrf.mxu1 }
 0x179   :  { %v7402_v58 = vpop.f32.mrf.mxu0  ;;  %v7404_v21 = vpop.f32.mrf.mxu1 }
 0x17b   :  { %v7406_v4 = vpop.f32.mrf.mxu0  ;;  %v7408_v33 = vpop.f32.mrf.mxu1  ;;  %5672 = vmatmul.mubr.msk.bf16.gmra.mxu0 %vm168_vm1, %v7413_v14  ;;  %5680 = vmatmul.mubr.msk.bf16.gmra.mxu1 %vm168_vm1, %v7420_v18  ;;  %v7445_v18 = vld [vmem:[%s9840_s0 + $0xc0] sm:$0xff]  }
 0x17c   :  { %1978 = vmatprep.mubr.bf16.mxu0 %v9928_v19  ;;  %2109 = vmatprep.mubr.bf16.mxu1 %v9928_v19  ;;  %9973 = vst [vmem:[#allocation39_spill] sm:$0xff] %v7445_v18 }
 0x17d   :  { %v7426_v6 = vpop.f32.mrf.mxu0  ;;  %v7428_v11 = vpop.f32.mrf.mxu1 }
 0x17f   :  { %v7430_v36 = vpop.f32.mrf.mxu0  ;;  %v7432_v24 = vpop.f32.mrf.mxu1 }
 0x181   :  { %v7434_v50 = vpop.f32.mrf.mxu0  ;;  %v7436_v28 = vpop.f32.mrf.mxu1 }
 0x183   :  { %v7438_v32 = vpop.f32.mrf.mxu0  ;;  %v7440_v37 = vpop.f32.mrf.mxu1  ;;  %5673 = vmatmul.mubr.msk.bf16.gmra.mxu0 %vm168_vm1, %v7445_v18  ;;  %5681 = vmatmul.mubr.msk.bf16.gmra.mxu1 %vm168_vm1, %v7452_v41 }
 0x184   :  { %1988 = vmatprep.mubr.bf16.mxu0 %v9928_v19  ;;  %2119 = vmatprep.mubr.bf16.mxu1 %v9928_v19 }
 0x185   :  { %v7458_v1 = vpop.f32.mrf.mxu0  ;;  %v7460_v3 = vpop.f32.mrf.mxu1 }
 0x186   :  { %9975 = vst [vmem:[#allocation41_spill] sm:$0xff] %v7460_v3 }
 0x187   :  { %v7462_v26 = vpop.f32.mrf.mxu0  ;;  %v7464_v27 = vpop.f32.mrf.mxu1 }
 0x188   :  { %9976 = vst [vmem:[#allocation42_spill] sm:$0xff] %v7464_v27 }
 0x189   :  { %v7466_v12 = vpop.f32.mrf.mxu0  ;;  %v7468_v15 = vpop.f32.mrf.mxu1 }
 0x18a   :  { %9977 = vst [vmem:[#allocation43_spill] sm:$0xff] %v7466_v12  ;;  %9978 = vst [vmem:[#allocation44_spill] sm:$0xff] %v7468_v15 }
 0x18b   :  { %v7470_v9 = vpop.f32.mrf.mxu0  ;;  %v7472_v18 = vpop.f32.mrf.mxu1  ;;  %5674 = vmatmul.mubr.msk.bf16.gmra.mxu0 %vm168_vm1, %v6859_v54  ;;  %5682 = vmatmul.mubr.msk.bf16.gmra.mxu1 %vm168_vm1, %v7052_v34  ;;  %v7499_v34 = vld [vmem:[%s9840_s0 + $0x10] sm:$0xff]  }
 0x18c   :  { %9979 = vst [vmem:[#allocation45_spill] sm:$0xff] %v7470_v9  ;;  %9980 = vst [vmem:[#allocation46_spill] sm:$0xff] %v7472_v18  ;;  %2198 = vmatprep.mubr.bf16.mxu0 %v9928_v19  ;;  %2329 = vmatprep.mubr.bf16.mxu1 %v9928_v19 }
 0x18d   :  { %v7480_v41 = vpop.f32.mrf.mxu0  ;;  %v7482_v27 = vpop.f32.mrf.mxu1  ;;  %9989 = vst [vmem:[#allocation55_spill] sm:$0xff] %v7499_v34 }
 0x18e   :  { %9981 = vst [vmem:[#allocation47_spill] sm:$0xff] %v7480_v41  ;;  %9982 = vst [vmem:[#allocation48_spill] sm:$0xff] %v7482_v27 }
 0x18f   :  { %v7484_v12 = vpop.f32.mrf.mxu0  ;;  %v7486_v15 = vpop.f32.mrf.mxu1 }
 0x190   :  { %9983 = vst [vmem:[#allocation49_spill] sm:$0xff] %v7484_v12  ;;  %9984 = vst [vmem:[#allocation50_spill] sm:$0xff] %v7486_v15  ;;  %v9990_v15 = vld [vmem:[#allocation3_spill] sm:$0xff]  ;;  %v7540_v12 = vld [vmem:[%s9840_s0 + $0x18] sm:$0xff]  }
 0x191   :  { %v7488_v9 = vpop.f32.mrf.mxu0  ;;  %v7490_v18 = vpop.f32.mrf.mxu1  ;;  %9994 = vst [vmem:[#allocation58_spill] sm:$0xff] %v7540_v12 }
 0x192   :  { %9985 = vst [vmem:[#allocation51_spill] sm:$0xff] %v7488_v9  ;;  %9986 = vst [vmem:[#allocation52_spill] sm:$0xff] %v7490_v18 }
 0x193   :  { %v7492_v54 = vpop.f32.mrf.mxu0  ;;  %v7494_v53 = vpop.f32.mrf.mxu1  ;;  %5685 = vmatmul.mubr.msk.bf16.vlgmr.msra.gmra.mxu0 %vm168_vm1, %v7499_v34  ;;  %5693 = vmatmul.mubr.msk.bf16.vlgmr.msra.gmra.mxu1 %vm168_vm1, %v7253_v20  ;;  %v6349_v20 = vld [vmem:[%s9839_s1 + $0x44] ss:$8 sps:$4 sm:$0xff]  }
 0x194   :  { %9987 = vst [vmem:[#allocation53_spill] sm:$0xff] %v7492_v54  ;;  %9988 = vst [vmem:[#allocation54_spill] sm:$0xff] %v7494_v53  ;;  %2413 = vmatpush1.bf16.msra.mxu0 %v9990_v15  ;;  %2516 = vmatpush1.bf16.msra.mxu1 %v6529_v17  ;;  %v6348_v53 = vld [vmem:[%s9839_s1 + $0x4] ss:$8 sps:$4 sm:$0xff]  }
 0x195   :  { %v7507_v18 = vpop.f32.mrf.mxu0  ;;  %v7509_v54 = vpop.f32.mrf.mxu1  ;;  %2208 = vmatprep.mubr.bf16.mxu0 %v9928_v19  ;;  %2339 = vmatprep.mubr.bf16.mxu1 %v9928_v19 }
 0x196   :  { %9991 = vst [vmem:[#allocation3_spill] sm:$0xff] %v7507_v18  ;;  %9992 = vst [vmem:[#allocation56_spill] sm:$0xff] %v7509_v54  ;;  %2414 = vmatprep.subr.bf16.mxu0 %v6348_v53  ;;  %2517 = vmatprep.subr.bf16.mxu1 %v6349_v20  ;;  %v6350_v54 = vld [vmem:[%s9839_s1] ss:$8 sps:$4 sm:$0xff]  }
 0x197   :  { %v1264_v15 = vpop.f32.mrf.mxu0  ;;  %v1367_v17 = vpop.f32.mrf.mxu1  ;;  %v6351_v18 = vld [vmem:[%s9839_s1 + $0x40] ss:$8 sps:$4 sm:$0xff]   ;;  %v6352_v20 = vld [vmem:[%s9839_s1 + $0x74] ss:$8 sps:$4 sm:$0x3f]  }
 0x198   :  { %v1265_v34 = vadd.f32 %v1264_v15, %v7280_v10  ;;  %2415 = vmatpush1.bf16.msra.mxu0 %v6350_v54  ;;  %2518 = vmatpush1.bf16.msra.mxu1 %v6351_v18  ;;  %v6353_v10 = vld [vmem:[%s9839_s1 + $0x94] ss:$8 sps:$4 sm:$0x3f]  }
 0x199   :  { %v1266_v53 = vpop.f32.mrf.mxu0  ;;  %v1369_v9 = vpop.f32.mrf.mxu1  ;;  %5716 = vmatprep.subr.msk.bf16.mxu0 %vm190_vm0, %v6352_v20  ;;  %5725 = vmatprep.subr.msk.bf16.mxu1 %vm190_vm0, %v6353_v10 }
 0x19a   :  { %v7534_v54 = vadd.f32 %v1367_v17, %v1265_v34  ;;  %v1267_v15 = vadd.f32 %v1266_v53, %v7289_v31 }
 0x19b   :  { %v1270_v27 = vpop.f32.mrf.mxu0  ;;  %v1373_v18 = vpop.f32.mrf.mxu1  ;;  %5686 = vmatmul.mubr.msk.bf16.gmra.mxu0 %vm168_vm1, %v7540_v12  ;;  %5694 = vmatmul.mubr.msk.bf16.gmra.mxu1 %vm168_vm1, %v7307_v2 }
 0x19c   :  { %9993 = vst [vmem:[#allocation57_spill] sm:$0xff] %v7534_v54  ;;  %v7546_v20 = vadd.f32 %v1369_v9, %v1267_v15  ;;  %v1271_v34 = vadd.f32 %v1270_v27, %v7302_v35  ;;  %2218 = vmatprep.mubr.bf16.mxu0 %v9928_v19  ;;  %2349 = vmatprep.mubr.bf16.mxu1 %v9928_v19 }
 0x19d   :  { %v1272_v31 = vpop.f32.mrf.mxu0  ;;  %v1375_v17 = vpop.f32.mrf.mxu1 }
 0x19e   :  { %9995 = vst [vmem:[#allocation59_spill] sm:$0xff] %v7546_v20  ;;  %v7551_v53 = vadd.f32 %v1373_v18, %v1271_v34  ;;  %v1273_v10 = vadd.f32 %v1272_v31, %v7323_v38  ;;  %v7563_v18 = vld [vmem:[%s9840_s0 + $0x20] sm:$0xff]  }
 0x19f   :  { %v1274_v54 = vpop.f32.mrf.mxu0  ;;  %v1377_v41 = vpop.f32.mrf.mxu1 }
 0x1a0   :  { %v7554_v12 = vadd.f32 %v1375_v17, %v1273_v10  ;;  %v1275_v2 = vadd.f32 %v1274_v54, %v7328_v55  ;;  %v1221_v54 = vadd.f32 %v7374_v48, %v7142_v30  ;;  %v1225_v30 = vadd.f32 %v7398_v25, %v7160_v47 }
 0x1a1   :  { %v1276_v9 = vpop.f32.mrf.mxu0  ;;  %v1379_v15 = vpop.f32.mrf.mxu1  ;;  %v1227_v47 = vadd.f32 %v7402_v58, %v7165_v0 }
 0x1a2   :  { %v7557_v20 = vadd.f32 %v1377_v41, %v1275_v2  ;;  %v1277_v27 = vadd.f32 %v1276_v9, %v7333_v16  ;;  %v1394_v25 = vadd.f32 %v7400_v39, %v1225_v30  ;;  %v1235_v39 = vadd.f32 %v7430_v36, %v7186_v63  ;;  %v7627_v63 = vld [vmem:[%s9840_s0 + $0x30] sm:$0xff]  }
 0x1a3   :  { %v1280_v35 = vpop.f32.mrf.mxu0  ;;  %v1383_v3 = vpop.f32.mrf.mxu1  ;;  %5687 = vmatmul.mubr.msk.bf16.gmra.mxu0 %vm168_vm1, %v7563_v18  ;;  %5695 = vmatmul.mubr.msk.bf16.gmra.mxu1 %vm168_vm1, %v7343_v43  ;;  %v1223_v43 = vadd.f32 %v7394_v8, %v7155_v29 }
 0x1a4   :  { %v7569_v55 = vadd.f32 %v1379_v15, %v1277_v27  ;;  %v1281_v41 = vadd.f32 %v1280_v35, %v7338_v22  ;;  %2228 = vmatprep.mubr.bf16.mxu0 %v9928_v19  ;;  %2359 = vmatprep.mubr.bf16.mxu1 %v9928_v19  ;;  %v1392_v27 = vadd.f32 %v7376_v56, %v1221_v54  ;;  %v7594_v35 = vld [vmem:[%s9840_s0 + $0x28] sm:$0xff]  }
 0x1a5   :  { %v1282_v16 = vpop.f32.mrf.mxu0  ;;  %v1385_v38 = vpop.f32.mrf.mxu1  ;;  %v1393_v48 = vadd.f32 %v7396_v49, %v1223_v43  ;;  %v1395_v54 = vadd.f32 %v7404_v21, %v1227_v47 }
 0x1a6   :  { %v7576_v34 = vadd.f32 %v1383_v3, %v1281_v41  ;;  %v1283_v31 = vadd.f32 %v1282_v16, %v7359_v62  ;;  %v1231_v41 = vadd.f32 %v7406_v4, %v7170_v40 }
 0x1a7   :  { %v1284_v17 = vpop.f32.mrf.mxu0  ;;  %v1387_v10 = vpop.f32.mrf.mxu1 }
 0x1a8   :  { %v7581_v2 = vadd.f32 %v1385_v38, %v1283_v31  ;;  %v1285_v22 = vadd.f32 %v1284_v17, %v7364_v61  ;;  %v1396_v40 = vadd.f32 %v7408_v33, %v1231_v41  ;;  %v9998_v41 = vld [vmem:[#allocation43_spill] sm:$0xff] }
 0x1a9   :  { %v1286_v9 = vpop.f32.mrf.mxu0  ;;  %v1389_v15 = vpop.f32.mrf.mxu1 }
 0x1aa   :  { %v7587_v3 = vadd.f32 %v1387_v10, %v1285_v22  ;;  %v1287_v62 = vadd.f32 %v1286_v9, %v7369_v57 }
 0x1ab   :  { %v1454_v29 = vpop.f32.mrf.mxu0  ;;  %v1593_v8 = vpop.f32.mrf.mxu1  ;;  %5688 = vmatmul.mubr.msk.bf16.gmra.mxu0 %vm168_vm1, %v7594_v35  ;;  %5696 = vmatmul.mubr.msk.bf16.gmra.mxu1 %vm168_vm1, %v7381_v45  ;;  %v1233_v45 = vadd.f32 %v7426_v6, %v7181_v42 }
 0x1ac   :  { %v7602_v61 = vadd.f32 %v1389_v15, %v1287_v62  ;;  %v1523_v57 = vadd.f32 %v1454_v29, %v1392_v27  ;;  %2238 = vmatprep.mubr.bf16.mxu0 %v9928_v19  ;;  %2369 = vmatprep.mubr.bf16.mxu1 %v9928_v19  ;;  %v1241_v27 = vadd.f32 %v7438_v32, %v7196_v52 }
 0x1ad   :  { %v1456_v56 = vpop.f32.mrf.mxu0  ;;  %v1595_v49 = vpop.f32.mrf.mxu1  ;;  %v1397_v6 = vadd.f32 %v7428_v11, %v1233_v45  ;;  %v1243_v62 = vadd.f32 %v7458_v1, %v7207_v13 }
 0x1ae   :  { %v1662_v16 = vadd.f32 %v1593_v8, %v1523_v57  ;;  %v1524_v38 = vadd.f32 %v1456_v56, %v1393_v48  ;;  %v1400_v56 = vadd.f32 %v7440_v37, %v1241_v27  ;;  %v10008_v27 = vld [vmem:[#allocation11_spill] sm:$0xff] }
 0x1af   :  { %v1458_v0 = vpop.f32.mrf.mxu0  ;;  %v1597_v58 = vpop.f32.mrf.mxu1 }
 0x1b0   :  { %v1663_v31 = vadd.f32 %v1595_v49, %v1524_v38  ;;  %v1525_v43 = vadd.f32 %v1458_v0, %v1394_v25  ;;  %v7613_v17 = vmax.f32 %v7151_v23, %v1662_v16  ;;  %v1237_v23 = vadd.f32 %v7434_v50, %v7191_v7  ;;  %v9997_v25 = vld [vmem:[#allocation15_spill] sm:$0xff] }
 0x1b1   :  { %v1460_v10 = vpop.f32.mrf.mxu0  ;;  %v1599_v22 = vpop.f32.mrf.mxu1  ;;  %v1398_v7 = vadd.f32 %v7432_v24, %v1235_v39  ;;  %v1247_v16 = vadd.f32 %v9998_v41, %v9997_v25 }
 0x1b2   :  { %v1664_v4 = vadd.f32 %v1597_v58, %v1525_v43  ;;  %v1526_v9 = vadd.f32 %v1460_v10, %v1395_v54  ;;  %2961 = vrot.lane.b32.xlu0 %v7613_v17, %s6384_s17  ;;  %v2906_v42 = vmax.f32 %v7158_v51, %v1663_v31  ;;  %v1399_v24 = vadd.f32 %v7436_v28, %v1237_v23  ;;  %v10001_v54 = vld [vmem:[#allocation42_spill] sm:$0xff]  ;;  %v10002_v10 = vld [vmem:[#allocation17_spill] sm:$0xff]  ;;  %v10005_v23 = vld [vmem:[#allocation12_spill] sm:$0xff] }
 0x1b3   :  { %v1464_v21 = vpop.f32.mrf.mxu0  ;;  %v1603_v15 = vpop.f32.mrf.mxu1  ;;  %5689 = vmatmul.mubr.msk.bf16.gmra.mxu0 %vm168_vm1, %v7627_v63  ;;  %5697 = vmatmul.mubr.msk.bf16.gmra.mxu1 %vm168_vm1, %v7413_v14 }
 0x1b4   :  { %v7634_v51 = vmax.f32 %v7163_v46, %v1664_v4  ;;  %v1665_v36 = vadd.f32 %v1599_v22, %v1526_v9  ;;  %v1527_v11 = vadd.f32 %v1464_v21, %v1396_v40  ;;  %2963 = vrot.lane.b32.xlu1 %v2906_v42, %s6384_s17  ;;  %2248 = vmatprep.mubr.bf16.mxu0 %v9928_v19  ;;  %v10003_v22 = vld [vmem:[#allocation45_spill] sm:$0xff]  ;;  %v10004_v4 = vld [vmem:[#allocation8_spill] sm:$0xff]  ;;  %v10006_v21 = vld [vmem:[#allocation47_spill] sm:$0xff] }
 0x1b5   :  { %v1466_v33 = vpop.f32.mrf.mxu0  ;;  %v1605_v50 = vpop.f32.mrf.mxu1  ;;  %2379 = vmatprep.mubr.bf16.mxu1 %v9928_v19  ;;  %v1251_v40 = vadd.f32 %v10003_v22, %v10002_v10  ;;  %v10019_v10 = vld [vmem:[#allocation53_spill] sm:$0xff] }
 0x1b6   :  { %v2908_v14 = vmax.f32 %v7168_v5, %v1665_v36  ;;  %v1666_v30 = vadd.f32 %v1603_v15, %v1527_v11  ;;  %v1528_v46 = vadd.f32 %v1466_v33, %v1397_v6  ;;  %2965 = vrot.lane.b32.xlu0 %v7634_v51, %s6384_s17  ;;  %v1245_v5 = vadd.f32 %v7462_v26, %v7212_v44  ;;  %v7664_v26 = vld [vmem:[%s9840_s0 + $0x38] sm:$0xff]   ;;  %v10007_v33 = vld [vmem:[#allocation44_spill] sm:$0xff] }
 0x1b7   :  { %v1468_v48 = vpop.f32.mrf.mxu0  ;;  %v1607_v29 = vpop.f32.mrf.mxu1  ;;  %v10000_v44 = vld [vmem:[#allocation9_spill] sm:$0xff]  ;;  %v1253_v15 = vadd.f32 %v10006_v21, %v10005_v23  ;;  %v10022_v23 = vld [vmem:[#allocation3_spill] sm:$0xff] }
 0x1b8   :  { %v7649_v8 = vmax.f32 %v7177_v59, %v1666_v30  ;;  %v1667_v47 = vadd.f32 %v1605_v50, %v1528_v46  ;;  %v1529_v57 = vadd.f32 %v1468_v48, %v1398_v7  ;;  %2967 = vrot.lane.b32.xlu1 %v2908_v14, %s6384_s17  ;;  %v9996_v59 = vld [vmem:[#allocation41_spill] sm:$0xff]  ;;  %v1402_v31 = vadd.f32 %v10001_v54, %v1245_v5  ;;  %v7687_v7 = vld [vmem:[%s9840_s0 + $0x40] sm:$0xff]  }
 0x1b9   :  { %v1470_v52 = vpop.f32.mrf.mxu0  ;;  %v1609_v32 = vpop.f32.mrf.mxu1  ;;  %v1401_v28 = vadd.f32 %v9996_v59, %v1243_v62  ;;  %v1403_v50 = vadd.f32 %v10007_v33, %v1247_v16  ;;  %v10009_v62 = vld [vmem:[#allocation19_spill] sm:$0xff]  ;;  %v10010_v48 = vld [vmem:[#allocation49_spill] sm:$0xff] }
 0x1ba   :  { %v2910_v13 = vmax.f32 %v7184_v60, %v1667_v47  ;;  %v1668_v1 = vadd.f32 %v1607_v29, %v1529_v57  ;;  %v1530_v49 = vadd.f32 %v1470_v52, %v1399_v24  ;;  %2969 = vrot.lane.b32.xlu0 %v7649_v8, %s6384_s17  ;;  %v9999_v60 = vld [vmem:[#allocation39_spill] sm:$0xff]  ;;  %v1255_v29 = vadd.f32 %v10010_v48, %v10009_v62  ;;  %v10011_v57 = vld [vmem:[#allocation46_spill] sm:$0xff]  ;;  %v10014_v59 = vld [vmem:[#allocation21_spill] sm:$0xff] }
 0x1bb   :  { %v1474_v38 = vpop.f32.mrf.mxu0  ;;  %v1613_v45 = vpop.f32.mrf.mxu1  ;;  %5690 = vmatmul.mubr.msk.bf16.gmra.mxu0 %vm168_vm1, %v7664_v26  ;;  %5698 = vmatmul.mubr.msk.bf16.gmra.mxu1 %vm168_vm1, %v9999_v60  ;;  %v1404_v5 = vadd.f32 %v10011_v57, %v1251_v40  ;;  %v10012_v52 = vld [vmem:[#allocation10_spill] sm:$0xff]  ;;  %v10020_v40 = vld [vmem:[#allocation16_spill] sm:$0xff] }
 0x1bc   :  { %v7671_v37 = vmax.f32 %v10000_v44, %v1668_v1  ;;  %v1669_v0 = vadd.f32 %v1609_v32, %v1530_v49  ;;  %v1531_v58 = vadd.f32 %v1474_v38, %v1400_v56  ;;  %2971 = vrot.lane.b32.xlu1 %v2910_v13, %s6384_s17  ;;  %2258 = vmatprep.mubr.bf16.mxu0 %v9928_v19  ;;  %v10013_v1 = vld [vmem:[#allocation48_spill] sm:$0xff]  ;;  %v6359_v38 = vld [vmem:[%s9840_s0 + $0xc8] sm:$0xff]  }
 0x1bd   :  { %v1476_v43 = vpop.f32.mrf.mxu0  ;;  %v1615_v39 = vpop.f32.mrf.mxu1  ;;  %2389 = vmatprep.mubr.bf16.mxu1 %v9928_v19  ;;  %v1405_v49 = vadd.f32 %v10013_v1, %v1253_v15 }
 0x1be   :  { %v2912_v9 = vmax.f32 %v10004_v4, %v1669_v0  ;;  %v1670_v42 = vadd.f32 %v1613_v45, %v1531_v58  ;;  %v1532_v6 = vadd.f32 %v1476_v43, %v1401_v28  ;;  %2973 = vrot.lane.b32.xlu0 %v7671_v37, %s6384_s17  ;;  %v10015_v28 = vld [vmem:[#allocation51_spill] sm:$0xff]  ;;  %v10016_v45 = vld [vmem:[#allocation14_spill] sm:$0xff] }
 0x1bf   :  { %v1478_v36 = vpop.f32.mrf.mxu0  ;;  %v1617_v11 = vpop.f32.mrf.mxu1  ;;  %v1257_v25 = vadd.f32 %v10015_v28, %v10014_v59  ;;  %v10017_v58 = vld [vmem:[#allocation50_spill] sm:$0xff]  ;;  %v6360_v59 = vld [vmem:[%s9840_s0 + $0x50] sm:$0xff]  }
 0x1c0   :  { %v7691_v14 = vmax.f32 %v10008_v27, %v1670_v42  ;;  %v1671_v30 = vadd.f32 %v1615_v39, %v1532_v6  ;;  %v1533_v46 = vadd.f32 %v1478_v36, %v1402_v31  ;;  %2975 = vrot.lane.b32.xlu1 %v2912_v9, %s6384_s17  ;;  %v1406_v54 = vadd.f32 %v10017_v58, %v1255_v29  ;;  %v10018_v39 = vld [vmem:[#allocation23_spill] sm:$0xff]  ;;  %v10021_v6 = vld [vmem:[#allocation2_spill] sm:$0xff]  ;;  %v10028_v28 = vld [vmem:[#allocation24_spill] sm:$0xff] }
 0x1c1   :  { %v1480_v24 = vpop.f32.mrf.mxu0  ;;  %v1619_v47 = vpop.f32.mrf.mxu1  ;;  %v1261_v22 = vadd.f32 %v10019_v10, %v10018_v39  ;;  %v1263_v21 = vadd.f32 %v10022_v23, %v10021_v6  ;;  %v10025_v29 = vld [vmem:[#allocation54_spill] sm:$0xff]  ;;  %v10031_v58 = vld [vmem:[#allocation5_spill] sm:$0xff] }
 0x1c2   :  { %v2914_v32 = vmax.f32 %v10012_v52, %v1671_v30  ;;  %v1672_v56 = vadd.f32 %v1617_v11, %v1533_v46  ;;  %v1534_v13 = vadd.f32 %v1480_v24, %v1403_v50  ;;  %2977 = vrot.lane.b32.xlu0 %v7691_v14, %s6384_s17  ;;  %v10023_v11 = vld [vmem:[#allocation52_spill] sm:$0xff]  ;;  %v10024_v50 = vld [vmem:[#allocation13_spill] sm:$0xff] }
 0x1c3   :  { %v1484_v41 = vpop.f32.mrf.mxu0  ;;  %v1623_v16 = vpop.f32.mrf.mxu1  ;;  %5691 = vmatmul.mubr.msk.bf16.gmra.mxu0 %vm168_vm1, %v7687_v7  ;;  %5699 = vmatmul.mubr.msk.bf16.gmra.mxu1 %vm168_vm1, %v6359_v38  ;;  %v1407_v33 = vadd.f32 %v10023_v11, %v1257_v25  ;;  %v1408_v24 = vadd.f32 %v10025_v29, %v1261_v22  ;;  %v10029_v25 = vld [vmem:[#allocation20_spill] sm:$0xff] }
 0x1c4   :  { %v7710_v60 = vmax.f32 %v10016_v45, %v1672_v56  ;;  %v1673_v44 = vadd.f32 %v1619_v47, %v1534_v13  ;;  %v1535_v0 = vadd.f32 %v1484_v41, %v1404_v5  ;;  %2979 = vrot.lane.b32.xlu1 %v2914_v32, %s6384_s17  ;;  %2432 = vmatprep.mubr.bf16.mxu0 %v9928_v19  ;;  %v10026_v47 = vld [vmem:[#allocation18_spill] sm:$0xff]  ;;  %v7735_v32 = vld [vmem:[%s9841_s3 + $0x50] sm:$0x33] }
 0x1c5   :  { %v1486_v31 = vpop.f32.mrf.mxu0  ;;  %v1625_v43 = vpop.f32.mrf.mxu1  ;;  %2535 = vmatprep.mubr.bf16.mxu1 %v9928_v19  ;;  %v10027_v56 = vld [vmem:[#allocation56_spill] sm:$0xff] }
 0x1c6   :  { %v2916_v4 = vmax.f32 %v10020_v40, %v1673_v44  ;;  %v1674_v9 = vadd.f32 %v1623_v16, %v1535_v0  ;;  %v1536_v42 = vadd.f32 %v1486_v31, %v1405_v49  ;;  %2981 = vrot.lane.b32.xlu0 %v7710_v60, %s6384_s17  ;;  %v1409_v13 = vadd.f32 %v10027_v56, %v1263_v21  ;;  %v10030_v45 = vld [vmem:[#allocation4_spill] sm:$0xff]  ;;  %v10033_v31 = vld [vmem:[#allocation22_spill] sm:$0xff]  ;;  %v10036_v21 = vld [vmem:[#allocation57_spill] sm:$0xff] }
 0x1c7   :  { %v1488_v15 = vpop.f32.mrf.mxu0  ;;  %v1627_v36 = vpop.f32.mrf.mxu1 }
 0x1c8   :  { %v7725_v27 = vmax.f32 %v10024_v50, %v1674_v9  ;;  %v1675_v30 = vadd.f32 %v1625_v43, %v1536_v42  ;;  %v1537_v46 = vadd.f32 %v1488_v15, %v1406_v54  ;;  %2983 = vrot.lane.b32.xlu1 %v2916_v4, %s6384_s17  ;;  %v7753_v54 = vcombine.high %v7735_v32, %v7735_v32  ;;  %v6361_v4 = vld [vmem:[%s9839_s1 + $0x64] ss:$8 sps:$4 sm:$0xff]   ;;  %v10034_v42 = vld [vmem:[#allocation25_spill] sm:$0xff]  ;;  %v6364_v50 = vld [vmem:[%s9839_s1 + $0x80] ss:$8 sps:$4 sm:$0xff]  }
 0x1c9   :  { %v1490_v62 = vpop.f32.mrf.mxu0  ;;  %v1629_v48 = vpop.f32.mrf.mxu1  ;;  %v6362_v9 = vld [vmem:[%s9839_s1 + $0x84] ss:$8 sps:$4 sm:$0xff]  }
 0x1ca   :  { %v2918_v57 = vmax.f32 %v10026_v47, %v1675_v30  ;;  %v1676_v5 = vadd.f32 %v1627_v36, %v1537_v46  ;;  %v1538_v52 = vadd.f32 %v1490_v62, %v1407_v33  ;;  %2985 = vrot.lane.b32.xlu0 %v7725_v27, %s6384_s17  ;;  %10032 = vst [vmem:[#allocation41_spill] sm:$0xff] %v7753_v54  ;;  %v6363_v36 = vld [vmem:[%s9839_s1 + $0x60] ss:$8 sps:$4 sm:$0xff]  }
 0x1cb   :  { %v1494_v1 = vpop.f32.mrf.mxu0  ;;  %v1633_v49 = vpop.f32.mrf.mxu1  ;;  %5701 = vmatmul.mubr.msk.bf16.vlgmr.msra.gmra.mxu0 %vm168_vm1, %v6360_v59  ;;  %5709 = vmatmul.mubr.msk.bf16.vlgmr.msra.gmra.mxu1 %vm168_vm1, %v10028_v28  ;;  %v10037_v30 = vld [vmem:[#allocation26_spill] sm:$0xff] }
 0x1cc   :  { %v7745_v41 = vmax.f32 %v10029_v25, %v1676_v5  ;;  %v1677_v16 = vadd.f32 %v1629_v48, %v1538_v52  ;;  %v1539_v38 = vadd.f32 %v1494_v1, %v1408_v24  ;;  %2647 = vmatpush1.bf16.msra.mxu0 %v10030_v45  ;;  %2987 = vrot.lane.b32.xlu1 %v2918_v57, %s6384_s17  ;;  %v10038_v48 = vld [vmem:[#allocation59_spill] sm:$0xff]  ;;  %v7785_v57 = vld [vmem:[%s9840_s0 + $0x58] sm:$0xff]   ;;  %v10040_v52 = vld [vmem:[#allocation6_spill] sm:$0xff] }
 0x1cd   :  { %v1496_v44 = vpop.f32.mrf.mxu0  ;;  %v1635_v0 = vpop.f32.mrf.mxu1  ;;  %2786 = vmatpush1.bf16.msra.mxu1 %v10031_v58  ;;  %2442 = vmatprep.mubr.bf16.mxu0 %v9928_v19  ;;  %v10039_v5 = vld [vmem:[#allocation27_spill] sm:$0xff] }
 0x1ce   :  { %v2920_v43 = vmax.f32 %v10033_v31, %v1677_v16  ;;  %v1678_v39 = vadd.f32 %v1633_v49, %v1539_v38  ;;  %v1540_v10 = vadd.f32 %v1496_v44, %v1409_v13  ;;  %2989 = vrot.lane.b32.xlu0 %v7745_v41, %s6384_s17  ;;  %2545 = vmatprep.mubr.bf16.mxu1 %v9928_v19  ;;  %v10065_v25 = vld [vmem:[#allocation55_spill] sm:$0xff] }
 0x1cf   :  { %v1498_v22 = vpop.f32.mrf.mxu0  ;;  %v1637_v40 = vpop.f32.mrf.mxu1  ;;  %2648 = vmatprep.subr.bf16.mxu0 %v6361_v4  ;;  %2787 = vmatprep.subr.bf16.mxu1 %v6362_v9 }
 0x1d0   :  { %v7766_v6 = vmax.f32 %v10034_v42, %v1678_v39  ;;  %v1679_v23 = vadd.f32 %v1635_v0, %v1540_v10  ;;  %v1541_v15 = vadd.f32 %v1498_v22, %v10036_v21  ;;  %2991 = vrot.lane.b32.xlu1 %v2920_v43, %s6384_s17  ;;  %2649 = vmatpush1.bf16.msra.mxu0 %v6363_v36  ;;  %v10044_v0 = vld [vmem:[#allocation28_spill] sm:$0xff] }
 0x1d1   :  { %v1500_v11 = vpop.f32.mrf.mxu0  ;;  %v1639_v33 = vpop.f32.mrf.mxu1  ;;  %2788 = vmatpush1.bf16.msra.mxu1 %v6364_v50 }
 0x1d2   :  { %10035 = vst [vmem:[#allocation15_spill] sm:$0xff] %v7766_v6  ;;  %v2922_v46 = vmax.f32 %v10037_v30, %v1679_v23  ;;  %v1680_v62 = vadd.f32 %v1637_v40, %v1541_v15  ;;  %v1542_v29 = vadd.f32 %v1500_v11, %v10038_v48  ;;  %2993 = vrot.lane.b32.xlu0 %v7766_v6, %s6384_s17  ;;  %v10048_v23 = vld [vmem:[#allocation32_spill] sm:$0xff] }
 0x1d3   :  { %5775 = vmatprep.subr.msk.bf16.mxu1 %vm3384_vm2, %v7753_v54  ;;  %v1504_v24 = vpop.f32.mrf.mxu0  ;;  %v1643_v47 = vpop.f32.mrf.mxu1  ;;  %5702 = vmatmul.mubr.msk.bf16.gmra.mxu0 %vm168_vm1, %v7785_v57 }
 0x1d4   :  { %5710 = vmatmul.mubr.msk.bf16.gmra.mxu1 %vm168_vm1, %v10039_v5  ;;  %v7792_v56 = vmax.f32 %v10040_v52, %v1680_v62  ;;  %v7794_v13 = vadd.f32 %v1639_v33, %v1542_v29  ;;  %v1543_v1 = vadd.f32 %v1504_v24, %v7551_v53  ;;  %2995 = vrot.lane.b32.xlu1 %v2922_v46, %s6384_s17  ;;  %v10053_v29 = vld [vmem:[#allocation33_spill] sm:$0xff] }
 0x1d5   :  { %2452 = vmatprep.mubr.bf16.mxu0 %v9928_v19  ;;  %v1506_v49 = vpop.f32.mrf.mxu0  ;;  %v1645_v59 = vpop.f32.mrf.mxu1  ;;  %2555 = vmatprep.mubr.bf16.mxu1 %v9928_v19 }
 0x1d6   :  { %10041 = vst [vmem:[#allocation43_spill] sm:$0xff] %v7792_v56  ;;  %10042 = vst [vmem:[#allocation39_spill] sm:$0xff] %v7794_v13  ;;  %v1682_v16 = vadd.f32 %v1643_v47, %v1543_v1  ;;  %v1544_v38 = vadd.f32 %v1506_v49, %v7554_v12  ;;  %v7815_v12 = vld [vmem:[%s9840_s0 + $0x60] sm:$0xff]  }
 0x1d7   :  { %v1508_v45 = vpop.f32.mrf.mxu0  ;;  %v1647_v44 = vpop.f32.mrf.mxu1 }
 0x1d8   :  { %v7804_v58 = vmax.f32 %v10044_v0, %v1682_v16  ;;  %v7806_v53 = vadd.f32 %v1645_v59, %v1544_v38  ;;  %v1545_v31 = vadd.f32 %v1508_v45, %v7557_v20  ;;  %v10049_v20 = vld [vmem:[#allocation30_spill] sm:$0xff] }
 0x1d9   :  { %v1510_v43 = vpop.f32.mrf.mxu0  ;;  %v1649_v39 = vpop.f32.mrf.mxu1 }
 0x1da   :  { %10045 = vst [vmem:[#allocation9_spill] sm:$0xff] %v7804_v58  ;;  %10046 = vst [vmem:[#allocation42_spill] sm:$0xff] %v7806_v53  ;;  %v1684_v40 = vadd.f32 %v1647_v44, %v1545_v31  ;;  %v1546_v4 = vadd.f32 %v1510_v43, %v7569_v55  ;;  %v10057_v44 = vld [vmem:[#allocation37_spill] sm:$0xff] }
 0x1db   :  { %v1514_v9 = vpop.f32.mrf.mxu0  ;;  %v1653_v42 = vpop.f32.mrf.mxu1  ;;  %5703 = vmatmul.mubr.msk.bf16.gmra.mxu0 %vm168_vm1, %v7815_v12 }
 0x1dc   :  { %5711 = vmatmul.mubr.msk.bf16.gmra.mxu1 %vm168_vm1, %v10048_v23  ;;  %v7822_v21 = vmax.f32 %v10049_v20, %v1684_v40  ;;  %v7824_v15 = vadd.f32 %v1649_v39, %v1546_v4  ;;  %v1547_v55 = vadd.f32 %v1514_v9, %v7576_v34  ;;  %2462 = vmatprep.mubr.bf16.mxu0 %v9928_v19 }
 0x1dd   :  { %2565 = vmatprep.mubr.bf16.mxu1 %v9928_v19  ;;  %v1516_v36 = vpop.f32.mrf.mxu0  ;;  %v1655_v11 = vpop.f32.mrf.mxu1 }
 0x1de   :  { %10050 = vst [vmem:[#allocation17_spill] sm:$0xff] %v7822_v21  ;;  %10051 = vst [vmem:[#allocation45_spill] sm:$0xff] %v7824_v15  ;;  %v1686_v30 = vadd.f32 %v1653_v42, %v1547_v55  ;;  %v1548_v46 = vadd.f32 %v1516_v36, %v7581_v2  ;;  %v7844_v2 = vld [vmem:[%s9840_s0 + $0x68] sm:$0xff]  }
 0x1df   :  { %v1518_v62 = vpop.f32.mrf.mxu0  ;;  %v1657_v48 = vpop.f32.mrf.mxu1 }
 0x1e0   :  { %v7833_v24 = vmax.f32 %v10053_v29, %v1686_v30  ;;  %v7835_v47 = vadd.f32 %v1655_v11, %v1548_v46  ;;  %v1549_v34 = vadd.f32 %v1518_v62, %v7587_v3  ;;  %v10058_v3 = vld [vmem:[#allocation35_spill] sm:$0xff]  ;;  %v7870_v62 = vld [vmem:[%s9840_s0 + $0x70] sm:$0xff]  }
 0x1e1   :  { %v1520_v5 = vpop.f32.mrf.mxu0  ;;  %v1659_v52 = vpop.f32.mrf.mxu1 }
 0x1e2   :  { %10054 = vst [vmem:[#allocation8_spill] sm:$0xff] %v7833_v24  ;;  %10055 = vst [vmem:[#allocation12_spill] sm:$0xff] %v7835_v47  ;;  %v1688_v59 = vadd.f32 %v1657_v48, %v1549_v34  ;;  %v1550_v16 = vadd.f32 %v1520_v5, %v7602_v61  ;;  %v10062_v48 = vld [vmem:[#allocation38_spill] sm:$0xff] }
 0x1e3   :  { %v1724_v38 = vpop.f32.mrf.mxu0  ;;  %v1827_v45 = vpop.f32.mrf.mxu1  ;;  %5704 = vmatmul.mubr.msk.bf16.gmra.mxu0 %vm168_vm1, %v7844_v2 }
 0x1e4   :  { %5712 = vmatmul.mubr.msk.bf16.gmra.mxu1 %vm168_vm1, %v10057_v44  ;;  %v7851_v0 = vmax.f32 %v10058_v3, %v1688_v59  ;;  %v7853_v31 = vadd.f32 %v1659_v52, %v1550_v16  ;;  %v7855_v43 = vadd.f32 %v1827_v45, %v1724_v38  ;;  %2472 = vmatprep.mubr.bf16.mxu0 %v9928_v19 }
 0x1e5   :  { %2575 = vmatprep.mubr.bf16.mxu1 %v9928_v19  ;;  %v1726_v61 = vpop.f32.mrf.mxu0  ;;  %v1829_v39 = vpop.f32.mrf.mxu1 }
 0x1e6   :  { %10059 = vst [vmem:[#allocation47_spill] sm:$0xff] %v7851_v0  ;;  %10060 = vst [vmem:[#allocation44_spill] sm:$0xff] %v7853_v31  ;;  %v7861_v9 = vadd.f32 %v1829_v39, %v1726_v61  ;;  %v10067_v31 = vld [vmem:[#allocation58_spill] sm:$0xff] }
 0x1e7   :  { %v1728_v42 = vpop.f32.mrf.mxu0  ;;  %v1831_v23 = vpop.f32.mrf.mxu1 }
 0x1e8   :  { %v7863_v20 = vadd.f32 %v1831_v23, %v1728_v42  ;;  %v7889_v42 = vld [vmem:[%s9840_s0 + $0x78] sm:$0xff]   ;;  %v10063_v23 = vld [vmem:[#allocation40_spill] sm:$0xff] }
 0x1e9   :  { %v1730_v55 = vpop.f32.mrf.mxu0  ;;  %v1833_v36 = vpop.f32.mrf.mxu1 }
 0x1ea   :  { %v7865_v11 = vadd.f32 %v1833_v36, %v1730_v55 }
 0x1eb   :  { %v1734_v30 = vpop.f32.mrf.mxu0  ;;  %v1837_v46 = vpop.f32.mrf.mxu1  ;;  %5705 = vmatmul.mubr.msk.bf16.gmra.mxu0 %vm168_vm1, %v7870_v62 }
 0x1ec   :  { %5713 = vmatmul.mubr.msk.bf16.gmra.mxu1 %vm168_vm1, %v10062_v48  ;;  %v7876_v29 = vadd.f32 %v1837_v46, %v1734_v30  ;;  %2482 = vmatprep.mubr.bf16.mxu0 %v9928_v19 }
 0x1ed   :  { %2585 = vmatprep.mubr.bf16.mxu1 %v9928_v19  ;;  %v1736_v34 = vpop.f32.mrf.mxu0  ;;  %v1839_v5 = vpop.f32.mrf.mxu1 }
 0x1ee   :  { %v7880_v52 = vadd.f32 %v1839_v5, %v1736_v34 }
 0x1ef   :  { %v1738_v59 = vpop.f32.mrf.mxu0  ;;  %v1841_v16 = vpop.f32.mrf.mxu1 }
 0x1f0   :  { %v7882_v38 = vadd.f32 %v1841_v16, %v1738_v59 }
 0x1f1   :  { %v1740_v45 = vpop.f32.mrf.mxu0  ;;  %v1843_v44 = vpop.f32.mrf.mxu1 }
 0x1f2   :  { %v7884_v3 = vadd.f32 %v1843_v44, %v1740_v45 }
 0x1f3   :  { %v1744_v61 = vpop.f32.mrf.mxu0  ;;  %v1847_v39 = vpop.f32.mrf.mxu1  ;;  %5706 = vmatmul.mubr.msk.bf16.gmra.mxu0 %vm168_vm1, %v7889_v42 }
 0x1f4   :  { %5714 = vmatmul.mubr.msk.bf16.gmra.mxu1 %vm168_vm1, %v10063_v23  ;;  %v7895_v55 = vadd.f32 %v1847_v39, %v1744_v61  ;;  %2492 = vmatprep.mubr.bf16.mxu0 %v9928_v19  ;;  %v7908_v61 = vld [vmem:[%s9840_s0 + $0x80] sm:$0xff]   ;;  %v6371_v39 = vld [vmem:[%s9840_s0 + $0x110] sm:$0xff]  }
 0x1f5   :  { %2595 = vmatprep.mubr.bf16.mxu1 %v9928_v19  ;;  %v1746_v36 = vpop.f32.mrf.mxu0  ;;  %v1849_v30 = vpop.f32.mrf.mxu1 }
 0x1f6   :  { %v7899_v46 = vadd.f32 %v1849_v30, %v1746_v36 }
 0x1f7   :  { %v1748_v48 = vpop.f32.mrf.mxu0  ;;  %v1851_v34 = vpop.f32.mrf.mxu1 }
 0x1f8   :  { %v7901_v5 = vadd.f32 %v1851_v34, %v1748_v48 }
 0x1f9   :  { %v1750_v59 = vpop.f32.mrf.mxu0  ;;  %v1853_v16 = vpop.f32.mrf.mxu1 }
 0x1fa   :  { %v7903_v45 = vadd.f32 %v1853_v16, %v1750_v59  ;;  %v5773_v59 = vcombine.low %v7735_v32, %v7735_v32 }
 0x1fb   :  { %v1754_v44 = vpop.f32.mrf.mxu0  ;;  %v1857_v23 = vpop.f32.mrf.mxu1  ;;  %5707 = vmatmul.mubr.msk.bf16.gmra.mxu0 %vm168_vm1, %v7908_v61 }
 0x1fc   :  { %5715 = vmatmul.mubr.msk.bf16.gmra.mxu1 %vm168_vm1, %v6371_v39  ;;  %v7916_v36 = vadd.f32 %v1857_v23, %v1754_v44  ;;  %2666 = vmatprep.mubr.bf16.mxu0 %v9928_v19  ;;  %v7929_v44 = vsel %vm3384_vm2, %v5773_v59, 0  ;;  %v6210_v23 = vld [vmem:[%s9841_s3 + $0x44] ss:$8 sps:$4 sm:$0xff]  }
 0x1fd   :  { %2805 = vmatprep.mubr.bf16.mxu1 %v9928_v19  ;;  %v1756_v30 = vpop.f32.mrf.mxu0  ;;  %v1859_v48 = vpop.f32.mrf.mxu1  ;;  %10064 = vst [vmem:[#allocation11_spill] sm:$0xff] %v7929_v44 }
 0x1fe   :  { %v7920_v34 = vadd.f32 %v1859_v48, %v1756_v30 }
 0x1ff   :  { %v1758_v16 = vpop.f32.mrf.mxu0  ;;  %v1861_v4 = vpop.f32.mrf.mxu1 }
 0x200   :  { %v7924_v49 = vadd.f32 %v1861_v4, %v1758_v16  ;;  %v6208_v4 = vld [vmem:[%s9841_s3 + $0x40] ss:$8 sps:$4 sm:$0xff]  }
 0x201   :  { %v1760_v50 = vpop.f32.mrf.mxu0  ;;  %v1863_v22 = vpop.f32.mrf.mxu1 }
 0x202   :  { %v7926_v39 = vadd.f32 %v1863_v22, %v1760_v50 }
 0x203   :  { %v1764_v30 = vpop.f32.mrf.mxu0  ;;  %v1867_v48 = vpop.f32.mrf.mxu1  ;;  %5717 = vmatmul.mubr.msk.bf16.vlgmr.msra.gmra.mxu0 %vm168_vm1, %v10065_v25 }
 0x204   :  { %5726 = vmatmul.mubr.msk.bf16.vlgmr.msra.gmra.mxu1 %vm168_vm1, %v7785_v57  ;;  %v7938_v32 = vadd.f32 %v1867_v48, %v1764_v30  ;;  %2676 = vmatprep.mubr.bf16.mxu0 %v9928_v19  ;;  %v6213_v57 = vld [vmem:[%s9841_s3 + $0x34] ss:$8 sps:$4 sm:$0xff]  }
 0x205   :  { %2815 = vmatprep.mubr.bf16.mxu1 %v9928_v19  ;;  %v1766_v22 = vpop.f32.mrf.mxu0  ;;  %v1869_v50 = vpop.f32.mrf.mxu1  ;;  %3555 = vmatpush1.bf16.msra.mxu1 %v7929_v44  ;;  %v6211_v44 = vld [vmem:[%s9841_s3 + $0x30] ss:$8 sps:$4 sm:$0xff]  }
 0x206   :  { %v7946_v59 = vadd.f32 %v1869_v50, %v1766_v22  ;;  %3556 = vmatprep.subr.bf16.mxu1 %v6210_v23  ;;  %v6216_v23 = vld [vmem:[%s9841_s3 + $0x24] ss:$8 sps:$4 sm:$0xff]  }
 0x207   :  { %v1768_v25 = vpop.f32.mrf.mxu0  ;;  %v1871_v16 = vpop.f32.mrf.mxu1 }
 0x208   :  { %v7951_v30 = vadd.f32 %v1871_v16, %v1768_v25  ;;  %v6214_v25 = vld [vmem:[%s9841_s3 + $0x20] ss:$8 sps:$4 sm:$0xff]  }
 0x209   :  { %v1770_v48 = vpop.f32.mrf.mxu0  ;;  %v1873_v54 = vpop.f32.mrf.mxu1  ;;  %3557 = vmatpush1.bf16.msra.mxu1 %v6208_v4 }
 0x20a   :  { %v7956_v6 = vadd.f32 %v1873_v54, %v1770_v48  ;;  %3558 = vmatprep.subr.bf16.mxu1 %v6213_v57 }
 0x20b   :  { %v1774_v22 = vpop.f32.mrf.mxu0  ;;  %v1877_v50 = vpop.f32.mrf.mxu1  ;;  %5718 = vmatmul.mubr.msk.bf16.gmra.mxu0 %vm168_vm1, %v10067_v31 }
 0x20c   :  { %10066 = vst [vmem:[#allocation19_spill] sm:$0xff] %v7956_v6  ;;  %5727 = vmatmul.mubr.msk.bf16.gmra.mxu1 %vm168_vm1, %v7815_v12  ;;  %v7965_v4 = vadd.f32 %v1877_v50, %v1774_v22  ;;  %2686 = vmatprep.mubr.bf16.mxu0 %v9928_v19  ;;  %v6220_v12 = vld [vmem:[%s9841_s3 + $0x14] ss:$8 sps:$4 sm:$0xff]  }
 0x20d   :  { %2825 = vmatprep.mubr.bf16.mxu1 %v9928_v19  ;;  %v1776_v54 = vpop.f32.mrf.mxu0  ;;  %v1879_v57 = vpop.f32.mrf.mxu1  ;;  %3559 = vmatpush1.bf16.msra.mxu1 %v6211_v44  ;;  %v6218_v44 = vld [vmem:[%s9841_s3 + $0x10] ss:$8 sps:$4 sm:$0xff]  }
 0x20e   :  { %v7972_v16 = vadd.f32 %v1879_v57, %v1776_v54  ;;  %3560 = vmatprep.subr.bf16.mxu1 %v6216_v23  ;;  %v6223_v23 = vld [vmem:[%s9841_s3 + $0x4] ss:$8 sps:$4 sm:$0xff]  }
 0x20f   :  { %v1778_v31 = vpop.f32.mrf.mxu0  ;;  %v1881_v48 = vpop.f32.mrf.mxu1 }
 0x210   :  { %v7977_v22 = vadd.f32 %v1881_v48, %v1778_v31  ;;  %v6221_v31 = vld [vmem:[%s9841_s3] ss:$8 sps:$4 sm:$0xff]  }
 0x211   :  { %v1780_v50 = vpop.f32.mrf.mxu0  ;;  %v1883_v40 = vpop.f32.mrf.mxu1  ;;  %3561 = vmatpush1.bf16.msra.mxu1 %v6214_v25 }
 0x212   :  { %v7982_v0 = vadd.f32 %v1883_v40, %v1780_v50  ;;  %3562 = vmatprep.subr.bf16.mxu1 %v6220_v12 }
 0x213   :  { %v1784_v54 = vpop.f32.mrf.mxu0  ;;  %v1887_v57 = vpop.f32.mrf.mxu1  ;;  %5719 = vmatmul.mubr.msk.bf16.gmra.mxu0 %vm168_vm1, %v7563_v18 }
 0x214   :  { %10068 = vst [vmem:[#allocation49_spill] sm:$0xff] %v7982_v0  ;;  %5728 = vmatmul.mubr.msk.bf16.gmra.mxu1 %vm168_vm1, %v7844_v2  ;;  %v7991_v25 = vadd.f32 %v1887_v57, %v1784_v54  ;;  %2696 = vmatprep.mubr.bf16.mxu0 %v9928_v19 }
 0x215   :  { %2835 = vmatprep.mubr.bf16.mxu1 %v9928_v19  ;;  %v1786_v40 = vpop.f32.mrf.mxu0  ;;  %v1889_v12 = vpop.f32.mrf.mxu1  ;;  %3563 = vmatpush1.bf16.msra.mxu1 %v6218_v44 }
 0x216   :  { %v7998_v48 = vadd.f32 %v1889_v12, %v1786_v40  ;;  %3564 = vmatprep.subr.bf16.mxu1 %v6223_v23 }
 0x217   :  { %v1788_v18 = vpop.f32.mrf.mxu0  ;;  %v1891_v50 = vpop.f32.mrf.mxu1 }
 0x218   :  { %v8000_v47 = vadd.f32 %v1891_v50, %v1788_v18 }
 0x219   :  { %v1790_v2 = vpop.f32.mrf.mxu0  ;;  %v1893_v54 = vpop.f32.mrf.mxu1  ;;  %3565 = vmatpush1.bf16.msra.mxu1 %v6221_v31 }
 0x21a   :  { %v8002_v57 = vadd.f32 %v1893_v54, %v1790_v2 }
 0x21b   :  { %v1930_v1 = vpop.f32.mrf.mxu0  ;;  %v2061_v24 = vpop.f32.mrf.mxu1  ;;  %5720 = vmatmul.mubr.msk.bf16.gmra.mxu0 %vm168_vm1, %v7594_v35 }
 0x21c   :  { %10069 = vst [vmem:[#allocation46_spill] sm:$0xff] %v8002_v57  ;;  %5729 = vmatmul.mubr.msk.bf16.gmra.mxu1 %vm168_vm1, %v7870_v62  ;;  %v1999_v44 = vadd.f32 %v1930_v1, %v7855_v43  ;;  %2706 = vmatprep.mubr.bf16.mxu0 %v9928_v19 }
 0x21d   :  { %2845 = vmatprep.mubr.bf16.mxu1 %v9928_v19  ;;  %v1932_v23 = vpop.f32.mrf.mxu0  ;;  %v2063_v40 = vpop.f32.mrf.mxu1 }
 0x21e   :  { %v8011_v12 = vadd.f32 %v2061_v24, %v1999_v44  ;;  %v2000_v31 = vadd.f32 %v1932_v23, %v7861_v9 }
 0x21f   :  { %v1934_v18 = vpop.f32.mrf.mxu0  ;;  %v2065_v50 = vpop.f32.mrf.mxu1 }
 0x220   :  { %v8014_v2 = vadd.f32 %v2063_v40, %v2000_v31  ;;  %v2001_v35 = vadd.f32 %v1934_v18, %v7863_v20 }
 0x221   :  { %v1936_v54 = vpop.f32.mrf.mxu0  ;;  %v2067_v62 = vpop.f32.mrf.mxu1 }
 0x222   :  { %v8017_v57 = vadd.f32 %v2065_v50, %v2001_v35  ;;  %v2002_v1 = vadd.f32 %v1936_v54, %v7865_v11 }
 0x223   :  { %v1940_v43 = vpop.f32.mrf.mxu0  ;;  %v2071_v15 = vpop.f32.mrf.mxu1  ;;  %5721 = vmatmul.mubr.msk.bf16.gmra.mxu0 %vm168_vm1, %v7627_v63 }
 0x224   :  { %5730 = vmatmul.mubr.msk.bf16.gmra.mxu1 %vm168_vm1, %v7889_v42  ;;  %v8024_v24 = vadd.f32 %v2067_v62, %v2002_v1  ;;  %v2003_v9 = vadd.f32 %v1940_v43, %v7876_v29  ;;  %v2962_v44 = vpop.permute.xlu0 %2961  ;;  %2716 = vmatprep.mubr.bf16.mxu0 %v9928_v19 }
 0x225   :  { %2855 = vmatprep.mubr.bf16.mxu1 %v9928_v19  ;;  %v1942_v20 = vpop.f32.mrf.mxu0  ;;  %v2073_v23 = vpop.f32.mrf.mxu1 }
 0x226   :  { %v8029_v11 = vadd.f32 %v2071_v15, %v2003_v9  ;;  %v2004_v40 = vadd.f32 %v1942_v20, %v7880_v52  ;;  %v2964_v31 = vpop.permute.xlu1 %2963 }
 0x227   :  { %v1944_v63 = vpop.f32.mrf.mxu0  ;;  %v2075_v18 = vpop.f32.mrf.mxu1 }
 0x228   :  { %v8032_v50 = vadd.f32 %v2073_v23, %v2004_v40  ;;  %v2005_v42 = vadd.f32 %v1944_v63, %v7882_v38  ;;  %v2966_v35 = vpop.permute.xlu0 %2965  ;;  %v3018_v38 = vsel %vm3017_vm3, %v2962_v44, %v2964_v31 }
 0x229   :  { %v1946_v29 = vpop.f32.mrf.mxu0  ;;  %v2077_v54 = vpop.f32.mrf.mxu1  ;;  %v3046_v44 = vmax.f32 %v7613_v17, %v3018_v38 }
 0x22a   :  { %v8035_v62 = vadd.f32 %v2075_v18, %v2005_v42  ;;  %v2006_v1 = vadd.f32 %v1946_v29, %v7884_v3  ;;  %v2968_v43 = vpop.permute.xlu1 %2967  ;;  %v8060_v29 = vld [vmem:[%s9842_s2] ss:$0 sm:$0xff] }
 0x22b   :  { %v3019_v15 = vsel %vm3017_vm3, %v2966_v35, %v2968_v43  ;;  %v1950_v9 = vpop.f32.mrf.mxu0  ;;  %v2081_v52 = vpop.f32.mrf.mxu1  ;;  %5722 = vmatmul.mubr.msk.bf16.gmra.mxu0 %vm168_vm1, %v7664_v26  ;;  %v3066_v38 = vadd.f32 %v8060_v29, %v3046_v44 }
 0x22c   :  { %5731 = vmatmul.mubr.msk.bf16.gmra.mxu1 %vm168_vm1, %v7908_v61  ;;  %v8044_v20 = vadd.f32 %v2077_v54, %v2006_v1  ;;  %v2007_v23 = vadd.f32 %v1950_v9, %v7895_v55  ;;  %v2970_v40 = vpop.permute.xlu0 %2969  ;;  %2726 = vmatprep.mubr.bf16.mxu0 %v9928_v19  ;;  %v3047_v3 = vmax.f32 %v7634_v51, %v3019_v15  ;;  %v6217_v55 = vld [vmem:[%s9840_s0 + $0x88] sm:$0xff]  }
 0x22d   :  { %2865 = vmatprep.mubr.bf16.mxu1 %v9928_v19  ;;  %v1952_v63 = vpop.f32.mrf.mxu0  ;;  %v2083_v18 = vpop.f32.mrf.mxu1 }
 0x22e   :  { %v8050_v42 = vadd.f32 %v2081_v52, %v2007_v23  ;;  %v2008_v26 = vadd.f32 %v1952_v63, %v7899_v46  ;;  %v2972_v61 = vpop.permute.xlu1 %2971  ;;  %v3067_v46 = vadd.f32 %v8060_v29, %v3047_v3 }
 0x22f   :  { %v1954_v31 = vpop.f32.mrf.mxu0  ;;  %v2085_v35 = vpop.f32.mrf.mxu1 }
 0x230   :  { %v8062_v51 = vadd.f32 %v2083_v18, %v2008_v26  ;;  %v2009_v54 = vadd.f32 %v1954_v31, %v7901_v5  ;;  %v2974_v1 = vpop.permute.xlu0 %2973  ;;  %v3020_v5 = vsel %vm3017_vm3, %v2970_v40, %v2972_v61  ;;  %v3080_v40 = vmax.f32 %v3066_v38, 0.0 }
 0x231   :  { %v1956_v43 = vpop.f32.mrf.mxu0  ;;  %v2087_v17 = vpop.f32.mrf.mxu1  ;;  %v3048_v61 = vmax.f32 %v7649_v8, %v3020_v5 }
 0x232   :  { %v8066_v15 = vadd.f32 %v2085_v35, %v2009_v54  ;;  %v2010_v9 = vadd.f32 %v1956_v43, %v7903_v45  ;;  %v2976_v52 = vpop.permute.xlu1 %2975  ;;  %v3081_v45 = vmax.f32 %v3067_v46, 0.0 }
 0x233   :  { %v3021_v23 = vsel %vm3017_vm3, %v2974_v1, %v2976_v52  ;;  %v1960_v63 = vpop.f32.mrf.mxu0  ;;  %v2091_v33 = vpop.f32.mrf.mxu1  ;;  %5723 = vmatmul.mubr.msk.bf16.gmra.mxu0 %vm168_vm1, %v7687_v7  ;;  %v3068_v8 = vadd.f32 %v8060_v29, %v3048_v61 }
 0x234   :  { %5732 = vmatmul.mubr.msk.bf16.gmra.mxu1 %vm168_vm1, %v6217_v55  ;;  %v8075_v3 = vadd.f32 %v2087_v17, %v2010_v9  ;;  %v2011_v18 = vadd.f32 %v1960_v63, %v7916_v36  ;;  %v2978_v26 = vpop.permute.xlu0 %2977  ;;  %3423 = vmatprep.mubr.bf16.mxu0 %v9928_v19  ;;  %v3049_v44 = vmax.f32 %v7671_v37, %v3021_v23 }
 0x235   :  { %3582 = vmatprep.mubr.bf16.mxu1 %v9928_v19  ;;  %v1962_v31 = vpop.f32.mrf.mxu0  ;;  %v2093_v35 = vpop.f32.mrf.mxu1  ;;  %v3094_v46 = vpack.c.bf16 %v3081_v45, %v3080_v40 }
 0x236   :  { %10070 = vst [vmem:[#allocation10_spill] sm:$0xff] %v8075_v3  ;;  %v8081_v54 = vadd.f32 %v2091_v33, %v2011_v18  ;;  %v2012_v7 = vadd.f32 %v1962_v31, %v7920_v34  ;;  %v2980_v55 = vpop.permute.xlu1 %2979  ;;  %v3069_v37 = vadd.f32 %v8060_v29, %v3049_v44 }
 0x237   :  { %v1964_v1 = vpop.f32.mrf.mxu0  ;;  %v2095_v36 = vpop.f32.mrf.mxu1 }
 0x238   :  { %v8085_v43 = vadd.f32 %v2093_v35, %v2012_v7  ;;  %v2013_v17 = vadd.f32 %v1964_v1, %v7924_v49  ;;  %v2982_v9 = vpop.permute.xlu0 %2981  ;;  %v3022_v49 = vsel %vm3017_vm3, %v2978_v26, %v2980_v55  ;;  %v3083_v35 = vmax.f32 %v3069_v37, 0.0 }
 0x239   :  { %v1966_v52 = vpop.f32.mrf.mxu0  ;;  %v2097_v33 = vpop.f32.mrf.mxu1  ;;  %v3050_v26 = vmax.f32 %v7691_v14, %v3022_v49 }
 0x23a   :  { %v8089_v23 = vadd.f32 %v2095_v36, %v2013_v17  ;;  %v2014_v34 = vadd.f32 %v1966_v52, %v7926_v39  ;;  %v2984_v38 = vpop.permute.xlu1 %2983  ;;  %v3082_v17 = vmax.f32 %v3068_v8, 0.0 }
 0x23b   :  { %v3023_v63 = vsel %vm3017_vm3, %v2982_v9, %v2984_v38  ;;  %v1970_v5 = vpop.f32.mrf.mxu0  ;;  %v2101_v18 = vpop.f32.mrf.mxu1  ;;  %v3070_v14 = vadd.f32 %v8060_v29, %v3050_v26 }
 0x23c   :  { %5776 = vmatmul.mubr.msk.bf16.vlgmr.msra.gmra.mxu1 %vm3368_vm4, %v3094_v46  ;;  %v8096_v45 = vadd.f32 %v2097_v33, %v2014_v34  ;;  %v2015_v44 = vadd.f32 %v1970_v5, %v7938_v32  ;;  %v2986_v31 = vpop.permute.xlu0 %2985  ;;  %v3051_v39 = vmax.f32 %v7710_v60, %v3023_v63  ;;  %v8108_v52 = vpack.c.bf16 %v3083_v35, %v3082_v17 }
 0x23d   :  { %3592 = vmatprep.mubr.bf16.mxu1 %v9928_v19  ;;  %v1972_v7 = vpop.f32.mrf.mxu0  ;;  %v2103_v40 = vpop.f32.mrf.mxu1 }
 0x23e   :  { %10071 = vst [vmem:[#allocation48_spill] sm:$0xff] %v8096_v45  ;;  %v8101_v61 = vadd.f32 %v2101_v18, %v2015_v44  ;;  %v2016_v1 = vadd.f32 %v1972_v7, %v7946_v59  ;;  %v2988_v36 = vpop.permute.xlu1 %2987  ;;  %10072 = vst [vmem:[#allocation21_spill] sm:$0xff] %v8108_v52  ;;  %v3071_v60 = vadd.f32 %v8060_v29, %v3051_v39  ;;  %v8336_v45 = vld [vmem:[%s9841_s3 + $0x9c] ss:$8 sps:$4 sm:$0xff]  }
 0x23f   :  { %v1974_v55 = vpop.f32.mrf.mxu0  ;;  %v2105_v9 = vpop.f32.mrf.mxu1  ;;  %10113 = vst [vmem:[#allocation66_spill] sm:$0xff] %v8336_v45 }
 0x240   :  { %v8105_v46 = vadd.f32 %v2103_v40, %v2016_v1  ;;  %v2017_v32 = vadd.f32 %v1974_v55, %v7951_v30  ;;  %v2990_v59 = vpop.permute.xlu0 %2989  ;;  %v3024_v30 = vsel %vm3017_vm3, %v2986_v31, %v2988_v36  ;;  %v3085_v49 = vmax.f32 %v3071_v60, 0.0 }
 0x241   :  { %v8111_v37 = vpop.f32.mrf.mxu0  ;;  %v8113_v33 = vpop.f32.mrf.mxu1  ;;  %v3084_v1 = vmax.f32 %v3070_v14, 0.0  ;;  %v3052_v17 = vmax.f32 %v7725_v27, %v3024_v30 }
 0x242   :  { %10073 = vst [vmem:[#allocation51_spill] sm:$0xff] %v8111_v37  ;;  %10074 = vst [vmem:[#allocation14_spill] sm:$0xff] %v8113_v33  ;;  %v8115_v34 = vadd.f32 %v2105_v9, %v2017_v32  ;;  %v2992_v38 = vpop.permute.xlu1 %2991 }
 0x243   :  { %v3025_v8 = vsel %vm3017_vm3, %v2990_v59, %v2992_v38  ;;  %v1980_v63 = vpop.f32.mrf.mxu0  ;;  %v2111_v5 = vpop.f32.mrf.mxu1  ;;  %v8132_v31 = vpack.c.bf16 %v3085_v49, %v3084_v1 }
 0x244   :  { %5777 = vmatmul.mubr.msk.bf16.gmra.mxu1 %vm3368_vm4, %v8108_v52  ;;  %v2019_v18 = vadd.f32 %v1980_v63, %v7965_v4  ;;  %v3053_v44 = vmax.f32 %v7745_v41, %v3025_v8 }
 0x245   :  { %3602 = vmatprep.mubr.bf16.mxu1 %v9928_v19  ;;  %v1982_v35 = vpop.f32.mrf.mxu0  ;;  %v2113_v39 = vpop.f32.mrf.mxu1  ;;  %10075 = vst [vmem:[#allocation50_spill] sm:$0xff] %v8132_v31 }
 0x246   :  { %v8125_v7 = vadd.f32 %v2111_v5, %v2019_v18  ;;  %v2020_v40 = vadd.f32 %v1982_v35, %v7972_v16  ;;  %v3073_v36 = vadd.f32 %v8060_v29, %v3053_v44  ;;  %v3072_v16 = vadd.f32 %v8060_v29, %v3052_v17 }
 0x247   :  { %v1984_v26 = vpop.f32.mrf.mxu0  ;;  %v2115_v55 = vpop.f32.mrf.mxu1 }
 0x248   :  { %v8129_v9 = vadd.f32 %v2113_v39, %v2020_v40  ;;  %v2021_v4 = vadd.f32 %v1984_v26, %v7977_v22  ;;  %v3087_v22 = vmax.f32 %v3073_v36, 0.0  ;;  %v3086_v30 = vmax.f32 %v3072_v16, 0.0 }
 0x249   :  { %v8135_v41 = vpop.f32.mrf.mxu0  ;;  %v8137_v32 = vpop.f32.mrf.mxu1 }
 0x24a   :  { %10076 = vst [vmem:[#allocation23_spill] sm:$0xff] %v8135_v41  ;;  %10077 = vst [vmem:[#allocation53_spill] sm:$0xff] %v8137_v32  ;;  %v8139_v60 = vadd.f32 %v2115_v55, %v2021_v4  ;;  %v8152_v35 = vpack.c.bf16 %v3087_v22, %v3086_v30 }
 0x24b   :  { %v1990_v59 = vpop.f32.mrf.mxu0  ;;  %v2121_v27 = vpop.f32.mrf.mxu1 }
 0x24c   :  { %5778 = vmatmul.mubr.msk.bf16.gmra.mxu1 %vm3368_vm4, %v8132_v31  ;;  %v2023_v38 = vadd.f32 %v1990_v59, %v7991_v25  ;;  %10078 = vst [vmem:[#allocation16_spill] sm:$0xff] %v8152_v35 }
 0x24d   :  { %3612 = vmatprep.mubr.bf16.mxu1 %v9928_v19  ;;  %v1992_v14 = vpop.f32.mrf.mxu0  ;;  %v2123_v8 = vpop.f32.mrf.mxu1 }
 0x24e   :  { %v8146_v63 = vadd.f32 %v2121_v27, %v2023_v38  ;;  %v2024_v5 = vadd.f32 %v1992_v14, %v7998_v48 }
 0x24f   :  { %v1994_v18 = vpop.f32.mrf.mxu0  ;;  %v2125_v49 = vpop.f32.mrf.mxu1 }
 0x250   :  { %v8149_v29 = vadd.f32 %v2123_v8, %v2024_v5  ;;  %v2025_v44 = vadd.f32 %v1994_v18, %v8000_v47 }
 0x251   :  { %v8154_v39 = vpop.f32.mrf.mxu0  ;;  %v8156_v25 = vpop.f32.mrf.mxu1 }
 0x252   :  { %10079 = vst [vmem:[#allocation2_spill] sm:$0xff] %v8154_v39  ;;  %10080 = vst [vmem:[#allocation3_spill] sm:$0xff] %v8156_v25  ;;  %v8158_v40 = vadd.f32 %v2125_v49, %v2025_v44 }
 0x253   :  { %v2200_v1 = vpop.f32.mrf.mxu0  ;;  %v8160_v17 = vpop.f32.mrf.mxu1 }
 0x254   :  { %5779 = vmatmul.mubr.msk.bf16.gmra.mxu1 %vm3368_vm4, %v8152_v35  ;;  %v8165_v48 = vadd.f32 %v2200_v1, %v8011_v12 }
 0x255   :  { %3622 = vmatprep.mubr.bf16.mxu1 %v9928_v19  ;;  %v2202_v47 = vpop.f32.mrf.mxu0  ;;  %v8168_v26 = vpop.f32.mrf.mxu1 }
 0x256   :  { %v8171_v55 = vadd.f32 %v2202_v47, %v8014_v2 }
 0x257   :  { %v2204_v4 = vpop.f32.mrf.mxu0  ;;  %v8173_v36 = vpop.f32.mrf.mxu1 }
 0x258   :  { %v8176_v16 = vadd.f32 %v2204_v4, %v8017_v57 }
 0x259   :  { %v8178_v59 = vpop.f32.mrf.mxu0  ;;  %v8180_v27 = vpop.f32.mrf.mxu1 }
 0x25b   :  { %v2210_v12 = vpop.f32.mrf.mxu0  ;;  %v8182_v38 = vpop.f32.mrf.mxu1 }
 0x25c   :  { %v8185_v22 = vadd.f32 %v2210_v12, %v8029_v11 }
 0x25d   :  { %v2212_v14 = vpop.f32.mrf.mxu0  ;;  %v8187_v8 = vpop.f32.mrf.mxu1 }
 0x25e   :  { %v8190_v2 = vadd.f32 %v2212_v14, %v8032_v50 }
 0x25f   :  { %v2214_v5 = vpop.f32.mrf.mxu0  ;;  %v8192_v30 = vpop.f32.mrf.mxu1 }
 0x260   :  { %v8195_v57 = vadd.f32 %v2214_v5, %v8035_v62 }
 0x261   :  { %v8197_v18 = vpop.f32.mrf.mxu0  ;;  %v8199_v49 = vpop.f32.mrf.mxu1 }
 0x262   :  { %10081 = vst [vmem:[#allocation52_spill] sm:$0xff] %v8197_v18 }
 0x263   :  { %v2220_v44 = vpop.f32.mrf.mxu0  ;;  %v8201_v1 = vpop.f32.mrf.mxu1 }
 0x264   :  { %v8204_v11 = vadd.f32 %v2220_v44, %v8050_v42 }
 0x265   :  { %v2222_v47 = vpop.f32.mrf.mxu0  ;;  %v8206_v4 = vpop.f32.mrf.mxu1 }
 0x266   :  { %10082 = vst [vmem:[#allocation13_spill] sm:$0xff] %v8204_v11  ;;  %v8209_v50 = vadd.f32 %v2222_v47, %v8062_v51 }
 0x267   :  { %v2224_v12 = vpop.f32.mrf.mxu0  ;;  %v8211_v14 = vpop.f32.mrf.mxu1 }
 0x268   :  { %10083 = vst [vmem:[#allocation54_spill] sm:$0xff] %v8209_v50  ;;  %v8214_v62 = vadd.f32 %v2224_v12, %v8066_v15 }
 0x269   :  { %v8216_v5 = vpop.f32.mrf.mxu0  ;;  %v8218_v35 = vpop.f32.mrf.mxu1 }
 0x26a   :  { %10084 = vst [vmem:[#allocation18_spill] sm:$0xff] %v8214_v62  ;;  %10085 = vst [vmem:[#allocation56_spill] sm:$0xff] %v8216_v5 }
 0x26b   :  { %v2230_v31 = vpop.f32.mrf.mxu0  ;;  %v8220_v52 = vpop.f32.mrf.mxu1 }
 0x26c   :  { %10086 = vst [vmem:[#allocation24_spill] sm:$0xff] %v8220_v52  ;;  %v8223_v42 = vadd.f32 %v2230_v31, %v8081_v54 }
 0x26d   :  { %v2232_v44 = vpop.f32.mrf.mxu0  ;;  %v8225_v19 = vpop.f32.mrf.mxu1 }
 0x26e   :  { %10087 = vst [vmem:[#allocation20_spill] sm:$0xff] %v8223_v42  ;;  %10088 = vst [vmem:[#allocation4_spill] sm:$0xff] %v8225_v19  ;;  %v8228_v51 = vadd.f32 %v2232_v44, %v8085_v43 }
 0x26f   :  { %v2234_v47 = vpop.f32.mrf.mxu0  ;;  %v8230_v25 = vpop.f32.mrf.mxu1 }
 0x270   :  { %10089 = vst [vmem:[#allocation5_spill] sm:$0xff] %v8228_v51  ;;  %10090 = vst [vmem:[#allocation22_spill] sm:$0xff] %v8230_v25  ;;  %v8233_v15 = vadd.f32 %v2234_v47, %v8089_v23 }
 0x271   :  { %v8235_v12 = vpop.f32.mrf.mxu0  ;;  %v8237_v39 = vpop.f32.mrf.mxu1 }
 0x272   :  { %10091 = vst [vmem:[#allocation25_spill] sm:$0xff] %v8233_v15  ;;  %10092 = vst [vmem:[#allocation57_spill] sm:$0xff] %v8235_v12 }
 0x273   :  { %10093 = vst [vmem:[#allocation26_spill] sm:$0xff] %v8237_v39  ;;  %v2240_v32 = vpop.f32.mrf.mxu0  ;;  %v8239_v41 = vpop.f32.mrf.mxu1 }
 0x274   :  { %10094 = vst [vmem:[#allocation59_spill] sm:$0xff] %v8239_v41  ;;  %v8242_v54 = vadd.f32 %v2240_v32, %v8101_v61 }
 0x275   :  { %v2242_v31 = vpop.f32.mrf.mxu0  ;;  %v8244_v0 = vpop.f32.mrf.mxu1 }
 0x276   :  { %10095 = vst [vmem:[#allocation27_spill] sm:$0xff] %v8242_v54  ;;  %10096 = vst [vmem:[#allocation6_spill] sm:$0xff] %v8244_v0  ;;  %v8247_v43 = vadd.f32 %v2242_v31, %v8105_v46 }
 0x277   :  { %v2244_v44 = vpop.f32.mrf.mxu0  ;;  %v8249_v21 = vpop.f32.mrf.mxu1 }
 0x278   :  { %10097 = vst [vmem:[#allocation28_spill] sm:$0xff] %v8247_v43  ;;  %10098 = vst [vmem:[#allocation32_spill] sm:$0xff] %v8249_v21  ;;  %v8252_v23 = vadd.f32 %v2244_v44, %v8115_v34  ;;  %v5744_v43 = vld [vmem:[%s9841_s3 + $0xa8] sm:$0x33] }
 0x279   :  { %v8254_v47 = vpop.f32.mrf.mxu0  ;;  %v8256_v53 = vpop.f32.mrf.mxu1  ;;  %v8327_v54 = vcombine.high %v5744_v43, %v5744_v43  ;;  %v5755_v37 = vcombine.low %v5744_v43, %v5744_v43  ;;  %v8351_v43 = vld [vmem:[%s9841_s3 + $0x98] ss:$8 sps:$4 sm:$0xff]  }
 0x27a   :  { %10099 = vst [vmem:[#allocation30_spill] sm:$0xff] %v8252_v23  ;;  %10100 = vst [vmem:[#allocation33_spill] sm:$0xff] %v8254_v47 }
 0x27b   :  { %10101 = vst [vmem:[#allocation37_spill] sm:$0xff] %v8256_v53  ;;  %v2250_v10 = vpop.f32.mrf.mxu0  ;;  %v8258_v58 = vpop.f32.mrf.mxu1  ;;  %10112 = vst [vmem:[#allocation65_spill] sm:$0xff] %v8327_v54  ;;  %5757 = vmatprep.subr.msk.bf16.mxu0 %vm3384_vm2, %v8327_v54  ;;  %v8341_v15 = vsel %vm3384_vm2, %v5755_v37, 0  ;;  %v8357_v54 = vld [vmem:[%s9841_s3 + $0x8c] ss:$8 sps:$4 sm:$0xff]  }
 0x27c   :  { %v8261_v61 = vadd.f32 %v2250_v10, %v8125_v7  ;;  %10114 = vst [vmem:[#allocation67_spill] sm:$0xff] %v8341_v15  ;;  %3396 = vmatpush1.bf16.msra.mxu0 %v8341_v15  ;;  %10115 = vst [vmem:[#allocation68_spill] sm:$0xff] %v8351_v43  ;;  %v8371_v15 = vld [vmem:[%s9841_s3 + $0x88] ss:$8 sps:$4 sm:$0xff]  }
 0x27d   :  { %v2252_v32 = vpop.f32.mrf.mxu0  ;;  %v8263_v13 = vpop.f32.mrf.mxu1  ;;  %3397 = vmatprep.subr.bf16.mxu0 %v8336_v45  ;;  %10116 = vst [vmem:[#allocation69_spill] sm:$0xff] %v8357_v54  ;;  %10118 = vst [vmem:[#allocation71_spill] sm:$0xff] %v8371_v15  ;;  %v8377_v45 = vld [vmem:[%s9841_s3 + $0x7c] ss:$8 sps:$4 sm:$0xff]  }
 0x27e   :  { %10102 = vst [vmem:[#allocation35_spill] sm:$0xff] %v8261_v61  ;;  %v8266_v46 = vadd.f32 %v2252_v32, %v8129_v9  ;;  %10119 = vst [vmem:[#allocation72_spill] sm:$0xff] %v8377_v45 }
 0x27f   :  { %v2254_v31 = vpop.f32.mrf.mxu0  ;;  %v8268_v28 = vpop.f32.mrf.mxu1 }
 0x280   :  { %10103 = vst [vmem:[#allocation38_spill] sm:$0xff] %v8266_v46  ;;  %v8271_v34 = vadd.f32 %v2254_v31, %v8139_v60  ;;  %3398 = vmatpush1.bf16.msra.mxu0 %v8351_v43  ;;  %v8391_v43 = vld [vmem:[%s9841_s3 + $0x78] ss:$8 sps:$4 sm:$0xff]  }
 0x281   :  { %v8273_v44 = vpop.f32.mrf.mxu0  ;;  %v8275_v56 = vpop.f32.mrf.mxu1  ;;  %3399 = vmatprep.subr.bf16.mxu0 %v8357_v54  ;;  %10123 = vst [vmem:[#allocation76_spill] sm:$0xff] %v8391_v43 }
 0x282   :  { %10104 = vst [vmem:[#allocation40_spill] sm:$0xff] %v8271_v34  ;;  %10105 = vst [vmem:[#allocation55_spill] sm:$0xff] %v8273_v44 }
 0x283   :  { %10106 = vst [vmem:[#allocation58_spill] sm:$0xff] %v8275_v56  ;;  %v2260_v47 = vpop.f32.mrf.mxu0  ;;  %v8277_v23 = vpop.f32.mrf.mxu1 }
 0x284   :  { %v8280_v10 = vadd.f32 %v2260_v47, %v8146_v63  ;;  %3400 = vmatpush1.bf16.msra.mxu0 %v8371_v15 }
 0x285   :  { %v2262_v7 = vpop.f32.mrf.mxu0  ;;  %v8282_v61 = vpop.f32.mrf.mxu1  ;;  %3401 = vmatprep.subr.bf16.mxu0 %v8377_v45 }
 0x286   :  { %10107 = vst [vmem:[#allocation60_spill] sm:$0xff] %v8280_v10  ;;  %v8285_v9 = vadd.f32 %v2262_v7, %v8149_v29 }
 0x287   :  { %v2264_v32 = vpop.f32.mrf.mxu0  ;;  %v8287_v46 = vpop.f32.mrf.mxu1 }
 0x288   :  { %10108 = vst [vmem:[#allocation61_spill] sm:$0xff] %v8285_v9  ;;  %v8290_v60 = vadd.f32 %v2264_v32, %v8158_v40  ;;  %3402 = vmatpush1.bf16.msra.mxu0 %v8391_v43 }
 0x289   :  { %v8292_v31 = vpop.f32.mrf.mxu0  ;;  %v8294_v44 = vpop.f32.mrf.mxu1 }
 0x28a   :  { %10109 = vst [vmem:[#allocation62_spill] sm:$0xff] %v8290_v60  ;;  %10110 = vst [vmem:[#allocation63_spill] sm:$0xff] %v8292_v31 }
 0x28b   :  { %10111 = vst [vmem:[#allocation64_spill] sm:$0xff] %v8294_v44  ;;  %v8296_v56 = vpop.f32.mrf.mxu0  ;;  %v8298_v63 = vpop.f32.mrf.mxu1 }
 0x28d   :  { %v8300_v47 = vpop.f32.mrf.mxu0  ;;  %v8302_v10 = vpop.f32.mrf.mxu1 }
 0x28f   :  { %v8304_v29 = vpop.f32.mrf.mxu0  ;;  %v8306_v7 = vpop.f32.mrf.mxu1 }
 0x291   :  { %v8308_v9 = vpop.f32.mrf.mxu0  ;;  %v8310_v40 = vpop.f32.mrf.mxu1 }
 0x293   :  { %v8312_v32 = vpop.f32.mrf.mxu0 }
 0x294   :  { %v8314_v31 = vpop.f32.mrf.mxu1 }
 0x295   :  { %v8316_v44 = vpop.f32.mrf.mxu0 }
 0x296   :  { %v8318_v60 = vpop.f32.mrf.mxu1 }
 0x297   :  { %v8320_v34 = vpop.f32.mrf.mxu0 }
 0x298   :  { %v8322_v33 = vpop.f32.mrf.mxu1 }
 0x299   :  { %v8329_v6 = vpop.f32.mrf.mxu0 }
 0x29a   :  { %v8331_v12 = vpop.f32.mrf.mxu1 }
 0x29b   :  { %v8343_v53 = vpop.f32.mrf.mxu0 }
 0x29c   :  { %v8345_v51 = vpop.f32.mrf.mxu1 }
 0x29d   :  { %v8359_v37 = vpop.f32.mrf.mxu0 }
 0x29e   :  { %v8361_v21 = vpop.f32.mrf.mxu1 }
 0x29f   :  { %v8363_v42 = vpop.f32.mrf.mxu0 }
 0x2a0   :  { %v8365_v0 = vpop.f32.mrf.mxu1 }
 0x2a1   :  { %10117 = vst [vmem:[#allocation70_spill] sm:$0xff] %v8365_v0  ;;  %v8379_v41 = vpop.f32.mrf.mxu0 }
 0x2a2   :  { %v8381_v5 = vpop.f32.mrf.mxu1 }
 0x2a3   :  { %10120 = vst [vmem:[#allocation73_spill] sm:$0xff] %v8381_v5  ;;  %v8383_v3 = vpop.f32.mrf.mxu0 }
 0x2a4   :  { %10121 = vst [vmem:[#allocation74_spill] sm:$0xff] %v8383_v3  ;;  %v8385_v62 = vpop.f32.mrf.mxu1 }
 0x2a5   :  { %10122 = vst [vmem:[#allocation75_spill] sm:$0xff] %v8385_v62  ;;  %v8394_v54 = vpop.f32.mrf.mxu0 }
 0x2a6   :  { %10124 = vst [vmem:[#allocation77_spill] sm:$0xff] %v8394_v54  ;;  %v8396_v39 = vpop.f32.mrf.mxu1 }
 0x2a7   :  { %10125 = vst [vmem:[#allocation78_spill] sm:$0xff] %v8396_v39  ;;  %v8398_v50 = vpop.f32.mrf.mxu0 }
 0x2a8   :  { %10126 = vst [vmem:[#allocation79_spill] sm:$0xff] %v8398_v50  ;;  %v8400_v25 = vpop.f32.mrf.mxu1 }
 0x2a9   :  { %10127 = vst [vmem:[#allocation80_spill] sm:$0xff] %v8400_v25  ;;  %v8403_v62 = vpop.f32.mrf.mxu0 }
 0x2aa   :  { %10128 = vst [vmem:[#allocation81_spill] sm:$0xff] %v8403_v62  ;;  %v8405_v15 = vpop.f32.mrf.mxu1 }
 0x2ab   :  { %10129 = vst [vmem:[#allocation82_spill] sm:$0xff] %v8405_v15  ;;  %v8407_v11 = vpop.f32.mrf.mxu0 }
 0x2ac   :  { %10130 = vst [vmem:[#allocation83_spill] sm:$0xff] %v8407_v11  ;;  %v8409_v19 = vpop.f32.mrf.mxu1 }
 0x2ad   :  { %10131 = vst [vmem:[#allocation84_spill] sm:$0xff] %v8409_v19  ;;  %v8411_v5 = vpop.f32.mrf.mxu0 }
 0x2ae   :  { %10132 = vst [vmem:[#allocation85_spill] sm:$0xff] %v8411_v5  ;;  %v8413_v45 = vpop.f32.mrf.mxu1 }
 0x2af   :  { %10133 = vst [vmem:[#allocation86_spill] sm:$0xff] %v8413_v45  ;;  %v8415_v54 = vpop.f32.mrf.mxu0 }
 0x2b0   :  { %10134 = vst [vmem:[#allocation87_spill] sm:$0xff] %v8415_v54  ;;  %v8417_v39 = vpop.f32.mrf.mxu1 }
 0x2b1   :  { %10135 = vst [vmem:[#allocation88_spill] sm:$0xff] %v8417_v39  ;;  %v8419_v50 = vpop.f32.mrf.mxu0 }
 0x2b2   :  { %10136 = vst [vmem:[#allocation89_spill] sm:$0xff] %v8419_v50  ;;  %v8421_v25 = vpop.f32.mrf.mxu1 }
 0x2b3   :  { %10137 = vst [vmem:[#allocation90_spill] sm:$0xff] %v8421_v25  ;;  %v2484_v43 = vpop.f32.mrf.mxu0 }
 0x2b4   :  { %v2587_v62 = vpop.f32.mrf.mxu1  ;;  %v2485_v15 = vadd.f32 %v2484_v43, %v8258_v58 }
 0x2b5   :  { %v2486_v0 = vpop.f32.mrf.mxu0 }
 0x2b6   :  { %v2589_v11 = vpop.f32.mrf.mxu1  ;;  %v8424_v3 = vadd.f32 %v2587_v62, %v2485_v15  ;;  %v2487_v19 = vadd.f32 %v2486_v0, %v8263_v13  ;;  %v8440_v13 = vld [vmem:[%s9841_s3 + $0x68] ss:$8 sps:$4 sm:$0xff]  }
 0x2b7   :  { %v2488_v5 = vpop.f32.mrf.mxu0  ;;  %10139 = vst [vmem:[#allocation92_spill] sm:$0xff] %v8440_v13 }
 0x2b8   :  { %v2591_v45 = vpop.f32.mrf.mxu1  ;;  %v8427_v52 = vadd.f32 %v2589_v11, %v2487_v19  ;;  %v2489_v39 = vadd.f32 %v2488_v5, %v8268_v28  ;;  %v8445_v19 = vld [vmem:[%s9841_s3 + $0x6c] ss:$8 sps:$4 sm:$0xff]   ;;  %v2437_v5 = vadd.f32 %v8300_v47, %v8168_v26 }
 0x2b9   :  { %v8430_v54 = vpop.f32.mrf.mxu0  ;;  %3403 = vmatprep.subr.bf16.mxu0 %v8445_v19 }
 0x2ba   :  { %v8432_v50 = vpop.f32.mrf.mxu1  ;;  %v8434_v25 = vadd.f32 %v2591_v45, %v2489_v39  ;;  %v2435_v45 = vadd.f32 %v8296_v56, %v8160_v17  ;;  %3404 = vmatpush1.bf16.msra.mxu0 %v8440_v13  ;;  %v2607_v47 = vadd.f32 %v8302_v10, %v2437_v5 }
 0x2bb   :  { %10138 = vst [vmem:[#allocation91_spill] sm:$0xff] %v8432_v50  ;;  %v2494_v18 = vpop.f32.mrf.mxu0 }
 0x2bc   :  { %v2597_v58 = vpop.f32.mrf.mxu1  ;;  %v2495_v43 = vadd.f32 %v2494_v18, %v8277_v23  ;;  %v2606_v17 = vadd.f32 %v8298_v63, %v2435_v45 }
 0x2bd   :  { %v2496_v28 = vpop.f32.mrf.mxu0 }
 0x2be   :  { %v2599_v0 = vpop.f32.mrf.mxu1  ;;  %v8449_v39 = vadd.f32 %v2597_v58, %v2495_v43  ;;  %v2497_v11 = vadd.f32 %v2496_v28, %v8282_v61  ;;  %v2439_v61 = vadd.f32 %v8304_v29, %v8173_v36  ;;  %v2441_v43 = vadd.f32 %v8308_v9, %v8180_v27 }
 0x2bf   :  { %v2498_v18 = vpop.f32.mrf.mxu0  ;;  %v2447_v27 = vadd.f32 %v8316_v44, %v8187_v8  ;;  %v8491_v8 = vld [vmem:[%s9841_s3 + $0x58] ss:$8 sps:$4 sm:$0xff]  }
 0x2c0   :  { %v2601_v62 = vpop.f32.mrf.mxu1  ;;  %v8456_v15 = vadd.f32 %v2599_v0, %v2497_v11  ;;  %v2499_v23 = vadd.f32 %v2498_v18, %v8287_v46  ;;  %v2445_v46 = vadd.f32 %v8312_v32, %v8182_v38  ;;  %v2608_v63 = vadd.f32 %v8306_v7, %v2439_v61  ;;  %v8483_v38 = vld [vmem:[%s9841_s3 + $0x5c] ss:$8 sps:$4 sm:$0xff]  }
 0x2c1   :  { %v8459_v50 = vpop.f32.mrf.mxu0  ;;  %v2609_v36 = vadd.f32 %v8310_v40, %v2441_v43  ;;  %v2449_v40 = vadd.f32 %v8320_v34, %v8192_v30  ;;  %3405 = vmatprep.subr.bf16.mxu0 %v8483_v38 }
 0x2c2   :  { %v8461_v56 = vpop.f32.mrf.mxu1  ;;  %v8466_v58 = vadd.f32 %v2601_v62, %v2499_v23  ;;  %v2610_v7 = vadd.f32 %v8314_v31, %v2445_v46  ;;  %v2451_v31 = vadd.f32 %v8329_v6, %v8199_v49  ;;  %3406 = vmatpush1.bf16.msra.mxu0 %v8491_v8 }
 0x2c3   :  { %v2668_v28 = vpop.f32.mrf.mxu0  ;;  %v2612_v6 = vadd.f32 %v8322_v33, %v2449_v40  ;;  %v10142_v40 = vld [vmem:[#allocation74_spill] sm:$0xff] }
 0x2c4   :  { %v2807_v26 = vpop.f32.mrf.mxu1  ;;  %v2737_v0 = vadd.f32 %v2668_v28, %v2606_v17  ;;  %v2611_v17 = vadd.f32 %v8318_v60, %v2447_v27  ;;  %v2272_v28 = vadd.f32 %v8178_v59, %v8024_v24  ;;  %v2457_v60 = vadd.f32 %v8359_v37, %v8206_v4 }
 0x2c5   :  { %v2670_v11 = vpop.f32.mrf.mxu0 }
 0x2c6   :  { %v2809_v18 = vpop.f32.mrf.mxu1  ;;  %v2876_v45 = vadd.f32 %v2807_v26, %v2737_v0  ;;  %v2738_v13 = vadd.f32 %v2670_v11, %v2607_v47  ;;  %v2455_v26 = vadd.f32 %v8343_v53, %v8201_v1 }
 0x2c7   :  { %v2672_v29 = vpop.f32.mrf.mxu0 }
 0x2c8   :  { %v2811_v62 = vpop.f32.mrf.mxu1  ;;  %v8478_v9 = vmax.f32 %v8165_v48, %v2876_v45  ;;  %v2877_v10 = vadd.f32 %v2809_v18, %v2738_v13  ;;  %v2739_v5 = vadd.f32 %v2672_v29, %v2608_v63  ;;  %v2614_v18 = vadd.f32 %v8345_v51, %v2455_v26 }
 0x2c9   :  { %v2674_v32 = vpop.f32.mrf.mxu0  ;;  %v2459_v63 = vadd.f32 %v8363_v42, %v8211_v14  ;;  %v2615_v51 = vadd.f32 %v8361_v21, %v2457_v60 }
 0x2ca   :  { %v2813_v23 = vpop.f32.mrf.mxu1  ;;  %v3102_v48 = vmax.f32 %v8171_v55, %v2877_v10  ;;  %v2878_v44 = vadd.f32 %v2811_v62, %v2739_v5  ;;  %v2740_v13 = vadd.f32 %v2674_v32, %v2609_v36  ;;  %3157 = vrot.lane.b32.xlu0 %v8478_v9, %s6384_s17  ;;  %v10140_v10 = vld [vmem:[#allocation52_spill] sm:$0xff] }
 0x2cb   :  { %v2678_v30 = vpop.f32.mrf.mxu0  ;;  %v2276_v5 = vadd.f32 %v10140_v10, %v8044_v20  ;;  %v5820_v20 = vld [vmem:[%s9841_s3 + $0x158] sm:$0x33] }
 0x2cc   :  { %v2817_v34 = vpop.f32.mrf.mxu1  ;;  %v8502_v61 = vmax.f32 %v8176_v16, %v2878_v44  ;;  %v2879_v55 = vadd.f32 %v2813_v23, %v2740_v13  ;;  %v2741_v43 = vadd.f32 %v2678_v30, %v2610_v7  ;;  %v2613_v16 = vadd.f32 %v8331_v12, %v2451_v31  ;;  %v10141_v7 = vld [vmem:[#allocation24_spill] sm:$0xff]  ;;  %v10144_v13 = vld [vmem:[#allocation73_spill] sm:$0xff] }
 0x2cd   :  { %v2680_v47 = vpop.f32.mrf.mxu0  ;;  %v10145_v30 = vld [vmem:[#allocation4_spill] sm:$0xff]  ;;  %v5831_v26 = vcombine.low %v5820_v20, %v5820_v20 }
 0x2ce   :  { %v2819_v0 = vpop.f32.mrf.mxu1  ;;  %v2880_v49 = vadd.f32 %v2817_v34, %v2741_v43  ;;  %v2742_v46 = vadd.f32 %v2680_v47, %v2611_v17  ;;  %3161 = vrot.lane.b32.xlu1 %v8502_v61, %s6384_s17  ;;  %3159 = vrot.lane.b32.xlu0 %v3102_v48, %s6384_s17  ;;  %v3104_v11 = vmax.f32 %v2272_v28, %v2879_v55  ;;  %v10146_v34 = vld [vmem:[#allocation77_spill] sm:$0xff] }
 0x2cf   :  { %v2682_v24 = vpop.f32.mrf.mxu0  ;;  %v2467_v17 = vadd.f32 %v10146_v34, %v10145_v30  ;;  %v8556_v28 = vcombine.high %v5820_v20, %v5820_v20  ;;  %v10160_v20 = vld [vmem:[#allocation80_spill] sm:$0xff] }
 0x2d0   :  { %v2821_v59 = vpop.f32.mrf.mxu1  ;;  %v8516_v53 = vmax.f32 %v8185_v22, %v2880_v49  ;;  %v2881_v1 = vadd.f32 %v2819_v0, %v2742_v46  ;;  %v2743_v33 = vadd.f32 %v2682_v24, %v2612_v6  ;;  %v2461_v22 = vadd.f32 %v8379_v41, %v8218_v35  ;;  %v10147_v0 = vld [vmem:[#allocation13_spill] sm:$0xff]  ;;  %v10149_v24 = vld [vmem:[#allocation22_spill] sm:$0xff]  ;;  %v8591_v34 = vld [vmem:[%s9841_s3 + $0x148] ss:$8 sps:$4 sm:$0xff]  }
 0x2d1   :  { %v2684_v45 = vpop.f32.mrf.mxu0  ;;  %v2465_v41 = vadd.f32 %v10142_v40, %v10141_v7  ;;  %5833 = vmatprep.subr.msk.bf16.mxu1 %vm3384_vm2, %v8556_v28  ;;  %v10156_v40 = vld [vmem:[#allocation10_spill] sm:$0xff] }
 0x2d2   :  { %v2823_v36 = vpop.f32.mrf.mxu1  ;;  %v3106_v12 = vmax.f32 %v8190_v2, %v2881_v1  ;;  %v2882_v29 = vadd.f32 %v2821_v59, %v2743_v33  ;;  %v2744_v62 = vadd.f32 %v2684_v45, %v2613_v16  ;;  %3163 = vrot.lane.b32.xlu1 %v3104_v11, %s6384_s17  ;;  %3165 = vrot.lane.b32.xlu0 %v8516_v53, %s6384_s17  ;;  %v8534_v2 = vld [vmem:[%s9841_s3 + $0x100] sm:$0x33]  ;;  %v10148_v16 = vld [vmem:[#allocation75_spill] sm:$0xff] }
 0x2d3   :  { %v2688_v4 = vpop.f32.mrf.mxu0  ;;  %v8542_v21 = vcombine.high %v8534_v2, %v8534_v2  ;;  %v2617_v31 = vadd.f32 %v10144_v13, %v2461_v22  ;;  %v2618_v60 = vadd.f32 %v10148_v16, %v2465_v41  ;;  %v10150_v59 = vld [vmem:[#allocation79_spill] sm:$0xff]  ;;  %v10157_v41 = vld [vmem:[#allocation56_spill] sm:$0xff] }
 0x2d4   :  { %v2827_v37 = vpop.f32.mrf.mxu1  ;;  %v8529_v14 = vmax.f32 %v8195_v57, %v2882_v29  ;;  %v2883_v42 = vadd.f32 %v2823_v36, %v2744_v62  ;;  %v2745_v27 = vadd.f32 %v2688_v4, %v2614_v18  ;;  %v10143_v57 = vld [vmem:[#allocation70_spill] sm:$0xff]  ;;  %v2469_v11 = vadd.f32 %v10150_v59, %v10149_v24  ;;  %v10153_v62 = vld [vmem:[#allocation81_spill] sm:$0xff] }
 0x2d5   :  { %v2690_v35 = vpop.f32.mrf.mxu0  ;;  %v2616_v23 = vadd.f32 %v10143_v57, %v2459_v63  ;;  %5804 = vmatprep.subr.msk.bf16.mxu0 %vm3384_vm2, %v8542_v21  ;;  %v8567_v18 = vsel %vm3384_vm2, %v5831_v26, 0  ;;  %v10151_v63 = vld [vmem:[#allocation54_spill] sm:$0xff]  ;;  %v10159_v57 = vld [vmem:[#allocation83_spill] sm:$0xff] }
 0x2d6   :  { %v2829_v32 = vpop.f32.mrf.mxu1  ;;  %v2884_v48 = vadd.f32 %v2827_v37, %v2745_v27  ;;  %v2746_v44 = vadd.f32 %v2690_v35, %v2615_v51  ;;  %3167 = vrot.lane.b32.xlu1 %v3106_v12, %s6384_s17  ;;  %3169 = vrot.lane.b32.xlu0 %v8529_v14, %s6384_s17  ;;  %v3108_v47 = vmax.f32 %v2276_v5, %v2883_v42  ;;  %v10152_v29 = vld [vmem:[#allocation26_spill] sm:$0xff] }
 0x2d7   :  { %v2692_v55 = vpop.f32.mrf.mxu0  ;;  %v2471_v22 = vadd.f32 %v10153_v62, %v10152_v29  ;;  %3893 = vmatpush1.bf16.msra.mxu1 %v8567_v18  ;;  %v10154_v51 = vld [vmem:[#allocation78_spill] sm:$0xff]  ;;  %v2280_v35 = vadd.f32 %v10157_v41, %v10156_v40  ;;  %v2620_v13 = vadd.f32 %v10160_v20, %v2469_v11  ;;  %v10168_v62 = vld [vmem:[#allocation5_spill] sm:$0xff] }
 0x2d8   :  { %v2831_v43 = vpop.f32.mrf.mxu1  ;;  %v8559_v6 = vmax.f32 %v10147_v0, %v2884_v48  ;;  %v2885_v49 = vadd.f32 %v2829_v32, %v2746_v44  ;;  %v2747_v46 = vadd.f32 %v2692_v55, %v2616_v23  ;;  %v2619_v42 = vadd.f32 %v10154_v51, %v2467_v17  ;;  %v10155_v27 = vld [vmem:[#allocation18_spill] sm:$0xff]  ;;  %v10158_v32 = vld [vmem:[#allocation59_spill] sm:$0xff]  ;;  %v10169_v51 = vld [vmem:[#allocation37_spill] sm:$0xff] }
 0x2d9   :  { %v2694_v1 = vpop.f32.mrf.mxu0  ;;  %v2475_v23 = vadd.f32 %v10159_v57, %v10158_v32  ;;  %v8596_v17 = vld [vmem:[%s9841_s3 + $0x14c] ss:$8 sps:$4 sm:$0xff]   ;;  %v10161_v55 = vld [vmem:[#allocation82_spill] sm:$0xff] }
 0x2da   :  { %v2833_v33 = vpop.f32.mrf.mxu1  ;;  %v3110_v45 = vmax.f32 %v10151_v63, %v2885_v49  ;;  %v2886_v36 = vadd.f32 %v2831_v43, %v2747_v46  ;;  %v2748_v12 = vadd.f32 %v2694_v1, %v2617_v31  ;;  %3171 = vrot.lane.b32.xlu1 %v3108_v47, %s6384_s17  ;;  %3173 = vrot.lane.b32.xlu0 %v8559_v6, %s6384_s17  ;;  %v10162_v26 = vld [vmem:[#allocation6_spill] sm:$0xff]  ;;  %v10163_v47 = vld [vmem:[#allocation85_spill] sm:$0xff]  ;;  %v10165_v1 = vld [vmem:[#allocation84_spill] sm:$0xff] }
 0x2db   :  { %v2698_v4 = vpop.f32.mrf.mxu0  ;;  %v2621_v43 = vadd.f32 %v10161_v55, %v2471_v22  ;;  %v2477_v0 = vadd.f32 %v10163_v47, %v10162_v26  ;;  %3894 = vmatprep.subr.bf16.mxu1 %v8596_v17  ;;  %v10166_v63 = vld [vmem:[#allocation32_spill] sm:$0xff]  ;;  %v10171_v40 = vld [vmem:[#allocation86_spill] sm:$0xff] }
 0x2dc   :  { %v2837_v37 = vpop.f32.mrf.mxu1  ;;  %v8578_v10 = vmax.f32 %v10155_v27, %v2886_v36  ;;  %v2887_v5 = vadd.f32 %v2833_v33, %v2748_v12  ;;  %v2749_v7 = vadd.f32 %v2698_v4, %v2618_v60  ;;  %v10164_v60 = vld [vmem:[#allocation20_spill] sm:$0xff]  ;;  %v2622_v33 = vadd.f32 %v10165_v1, %v2475_v23  ;;  %3895 = vmatpush1.bf16.msra.mxu1 %v8591_v34  ;;  %v8628_v47 = vld [vmem:[%s9841_s3 + $0x138] ss:$8 sps:$4 sm:$0xff]  }
 0x2dd   :  { %v2700_v48 = vpop.f32.mrf.mxu0  ;;  %v2623_v41 = vadd.f32 %v10171_v40, %v2477_v0  ;;  %v8633_v0 = vld [vmem:[%s9841_s3 + $0x13c] ss:$8 sps:$4 sm:$0xff]  }
 0x2de   :  { %v2839_v44 = vpop.f32.mrf.mxu1  ;;  %v2888_v31 = vadd.f32 %v2837_v37, %v2749_v7  ;;  %v2750_v30 = vadd.f32 %v2700_v48, %v2619_v42  ;;  %3175 = vrot.lane.b32.xlu1 %v3110_v45, %s6384_s17  ;;  %3177 = vrot.lane.b32.xlu0 %v8578_v10, %s6384_s17  ;;  %v3112_v16 = vmax.f32 %v2280_v35, %v2887_v5  ;;  %v10167_v45 = vld [vmem:[#allocation87_spill] sm:$0xff]  ;;  %v10170_v42 = vld [vmem:[#allocation89_spill] sm:$0xff]  ;;  %v10173_v48 = vld [vmem:[#allocation48_spill] sm:$0xff] }
 0x2df   :  { %v2702_v49 = vpop.f32.mrf.mxu0  ;;  %v2479_v36 = vadd.f32 %v10167_v45, %v10166_v63  ;;  %v2481_v27 = vadd.f32 %v10170_v42, %v10169_v51  ;;  %v10172_v35 = vld [vmem:[#allocation25_spill] sm:$0xff]  ;;  %v10179_v63 = vld [vmem:[#allocation27_spill] sm:$0xff]  ;;  %3896 = vmatprep.subr.bf16.mxu1 %v8633_v0  ;;  %v10182_v40 = vld [vmem:[#allocation30_spill] sm:$0xff] }
 0x2e0   :  { %v2841_v46 = vpop.f32.mrf.mxu1  ;;  %v8602_v24 = vmax.f32 %v10164_v60, %v2888_v31  ;;  %v2889_v59 = vadd.f32 %v2839_v44, %v2750_v30  ;;  %v2751_v11 = vadd.f32 %v2702_v49, %v2620_v13  ;;  %v10174_v44 = vld [vmem:[#allocation57_spill] sm:$0xff]  ;;  %v10175_v30 = vld [vmem:[#allocation88_spill] sm:$0xff]  ;;  %v10176_v49 = vld [vmem:[#allocation19_spill] sm:$0xff]  ;;  %3897 = vmatpush1.bf16.msra.mxu1 %v8628_v47 }
 0x2e1   :  { %v2704_v12 = vpop.f32.mrf.mxu0  ;;  %v2284_v20 = vadd.f32 %v10174_v44, %v10173_v48  ;;  %v2624_v55 = vadd.f32 %v10175_v30, %v2479_v36  ;;  %v10178_v60 = vld [vmem:[#allocation90_spill] sm:$0xff]  ;;  %v8660_v48 = vld [vmem:[%s9841_s3 + $0x12c] ss:$8 sps:$4 sm:$0xff]  }
 0x2e2   :  { %v2843_v29 = vpop.f32.mrf.mxu1  ;;  %v3114_v22 = vmax.f32 %v10168_v62, %v2889_v59  ;;  %v2890_v4 = vadd.f32 %v2841_v46, %v2751_v11  ;;  %v2752_v37 = vadd.f32 %v2704_v12, %v2621_v43  ;;  %3179 = vrot.lane.b32.xlu1 %v3112_v16, %s6384_s17  ;;  %3181 = vrot.lane.b32.xlu0 %v8602_v24, %s6384_s17  ;;  %v10177_v46 = vld [vmem:[#allocation51_spill] sm:$0xff] }
 0x2e3   :  { %v2708_v5 = vpop.f32.mrf.mxu0  ;;  %v2018_v16 = vadd.f32 %v10177_v46, %v10176_v49  ;;  %v2625_v59 = vadd.f32 %v10178_v60, %v2481_v27  ;;  %3898 = vmatprep.subr.bf16.mxu1 %v8660_v48  ;;  %v10184_v49 = vld [vmem:[#allocation35_spill] sm:$0xff] }
 0x2e4   :  { %v2847_v7 = vpop.f32.mrf.mxu1  ;;  %v8617_v32 = vmax.f32 %v10172_v35, %v2890_v4  ;;  %v2891_v57 = vadd.f32 %v2843_v29, %v2752_v37  ;;  %v2753_v23 = vadd.f32 %v2708_v5, %v2622_v33  ;;  %v10181_v5 = vld [vmem:[#allocation14_spill] sm:$0xff] }
 0x2e5   :  { %v2710_v13 = vpop.f32.mrf.mxu0 }
 0x2e6   :  { %v2849_v31 = vpop.f32.mrf.mxu1  ;;  %v2892_v43 = vadd.f32 %v2847_v7, %v2753_v23  ;;  %v2754_v26 = vadd.f32 %v2710_v13, %v2623_v41  ;;  %3183 = vrot.lane.b32.xlu1 %v3114_v22, %s6384_s17  ;;  %3185 = vrot.lane.b32.xlu0 %v8617_v32, %s6384_s17  ;;  %v3116_v33 = vmax.f32 %v2284_v20, %v2891_v57  ;;  %v10180_v22 = vld [vmem:[#allocation28_spill] sm:$0xff]  ;;  %v10183_v13 = vld [vmem:[#allocation33_spill] sm:$0xff] }
 0x2e7   :  { %v2712_v11 = vpop.f32.mrf.mxu0  ;;  %v2149_v7 = vadd.f32 %v10181_v5, %v2018_v16  ;;  %v8655_v23 = vld [vmem:[%s9841_s3 + $0x128] ss:$8 sps:$4 sm:$0xff]   ;;  %v10190_v5 = vld [vmem:[#allocation58_spill] sm:$0xff] }
 0x2e8   :  { %v2851_v1 = vpop.f32.mrf.mxu1  ;;  %v8639_v45 = vmax.f32 %v10179_v63, %v2892_v43  ;;  %v2893_v36 = vadd.f32 %v2849_v31, %v2754_v26  ;;  %v2755_v12 = vadd.f32 %v2712_v11, %v2624_v55  ;;  %3899 = vmatpush1.bf16.msra.mxu1 %v8655_v23 }
 0x2e9   :  { %v2714_v29 = vpop.f32.mrf.mxu0  ;;  %v2288_v31 = vadd.f32 %v10183_v13, %v2149_v7  ;;  %v2491_v7 = vadd.f32 %v8430_v54, %v10190_v5 }
 0x2ea   :  { %v2853_v62 = vpop.f32.mrf.mxu1  ;;  %v3118_v4 = vmax.f32 %v10180_v22, %v2893_v36  ;;  %v2894_v37 = vadd.f32 %v2851_v1, %v2755_v12  ;;  %v2756_v51 = vadd.f32 %v2714_v29, %v2625_v59  ;;  %3187 = vrot.lane.b32.xlu1 %v3116_v33, %s6384_s17  ;;  %3189 = vrot.lane.b32.xlu0 %v8639_v45, %s6384_s17  ;;  %v8681_v1 = vld [vmem:[%s9841_s3 + $0x118] ss:$8 sps:$4 sm:$0xff]  }
 0x2eb   :  { %v2718_v42 = vpop.f32.mrf.mxu0  ;;  %v10185_v33 = vld [vmem:[#allocation38_spill] sm:$0xff] }
 0x2ec   :  { %v2857_v27 = vpop.f32.mrf.mxu1  ;;  %v8649_v41 = vmax.f32 %v10182_v40, %v2894_v37  ;;  %v2895_v35 = vadd.f32 %v2853_v62, %v2756_v51  ;;  %v2757_v57 = vadd.f32 %v2718_v42, %v8424_v3  ;;  %v10187_v62 = vld [vmem:[#allocation40_spill] sm:$0xff] }
 0x2ed   :  { %v2720_v44 = vpop.f32.mrf.mxu0  ;;  %v8696_v37 = vld [vmem:[%s9841_s3 + $0x10c] ss:$8 sps:$4 sm:$0xff]  }
 0x2ee   :  { %v2859_v20 = vpop.f32.mrf.mxu1  ;;  %v2896_v30 = vadd.f32 %v2857_v27, %v2757_v57  ;;  %v2758_v55 = vadd.f32 %v2720_v44, %v8427_v52  ;;  %3191 = vrot.lane.b32.xlu1 %v3118_v4, %s6384_s17  ;;  %3193 = vrot.lane.b32.xlu0 %v8649_v41, %s6384_s17  ;;  %v3120_v26 = vmax.f32 %v2288_v31, %v2895_v35  ;;  %v8676_v52 = vld [vmem:[%s9841_s3 + $0x11c] ss:$8 sps:$4 sm:$0xff]   ;;  %v8701_v27 = vld [vmem:[%s9841_s3 + $0x108] ss:$8 sps:$4 sm:$0xff]  }
 0x2ef   :  { %v2722_v3 = vpop.f32.mrf.mxu0  ;;  %3900 = vmatprep.subr.bf16.mxu1 %v8676_v52  ;;  %10188 = vst [vmem:[#allocation52_spill] sm:$0xff] %v8696_v37  ;;  %10189 = vst [vmem:[#allocation24_spill] sm:$0xff] %v8701_v27  ;;  %v10191_v35 = vld [vmem:[#allocation7_spill] sm:$0xff]  ;;  %v10195_v31 = vld [vmem:[#allocation60_spill] sm:$0xff] }
 0x2f0   :  { %v2861_v43 = vpop.f32.mrf.mxu1  ;;  %v8669_v46 = vmax.f32 %v10184_v49, %v2896_v30  ;;  %v2897_v16 = vadd.f32 %v2859_v20, %v2758_v55  ;;  %v2759_v60 = vadd.f32 %v2722_v3, %v8434_v25  ;;  %v10186_v25 = vld [vmem:[#allocation43_spill] sm:$0xff]  ;;  %3901 = vmatpush1.bf16.msra.mxu1 %v8681_v1  ;;  %v10194_v20 = vld [vmem:[#allocation9_spill] sm:$0xff] }
 0x2f1   :  { %v2724_v59 = vpop.f32.mrf.mxu0  ;;  %v10192_v57 = vld [vmem:[#allocation39_spill] sm:$0xff]  ;;  %3902 = vmatprep.subr.bf16.mxu1 %v8696_v37  ;;  %v10197_v3 = vld [vmem:[#allocation65_spill] sm:$0xff] }
 0x2f2   :  { %v2863_v11 = vpop.f32.mrf.mxu1  ;;  %v3122_v63 = vmax.f32 %v10185_v33, %v2897_v16  ;;  %v2898_v36 = vadd.f32 %v2861_v43, %v2759_v60  ;;  %3195 = vrot.lane.b32.xlu1 %v3120_v26, %s6384_s17  ;;  %2997 = vrot.lane.b32.xlu0 %v10186_v25, %s6384_s17  ;;  %v10193_v44 = vmax.f32 %v10191_v35, %v10192_v57  ;;  %v10198_v43 = vld [vmem:[#allocation91_spill] sm:$0xff]  ;;  %v10199_v49 = vld [vmem:[#allocation61_spill] sm:$0xff] }
 0x2f3   :  { %v2728_v12 = vpop.f32.mrf.mxu0  ;;  %v2629_v26 = vadd.f32 %v10198_v43, %v2491_v7  ;;  %v10200_v33 = vld [vmem:[#allocation29_spill] sm:$0xff]  ;;  %v10208_v7 = vld [vmem:[#allocation31_spill] sm:$0xff] }
 0x2f4   :  { %v2867_v29 = vpop.f32.mrf.mxu1  ;;  %v8689_v22 = vmax.f32 %v10187_v62, %v2898_v36  ;;  %v2761_v4 = vadd.f32 %v2728_v12, %v8449_v39  ;;  %3903 = vmatpush1.bf16.msra.mxu1 %v8701_v27  ;;  %v10201_v36 = vld [vmem:[#allocation42_spill] sm:$0xff]  ;;  %v10205_v62 = vld [vmem:[#allocation23_spill] sm:$0xff]  ;;  %v10211_v35 = vld [vmem:[#allocation53_spill] sm:$0xff] }
 0x2f5   :  { %v2730_v51 = vpop.f32.mrf.mxu0  ;;  %5868 = vmatprep.subr.msk.bf16.mxu1 %vm3384_vm2, %v10197_v3  ;;  %v10202_v12 = vmax.f32 %v10200_v33, %v10201_v36  ;;  %v10220_v33 = vld [vmem:[#allocation2_spill] sm:$0xff]  ;;  %v10238_v27 = vld [vmem:[#allocation76_spill] sm:$0xff] }
 0x2f6   :  { %v2869_v42 = vpop.f32.mrf.mxu1  ;;  %v2900_v40 = vadd.f32 %v2867_v29, %v2761_v4  ;;  %v2762_v39 = vadd.f32 %v2730_v51, %v8456_v15  ;;  %2999 = vrot.lane.b32.xlu1 %v10193_v44, %s6384_s17  ;;  %3001 = vrot.lane.b32.xlu0 %v10194_v20, %s6384_s17  ;;  %v10203_v29 = vld [vmem:[#allocation17_spill] sm:$0xff]  ;;  %v2760_v51 = vadd.f32 %v2724_v59, %v2629_v26  ;;  %v10216_v26 = vld [vmem:[#allocation12_spill] sm:$0xff] }
 0x2f7   :  { %v2732_v13 = vpop.f32.mrf.mxu0 }
 0x2f8   :  { %v8714_v30 = vmax.f32 %v10195_v31, %v2900_v40  ;;  %v2901_v55 = vadd.f32 %v2869_v42, %v2762_v39  ;;  %v2763_v54 = vadd.f32 %v2732_v13, %v8466_v58  ;;  %v2871_v15 = vpop.f32.mrf.mxu1  ;;  %v10204_v58 = vld [vmem:[#allocation49_spill] sm:$0xff]  ;;  %v10206_v42 = vld [vmem:[#allocation62_spill] sm:$0xff]  ;;  %v2899_v44 = vadd.f32 %v2863_v11, %v2760_v51  ;;  %v10212_v13 = vld [vmem:[#allocation55_spill] sm:$0xff] }
 0x2f9   :  { %v2022_v4 = vadd.f32 %v10205_v62, %v10204_v58  ;;  %v10209_v40 = vld [vmem:[#allocation45_spill] sm:$0xff]  ;;  %v2734_v3 = vpop.f32.mrf.mxu0  ;;  %v10215_v11 = vld [vmem:[#allocation34_spill] sm:$0xff]  ;;  %v10222_v58 = vld [vmem:[#allocation44_spill] sm:$0xff] }
 0x2fa   :  { %10196 = vst [vmem:[#allocation74_spill] sm:$0xff] %v8714_v30  ;;  %v3126_v16 = vmax.f32 %v10199_v49, %v2901_v55  ;;  %v2902_v60 = vadd.f32 %v2871_v15, %v2763_v54  ;;  %3003 = vrot.lane.b32.xlu1 %v10202_v12, %s6384_s17  ;;  %3005 = vrot.lane.b32.xlu0 %v10203_v29, %s6384_s17  ;;  %v10213_v55 = vld [vmem:[#allocation64_spill] sm:$0xff] }
 0x2fb   :  { %v10210_v39 = vmax.f32 %v10208_v7, %v10209_v40  ;;  %v2153_v57 = vadd.f32 %v10211_v35, %v2022_v4  ;;  %v2501_v54 = vadd.f32 %v8459_v50, %v10213_v55  ;;  %v10214_v15 = vld [vmem:[#allocation8_spill] sm:$0xff]  ;;  %v10217_v49 = vmax.f32 %v10215_v11, %v10216_v26  ;;  %v10224_v4 = vld [vmem:[#allocation3_spill] sm:$0xff]  ;;  %v8770_v35 = vpop.permute.xlu0 %2993 }
 0x2fc   :  { %v8731_v5 = vmax.f32 %v10206_v42, %v2902_v60  ;;  %v10219_v60 = vld [vmem:[#allocation46_spill] sm:$0xff]  ;;  %v10221_v12 = vld [vmem:[#allocation36_spill] sm:$0xff]  ;;  %v10225_v7 = vld [vmem:[#allocation63_spill] sm:$0xff] }
 0x2fd   :  { %v2292_v31 = vadd.f32 %v10212_v13, %v2153_v57  ;;  %v2633_v43 = vadd.f32 %v8461_v56, %v2501_v54  ;;  %v2026_v36 = vadd.f32 %v10220_v33, %v10219_v60  ;;  %v10223_v62 = vmax.f32 %v10221_v12, %v10222_v58  ;;  %v2873_v56 = vpop.f32.mrf.mxu1  ;;  %v8772_v57 = vpop.permute.xlu1 %2995 }
 0x2fe   :  { %10207 = vst [vmem:[#allocation70_spill] sm:$0xff] %v8731_v5  ;;  %3007 = vrot.lane.b32.xlu1 %v10210_v39, %s6384_s17  ;;  %3197 = vrot.lane.b32.xlu0 %v8669_v46, %s6384_s17 }
 0x2ff   :  { %v3124_v59 = vmax.f32 %v2292_v31, %v2899_v44  ;;  %v2764_v50 = vadd.f32 %v2734_v3, %v2633_v43  ;;  %v2157_v51 = vadd.f32 %v10224_v4, %v2026_v36 }
 0x301   :  { %v2903_v42 = vadd.f32 %v2873_v56, %v2764_v50  ;;  %v2296_v40 = vadd.f32 %v10225_v7, %v2157_v51 }
 0x302   :  { %3199 = vrot.lane.b32.xlu1 %v3122_v63, %s6384_s17  ;;  %3201 = vrot.lane.b32.xlu0 %v8689_v22, %s6384_s17  ;;  %v10218_v63 = vld [vmem:[#allocation47_spill] sm:$0xff] }
 0x303   :  { %v3128_v39 = vmax.f32 %v2296_v40, %v2903_v42  ;;  %v8809_v40 = vld [vmem:[%s9841_s3 + $0xf0] ss:$8 sps:$4 sm:$0xff]  }
 0x306   :  { %3203 = vrot.lane.b32.xlu1 %v3124_v59, %s6384_s17  ;;  %3009 = vrot.lane.b32.xlu0 %v10214_v15, %s6384_s17 }
 0x30a   :  { %3011 = vrot.lane.b32.xlu1 %v10217_v49, %s6384_s17  ;;  %3013 = vrot.lane.b32.xlu0 %v10218_v63, %s6384_s17 }
 0x30e   :  { %3205 = vrot.lane.b32.xlu0 %v8714_v30, %s6384_s17  ;;  %3015 = vrot.lane.b32.xlu1 %v10223_v62, %s6384_s17  ;;  %v8993_v30 = vld [vmem:[%s9841_s3 + $0x164] ss:$8 sps:$4 sm:$0xff]  }
 0x312   :  { %3209 = vrot.lane.b32.xlu0 %v8731_v5, %s6384_s17  ;;  %3207 = vrot.lane.b32.xlu1 %v3126_v16, %s6384_s17  ;;  %v8780_v16 = vld [vmem:[%s9842_s2] ss:$0 sm:$0xff] }
 0x316   :  { %3211 = vrot.lane.b32.xlu1 %v3128_v39, %s6384_s17 }
 0x33c   :  { %v3158_v44 = vpop.permute.xlu0 %3157 }
 0x340   :  { %v3162_v13 = vpop.permute.xlu1 %3161  ;;  %v3160_v31 = vpop.permute.xlu0 %3159 }
 0x341   :  { %v3213_v59 = vsel %vm3017_vm3, %v3158_v44, %v3160_v31 }
 0x342   :  { %v3241_v55 = vmax.f32 %v8478_v9, %v3213_v59  ;;  %v5802_v9 = vcombine.low %v8534_v2, %v8534_v2 }
 0x344   :  { %v3164_v54 = vpop.permute.xlu1 %3163  ;;  %v3166_v3 = vpop.permute.xlu0 %3165  ;;  %v3255_v11 = vadd.f32 %v8780_v16, %v3241_v55  ;;  %v8792_v51 = vsel %vm3384_vm2, %v5802_v9, 0  ;;  %v8844_v9 = vld [vmem:[%s9841_s3 + $0xd0] ss:$8 sps:$4 sm:$0xff]  }
 0x345   :  { %v3214_v43 = vsel %vm3017_vm3, %v3162_v13, %v3164_v54 }
 0x346   :  { %v3242_v26 = vmax.f32 %v8502_v61, %v3214_v43  ;;  %v3269_v50 = vmax.f32 %v3255_v11, 0.0  ;;  %v8797_v61 = vld [vmem:[%s9841_s3 + $0xf4] ss:$8 sps:$4 sm:$0xff]  }
 0x348   :  { %v3256_v49 = vadd.f32 %v8780_v16, %v3242_v26  ;;  %v3168_v60 = vpop.permute.xlu1 %3167  ;;  %v3170_v33 = vpop.permute.xlu0 %3169 }
 0x349   :  { %v3215_v36 = vsel %vm3017_vm3, %v3166_v3, %v3168_v60  ;;  %v8824_v3 = vld [vmem:[%s9841_s3 + $0xe0] ss:$8 sps:$4 sm:$0xff]  }
 0x34a   :  { %v3270_v12 = vmax.f32 %v3256_v49, 0.0  ;;  %v3243_v58 = vmax.f32 %v8516_v53, %v3215_v36  ;;  %v10226_v53 = vmov 0   ;;  %v8832_v49 = vld [vmem:[%s9841_s3 + $0xd4] ss:$8 sps:$4 sm:$0xff]  }
 0x34c   :  { %v8789_v62 = vpack.c.bf16 %v3270_v12, %v3269_v50  ;;  %v3172_v56 = vpop.permute.xlu1 %3171  ;;  %v3174_v4 = vpop.permute.xlu0 %3173  ;;  %v3257_v42 = vadd.f32 %v8780_v16, %v3243_v58 }
 0x34d   :  { %v3216_v2 = vsel %vm3017_vm3, %v3170_v33, %v3172_v56 }
 0x34e   :  { %v3244_v7 = vmax.f32 %v8529_v14, %v3216_v2  ;;  %5758 = vmatmul.mubr.msk.bf16.vlgmr.msra.gmra.mxu0 %vm3368_vm4, %v8789_v62  ;;  %v8816_v14 = vld [vmem:[%s9841_s3 + $0xe4] ss:$8 sps:$4 sm:$0xff]   ;;  %v3271_v59 = vmax.f32 %v3257_v42, 0.0  ;;  %v8859_v42 = vld [vmem:[%s9841_s3 + $0xc0] ss:$8 sps:$4 sm:$0xff]  }
 0x34f   :  { %3714 = vmatpush1.bf16.msra.mxu0 %v8792_v51  ;;  %3433 = vmatprep.mubr.bf16.mxu0 %v10226_v53 }
 0x350   :  { %v3258_v39 = vadd.f32 %v8780_v16, %v3244_v7  ;;  %v3176_v44 = vpop.permute.xlu1 %3175  ;;  %v3178_v13 = vpop.permute.xlu0 %3177  ;;  %3715 = vmatprep.subr.bf16.mxu0 %v8797_v61 }
 0x351   :  { %v3217_v31 = vsel %vm3017_vm3, %v3174_v4, %v3176_v44 }
 0x352   :  { %v3272_v55 = vmax.f32 %v3258_v39, 0.0  ;;  %v3245_v54 = vmax.f32 %v8559_v6, %v3217_v31  ;;  %v5849_v31 = vld [vmem:[%s9841_s3 + $0x1b0] sm:$0x33] }
 0x353   :  { %3716 = vmatpush1.bf16.msra.mxu0 %v8809_v40 }
 0x354   :  { %v8826_v43 = vpack.c.bf16 %v3272_v55, %v3271_v59  ;;  %v3180_v11 = vpop.permute.xlu1 %3179  ;;  %v3182_v26 = vpop.permute.xlu0 %3181  ;;  %3717 = vmatprep.subr.bf16.mxu0 %v8816_v14  ;;  %v3259_v60 = vadd.f32 %v8780_v16, %v3245_v54  ;;  %v8882_v54 = vld [vmem:[%s9841_s3 + $0xb0] ss:$8 sps:$4 sm:$0xff]  }
 0x355   :  { %v3218_v6 = vsel %vm3017_vm3, %v3178_v13, %v3180_v11  ;;  %v8867_v13 = vld [vmem:[%s9841_s3 + $0xb4] ss:$8 sps:$4 sm:$0xff]  }
 0x356   :  { %v3246_v33 = vmax.f32 %v8578_v10, %v3218_v6  ;;  %5759 = vmatmul.mubr.msk.bf16.gmra.mxu0 %vm3368_vm4, %v8826_v43  ;;  %v8851_v10 = vld [vmem:[%s9841_s3 + $0xc4] ss:$8 sps:$4 sm:$0xff]   ;;  %v3273_v56 = vmax.f32 %v3259_v60, 0.0  ;;  %v8886_v6 = vcombine.high %v5849_v31, %v5849_v31 }
 0x357   :  { %3443 = vmatprep.mubr.bf16.mxu0 %v10226_v53  ;;  %3718 = vmatpush1.bf16.msra.mxu0 %v8824_v3 }
 0x358   :  { %v3260_v36 = vadd.f32 %v8780_v16, %v3246_v33  ;;  %v3184_v50 = vpop.permute.xlu1 %3183  ;;  %v3186_v12 = vpop.permute.xlu0 %3185  ;;  %3719 = vmatprep.subr.bf16.mxu0 %v8832_v49 }
 0x359   :  { %v3219_v58 = vsel %vm3017_vm3, %v3182_v26, %v3184_v50 }
 0x35a   :  { %v3274_v4 = vmax.f32 %v3260_v36, 0.0  ;;  %v3247_v2 = vmax.f32 %v8602_v24, %v3219_v58 }
 0x35b   :  { %3720 = vmatpush1.bf16.msra.mxu0 %v8844_v9 }
 0x35c   :  { %v8861_v7 = vpack.c.bf16 %v3274_v4, %v3273_v56  ;;  %v3188_v39 = vpop.permute.xlu1 %3187  ;;  %v3190_v44 = vpop.permute.xlu0 %3189  ;;  %3721 = vmatprep.subr.bf16.mxu0 %v8851_v10  ;;  %v3261_v59 = vadd.f32 %v8780_v16, %v3247_v2  ;;  %v10227_v2 = vld [vmem:[#allocation15_spill] sm:$0xff] }
 0x35d   :  { %v3220_v24 = vsel %vm3017_vm3, %v3186_v12, %v3188_v39  ;;  %v3026_v12 = vsel %vm3017_vm3, %v8770_v35, %v8772_v57 }
 0x35e   :  { %v3248_v55 = vmax.f32 %v8617_v32, %v3220_v24  ;;  %5760 = vmatmul.mubr.msk.bf16.gmra.mxu0 %vm3368_vm4, %v8861_v7  ;;  %v3275_v60 = vmax.f32 %v3261_v59, 0.0  ;;  %v3054_v39 = vmax.f32 %v10227_v2, %v3026_v12  ;;  %v5860_v12 = vcombine.low %v5849_v31, %v5849_v31  ;;  %v8935_v31 = vld [vmem:[%s9841_s3 + $0x1a0] ss:$8 sps:$4 sm:$0xff]  }
 0x35f   :  { %3453 = vmatprep.mubr.bf16.mxu0 %v10226_v53  ;;  %3722 = vmatpush1.bf16.msra.mxu0 %v8859_v42 }
 0x360   :  { %v3262_v11 = vadd.f32 %v8780_v16, %v3248_v55  ;;  %v3192_v26 = vpop.permute.xlu1 %3191  ;;  %3723 = vmatprep.subr.bf16.mxu0 %v8867_v13  ;;  %v3194_v50 = vpop.permute.xlu0 %3193  ;;  %v3074_v55 = vadd.f32 %v8780_v16, %v3054_v39  ;;  %v10228_v39 = vld [vmem:[#allocation21_spill] sm:$0xff] }
 0x361   :  { %v3221_v32 = vsel %vm3017_vm3, %v3190_v44, %v3192_v26 }
 0x362   :  { %v3276_v33 = vmax.f32 %v3262_v11, 0.0  ;;  %v3249_v36 = vmax.f32 %v8639_v45, %v3221_v32 }
 0x363   :  { %3724 = vmatpush1.bf16.msra.mxu0 %v8882_v54 }
 0x364   :  { %v8894_v58 = vpack.c.bf16 %v3276_v33, %v3275_v60  ;;  %v3196_v56 = vpop.permute.xlu1 %3195  ;;  %5862 = vmatprep.subr.msk.bf16.mxu0 %vm3384_vm2, %v8886_v6  ;;  %v3263_v44 = vadd.f32 %v8780_v16, %v3249_v36  ;;  %v2998_v57 = vpop.permute.xlu0 %2997  ;;  %v3088_v33 = vmax.f32 %v3074_v55, 0.0  ;;  %v8958_v55 = vld [vmem:[%s9841_s3 + $0x184] ss:$8 sps:$4 sm:$0xff]  }
 0x365   :  { %v3222_v4 = vsel %vm3017_vm3, %v3194_v50, %v3196_v56  ;;  %v8921_v56 = vsel %vm3384_vm2, %v5860_v12, 0 }
 0x366   :  { %v3250_v45 = vmax.f32 %v8649_v41, %v3222_v4  ;;  %5761 = vmatmul.mubr.msk.bf16.gmra.mxu0 %vm3368_vm4, %v8894_v58  ;;  %v3277_v11 = vmax.f32 %v3263_v44, 0.0  ;;  %v8926_v4 = vld [vmem:[%s9841_s3 + $0x1a4] ss:$8 sps:$4 sm:$0xff]   ;;  %v8941_v44 = vld [vmem:[%s9841_s3 + $0x194] ss:$8 sps:$4 sm:$0xff]  }
 0x367   :  { %3463 = vmatprep.mubr.bf16.mxu0 %v10226_v53 }
 0x368   :  { %v3264_v35 = vadd.f32 %v8780_v16, %v3250_v45  ;;  %v3000_v24 = vpop.permute.xlu1 %2999  ;;  %v3002_v2 = vpop.permute.xlu0 %3001 }
 0x369   :  { %v3027_v59 = vsel %vm3017_vm3, %v2998_v57, %v3000_v24  ;;  %v10230_v24 = vld [vmem:[#allocation66_spill] sm:$0xff] }
 0x36a   :  { %v3278_v26 = vmax.f32 %v3264_v35, 0.0  ;;  %v3055_v32 = vmax.f32 %v10186_v25, %v3027_v59  ;;  %v10229_v35 = vld [vmem:[#allocation67_spill] sm:$0xff]  ;;  %v8952_v59 = vld [vmem:[%s9841_s3 + $0x190] ss:$8 sps:$4 sm:$0xff]  }
 0x36c   :  { %v8909_v60 = vpack.c.bf16 %v3278_v26, %v3277_v11  ;;  %v3075_v41 = vadd.f32 %v8780_v16, %v3055_v32  ;;  %v3004_v25 = vpop.permute.xlu1 %3003  ;;  %v3006_v57 = vpop.permute.xlu0 %3005  ;;  %v10231_v11 = vld [vmem:[#allocation50_spill] sm:$0xff]  ;;  %v10232_v26 = vld [vmem:[#allocation68_spill] sm:$0xff] }
 0x36e   :  { %v3089_v36 = vmax.f32 %v3075_v41, 0.0  ;;  %5762 = vmatmul.mubr.msk.bf16.gmra.mxu0 %vm3368_vm4, %v8909_v60  ;;  %v10233_v41 = vld [vmem:[#allocation69_spill] sm:$0xff] }
 0x36f   :  { %3741 = vmatprep.mubr.bf16.mxu0 %v10226_v53 }
 0x370   :  { %v8915_v50 = vpack.c.bf16 %v3089_v36, %v3088_v33  ;;  %v3008_v45 = vpop.permute.xlu1 %3007  ;;  %v8969_v33 = vld [vmem:[%s9841_s3 + $0x180] ss:$8 sps:$4 sm:$0xff]   ;;  %v8975_v36 = vld [vmem:[%s9841_s3 + $0x174] ss:$8 sps:$4 sm:$0xff]   ;;  %v3198_v12 = vpop.permute.xlu0 %3197 }
 0x371   :  { %10234 = vst [vmem:[#allocation73_spill] sm:$0xff] %v8975_v36 }
 0x372   :  { %5780 = vmatmul.mubr.msk.bf16.gmra.mxu1 %vm3368_vm4, %v8915_v50 }
 0x373   :  { %3920 = vmatprep.mubr.bf16.mxu1 %v10226_v53 }
 0x374   :  { %v3200_v32 = vpop.permute.xlu1 %3199 }
 0x376   :  { %5805 = vmatmul.mubr.msk.bf16.vlgmr.msra.gmra.mxu0 %vm3368_vm4, %v10228_v39 }
 0x377   :  { %4072 = vmatpush1.bf16.msra.mxu0 %v8921_v56  ;;  %3751 = vmatprep.mubr.bf16.mxu0 %v10226_v53 }
 0x378   :  { %4073 = vmatprep.subr.bf16.mxu0 %v8926_v4  ;;  %v3204_v5 = vpop.permute.xlu1 %3203 }
 0x37a   :  { %5834 = vmatmul.mubr.msk.bf16.vlgmr.msra.gmra.mxu1 %vm3368_vm4, %v8826_v43 }
 0x37b   :  { %4175 = vmatpush1.bf16.msra.mxu1 %v10229_v35  ;;  %4074 = vmatpush1.bf16.msra.mxu0 %v8935_v31  ;;  %v10235_v35 = vld [vmem:[#allocation71_spill] sm:$0xff] }
 0x37c   :  { %3930 = vmatprep.mubr.bf16.mxu1 %v10226_v53  ;;  %4176 = vmatprep.subr.bf16.mxu1 %v10230_v24  ;;  %v10236_v24 = vld [vmem:[#allocation72_spill] sm:$0xff] }
 0x37d   :  { %4075 = vmatprep.subr.bf16.mxu0 %v8941_v44 }
 0x37e   :  { %5806 = vmatmul.mubr.msk.bf16.gmra.mxu0 %vm3368_vm4, %v10231_v11 }
 0x37f   :  { %4177 = vmatpush1.bf16.msra.mxu1 %v10232_v26  ;;  %3761 = vmatprep.mubr.bf16.mxu0 %v10226_v53  ;;  %v8986_v26 = vld [vmem:[%s9841_s3 + $0x170] ss:$8 sps:$4 sm:$0xff]  }
 0x380   :  { %4076 = vmatpush1.bf16.msra.mxu0 %v8952_v59  ;;  %4178 = vmatprep.subr.bf16.mxu1 %v10233_v41  ;;  %v3029_v41 = vsel %vm3017_vm3, %v3006_v57, %v3008_v45  ;;  %v3202_v45 = vpop.permute.xlu0 %3201  ;;  %v9006_v57 = vld [vmem:[%s9841_s3 + $0x160] ss:$8 sps:$4 sm:$0xff]  }
 0x381   :  { %4077 = vmatprep.subr.bf16.mxu0 %v8958_v55  ;;  %v3057_v37 = vmax.f32 %v10203_v29, %v3029_v41  ;;  %v10239_v29 = vld [vmem:[#allocation92_spill] sm:$0xff] }
 0x382   :  { %5835 = vmatmul.mubr.msk.bf16.gmra.mxu1 %vm3368_vm4, %v8861_v7 }
 0x383   :  { %3940 = vmatprep.mubr.bf16.mxu1 %v10226_v53  ;;  %4179 = vmatpush1.bf16.msra.mxu1 %v10235_v35  ;;  %v10237_v35 = vld [vmem:[#allocation16_spill] sm:$0xff] }
 0x384   :  { %4078 = vmatpush1.bf16.msra.mxu0 %v8969_v33  ;;  %4180 = vmatprep.subr.bf16.mxu1 %v10236_v24  ;;  %v3028_v24 = vsel %vm3017_vm3, %v3002_v2, %v3004_v25 }
 0x385   :  { %4079 = vmatprep.subr.bf16.mxu0 %v8975_v36  ;;  %v3224_v36 = vsel %vm3017_vm3, %v3202_v45, %v3204_v5  ;;  %v3056_v25 = vmax.f32 %v10194_v20, %v3028_v24  ;;  %v10240_v5 = vld [vmem:[#allocation41_spill] sm:$0xff]  ;;  %v6373_v24 = vld [vmem:[%s9841_s3 + $0x44] ss:$8 sps:$4 sm:$0xff]   ;;  %v6374_v45 = vld [vmem:[%s9841_s3 + $0x40] ss:$8 sps:$4 sm:$0xff]  }
 0x386   :  { %5807 = vmatmul.mubr.msk.bf16.gmra.mxu0 %vm3368_vm4, %v10237_v35  ;;  %v3252_v2 = vmax.f32 %v8689_v22, %v3224_v36 }
 0x387   :  { %3771 = vmatprep.mubr.bf16.mxu0 %v10226_v53  ;;  %4181 = vmatpush1.bf16.msra.mxu1 %v10238_v27  ;;  %v3223_v27 = vsel %vm3017_vm3, %v3198_v12, %v3200_v32  ;;  %v3076_v20 = vadd.f32 %v8780_v16, %v3056_v25  ;;  %v3012_v25 = vpop.permute.xlu1 %3011 }
 0x388   :  { %4080 = vmatpush1.bf16.msra.mxu0 %v8986_v26  ;;  %4182 = vmatprep.subr.bf16.mxu1 %v8445_v19  ;;  %v3077_v19 = vadd.f32 %v8780_v16, %v3057_v37  ;;  %v3251_v41 = vmax.f32 %v8669_v46, %v3223_v27  ;;  %v3266_v22 = vadd.f32 %v8780_v16, %v3252_v2  ;;  %v6375_v27 = vld [vmem:[%s9841_s3 + $0x34] ss:$8 sps:$4 sm:$0xff]  }
 0x389   :  { %4081 = vmatprep.subr.bf16.mxu0 %v8993_v30  ;;  %v6379_v2 = vld [vmem:[%s9841_s3 + $0x14] ss:$8 sps:$4 sm:$0xff]  }
 0x38a   :  { %5836 = vmatmul.mubr.msk.bf16.gmra.mxu1 %vm3368_vm4, %v8894_v58  ;;  %v3091_v37 = vmax.f32 %v3077_v19, 0.0  ;;  %v3265_v32 = vadd.f32 %v8780_v16, %v3251_v41  ;;  %v3280_v36 = vmax.f32 %v3266_v22, 0.0  ;;  %v6378_v19 = vld [vmem:[%s9841_s3 + $0x20] ss:$8 sps:$4 sm:$0xff]  }
 0x38b   :  { %3950 = vmatprep.mubr.bf16.mxu1 %v10226_v53  ;;  %4183 = vmatpush1.bf16.msra.mxu1 %v10239_v29  ;;  %v3010_v29 = vpop.permute.xlu0 %3009 }
 0x38c   :  { %4082 = vmatpush1.bf16.msra.mxu0 %v9006_v57  ;;  %4184 = vmatprep.subr.bf16.mxu1 %v8483_v38  ;;  %v3090_v38 = vmax.f32 %v3076_v20, 0.0  ;;  %v3279_v12 = vmax.f32 %v3265_v32, 0.0  ;;  %v6381_v20 = vld [vmem:[%s9841_s3 + $0x4] ss:$8 sps:$4 sm:$0xff]  }
 0x38d   :  { %5874 = vmatprep.subr.msk.bf16.mxu0 %vm3384_vm2, %v10240_v5 }
 0x38e   :  { %5808 = vmatmul.mubr.msk.bf16.gmra.mxu0 %vm3368_vm4, %v8915_v50  ;;  %v9035_v46 = vpack.c.bf16 %v3091_v37, %v3090_v38 }
 0x38f   :  { %3781 = vmatprep.mubr.bf16.mxu0 %v10226_v53  ;;  %4185 = vmatpush1.bf16.msra.mxu1 %v8491_v8  ;;  %v9040_v8 = vpack.c.bf16 %v3280_v36, %v3279_v12 }
 0x390   :  { %5880 = vmatprep.subr.msk.bf16.mxu1 %vm3384_vm2, %v8542_v21  ;;  %v10241_v21 = vld [vmem:[#allocation11_spill] sm:$0xff] }
 0x392   :  { %5837 = vmatmul.mubr.msk.bf16.gmra.mxu1 %vm3368_vm4, %v8909_v60 }
 0x393   :  { %3960 = vmatprep.mubr.bf16.mxu1 %v10226_v53 }
 0x396   :  { %5809 = vmatmul.mubr.msk.bf16.gmra.mxu0 %vm3368_vm4, %v9035_v46 }
 0x397   :  { %4099 = vmatprep.mubr.bf16.mxu0 %v10226_v53 }
 0x39a   :  { %5838 = vmatmul.mubr.msk.bf16.gmra.mxu1 %vm3368_vm4, %v9040_v8 }
 0x39b   :  { %4202 = vmatprep.mubr.bf16.mxu1 %v10226_v53 }
 0x39e   :  { %5863 = vmatmul.mubr.msk.bf16.vlgmr.msra.gmra.mxu0 %vm3368_vm4, %v10231_v11 }
 0x39f   :  { %4258 = vmatpush1.bf16.msra.mxu0 %v10241_v21  ;;  %4109 = vmatprep.mubr.bf16.mxu0 %v10226_v53 }
 0x3a0   :  { %4259 = vmatprep.subr.bf16.mxu0 %v6373_v24 }
 0x3a2   :  { %5869 = vmatmul.mubr.msk.bf16.vlgmr.msra.gmra.mxu1 %vm3368_vm4, %v10228_v39  ;;  %v3016_v39 = vpop.permute.xlu1 %3015 }
 0x3a3   :  { %4341 = vmatpush1.bf16.msra.mxu1 %v8792_v51  ;;  %4260 = vmatpush1.bf16.msra.mxu0 %v6374_v45  ;;  %v6376_v51 = vld [vmem:[%s9841_s3 + $0x30] ss:$8 sps:$4 sm:$0xff]  }
 0x3a4   :  { %4212 = vmatprep.mubr.bf16.mxu1 %v10226_v53  ;;  %4342 = vmatprep.subr.bf16.mxu1 %v8797_v61  ;;  %v6377_v61 = vld [vmem:[%s9841_s3 + $0x24] ss:$8 sps:$4 sm:$0xff]  }
 0x3a5   :  { %4261 = vmatprep.subr.bf16.mxu0 %v6375_v27 }
 0x3a6   :  { %5864 = vmatmul.mubr.msk.bf16.gmra.mxu0 %vm3368_vm4, %v10237_v35 }
 0x3a7   :  { %4343 = vmatpush1.bf16.msra.mxu1 %v8809_v40  ;;  %4119 = vmatprep.mubr.bf16.mxu0 %v10226_v53  ;;  %v3014_v40 = vpop.permute.xlu0 %3013 }
 0x3a8   :  { %4262 = vmatpush1.bf16.msra.mxu0 %v6376_v51  ;;  %4344 = vmatprep.subr.bf16.mxu1 %v8816_v14  ;;  %v3031_v14 = vsel %vm3017_vm3, %v3014_v40, %v3016_v39 }
 0x3a9   :  { %4263 = vmatprep.subr.bf16.mxu0 %v6377_v61  ;;  %v3059_v5 = vmax.f32 %v10218_v63, %v3031_v14 }
 0x3aa   :  { %5870 = vmatmul.mubr.msk.bf16.gmra.mxu1 %vm3368_vm4, %v10231_v11 }
 0x3ab   :  { %4222 = vmatprep.mubr.bf16.mxu1 %v10226_v53  ;;  %4345 = vmatpush1.bf16.msra.mxu1 %v8824_v3  ;;  %v3030_v3 = vsel %vm3017_vm3, %v3010_v29, %v3012_v25  ;;  %v3079_v63 = vadd.f32 %v8780_v16, %v3059_v5 }
 0x3ac   :  { %4264 = vmatpush1.bf16.msra.mxu0 %v6378_v19  ;;  %4346 = vmatprep.subr.bf16.mxu1 %v8832_v49  ;;  %v6380_v49 = vld [vmem:[%s9841_s3 + $0x10] ss:$8 sps:$4 sm:$0xff]   ;;  %v3058_v41 = vmax.f32 %v10214_v15, %v3030_v3 }
 0x3ad   :  { %4265 = vmatprep.subr.bf16.mxu0 %v6379_v2 }
 0x3ae   :  { %5865 = vmatmul.mubr.msk.bf16.gmra.mxu0 %vm3368_vm4, %v8915_v50  ;;  %v3078_v15 = vadd.f32 %v8780_v16, %v3058_v41 }
 0x3af   :  { %4129 = vmatprep.mubr.bf16.mxu0 %v10226_v53  ;;  %4347 = vmatpush1.bf16.msra.mxu1 %v8844_v9  ;;  %v6382_v9 = vld [vmem:[%s9841_s3] ss:$8 sps:$4 sm:$0xff]  }
 0x3b0   :  { %4266 = vmatpush1.bf16.msra.mxu0 %v6380_v49  ;;  %4348 = vmatprep.subr.bf16.mxu1 %v8851_v10  ;;  %v3093_v10 = vmax.f32 %v3079_v63, 0.0 }
 0x3b1   :  { %4267 = vmatprep.subr.bf16.mxu0 %v6381_v20 }
 0x3b2   :  { %5871 = vmatmul.mubr.msk.bf16.gmra.mxu1 %vm3368_vm4, %v10237_v35 }
 0x3b3   :  { %4232 = vmatprep.mubr.bf16.mxu1 %v10226_v53  ;;  %4349 = vmatpush1.bf16.msra.mxu1 %v8859_v42  ;;  %v3092_v42 = vmax.f32 %v3078_v15, 0.0 }
 0x3b4   :  { %4268 = vmatpush1.bf16.msra.mxu0 %v6382_v9  ;;  %4350 = vmatprep.subr.bf16.mxu1 %v8867_v13 }
 0x3b5   :  { %5886 = vmatprep.subr.msk.bf16.mxu0 %vm3384_vm2, %v8556_v28  ;;  %v9121_v28 = vpack.c.bf16 %v3093_v10, %v3092_v42 }
 0x3b6   :  { %5866 = vmatmul.mubr.msk.bf16.gmra.mxu0 %vm3368_vm4, %v9035_v46 }
 0x3b7   :  { %4139 = vmatprep.mubr.bf16.mxu0 %v10226_v53  ;;  %4351 = vmatpush1.bf16.msra.mxu1 %v8882_v54 }
 0x3b8   :  { %5892 = vmatprep.subr.msk.bf16.mxu1 %vm3384_vm2, %v8886_v6  ;;  %v10245_v6 = vld [vmem:[#allocation70_spill] sm:$0xff] }
 0x3ba   :  { %5872 = vmatmul.mubr.msk.bf16.gmra.mxu1 %vm3368_vm4, %v8915_v50 }
 0x3bb   :  { %4242 = vmatprep.mubr.bf16.mxu1 %v10226_v53 }
 0x3be   :  { %5867 = vmatmul.mubr.msk.bf16.gmra.mxu0 %vm3368_vm4, %v9121_v28 }
 0x3bf   :  { %4285 = vmatprep.mubr.bf16.mxu0 %v10226_v53 }
 0x3c2   :  { %5873 = vmatmul.mubr.msk.bf16.gmra.mxu1 %vm3368_vm4, %v9035_v46 }
 0x3c3   :  { %4368 = vmatprep.mubr.bf16.mxu1 %v10226_v53 }
 0x3c6   :  { %5875 = vmatmul.mubr.msk.bf16.vlgmr.msra.gmra.mxu0 %vm3368_vm4, %v8789_v62 }
 0x3c7   :  { %4444 = vmatpush1.bf16.msra.mxu0 %v8567_v18  ;;  %4295 = vmatprep.mubr.bf16.mxu0 %v10226_v53  ;;  %v10242_v18 = vld [vmem:[#allocation73_spill] sm:$0xff] }
 0x3c8   :  { %4445 = vmatprep.subr.bf16.mxu0 %v8596_v17  ;;  %v10244_v17 = vld [vmem:[#allocation24_spill] sm:$0xff] }
 0x3ca   :  { %5881 = vmatmul.mubr.msk.bf16.vlgmr.msra.gmra.mxu1 %vm3368_vm4, %v8826_v43 }
 0x3cb   :  { %4550 = vmatpush1.bf16.msra.mxu1 %v8921_v56  ;;  %4446 = vmatpush1.bf16.msra.mxu0 %v8591_v34  ;;  %v10243_v34 = vld [vmem:[#allocation52_spill] sm:$0xff]  ;;  %v10246_v56 = vld [vmem:[#allocation74_spill] sm:$0xff] }
 0x3cc   :  { %4378 = vmatprep.mubr.bf16.mxu1 %v10226_v53  ;;  %4551 = vmatprep.subr.bf16.mxu1 %v8926_v4 }
 0x3cd   :  { %4447 = vmatprep.subr.bf16.mxu0 %v8633_v0 }
 0x3ce   :  { %5876 = vmatmul.mubr.msk.bf16.gmra.mxu0 %vm3368_vm4, %v8826_v43 }
 0x3cf   :  { %4552 = vmatpush1.bf16.msra.mxu1 %v8935_v31  ;;  %4305 = vmatprep.mubr.bf16.mxu0 %v10226_v53 }
 0x3d0   :  { %4448 = vmatpush1.bf16.msra.mxu0 %v8628_v47  ;;  %4553 = vmatprep.subr.bf16.mxu1 %v8941_v44  ;;  %v9184_v47 = vpop.f32.mrf.mxu1 }
 0x3d1   :  { %4449 = vmatprep.subr.bf16.mxu0 %v8660_v48  ;;  %v3208_v48 = vpop.permute.xlu1 %3207 }
 0x3d2   :  { %5882 = vmatmul.mubr.msk.bf16.gmra.mxu1 %vm3368_vm4, %v8861_v7  ;;  %v9189_v0 = vpop.f32.mrf.mxu1 }
 0x3d3   :  { %4388 = vmatprep.mubr.bf16.mxu1 %v10226_v53  ;;  %4554 = vmatpush1.bf16.msra.mxu1 %v8952_v59 }
 0x3d4   :  { %4450 = vmatpush1.bf16.msra.mxu0 %v8655_v23  ;;  %4555 = vmatprep.subr.bf16.mxu1 %v8958_v55  ;;  %v9194_v23 = vpop.f32.mrf.mxu1 }
 0x3d5   :  { %4451 = vmatprep.subr.bf16.mxu0 %v8676_v52  ;;  %v3206_v52 = vpop.permute.xlu0 %3205 }
 0x3d6   :  { %5877 = vmatmul.mubr.msk.bf16.gmra.mxu0 %vm3368_vm4, %v8861_v7  ;;  %v3225_v13 = vsel %vm3017_vm3, %v3206_v52, %v3208_v48 }
 0x3d7   :  { %4315 = vmatprep.mubr.bf16.mxu0 %v10226_v53  ;;  %4556 = vmatpush1.bf16.msra.mxu1 %v8969_v33 }
 0x3d8   :  { %4452 = vmatpush1.bf16.msra.mxu0 %v8681_v1  ;;  %4557 = vmatprep.subr.bf16.mxu1 %v10242_v18  ;;  %v9199_v1 = vpop.f32.mrf.mxu1 }
 0x3d9   :  { %4453 = vmatprep.subr.bf16.mxu0 %v10243_v34  ;;  %v3210_v43 = vpop.permute.xlu0 %3209 }
 0x3da   :  { %5883 = vmatmul.mubr.msk.bf16.gmra.mxu1 %vm3368_vm4, %v8894_v58  ;;  %v9204_v62 = vpop.f32.mrf.mxu1 }
 0x3db   :  { %4398 = vmatprep.mubr.bf16.mxu1 %v10226_v53  ;;  %4558 = vmatpush1.bf16.msra.mxu1 %v8986_v26 }
 0x3dc   :  { %4454 = vmatpush1.bf16.msra.mxu0 %v10244_v17  ;;  %4559 = vmatprep.subr.bf16.mxu1 %v8993_v30  ;;  %v3212_v30 = vpop.permute.xlu1 %3211  ;;  %v9211_v54 = vpop.f32.mrf.mxu1 }
 0x3de   :  { %5878 = vmatmul.mubr.msk.bf16.gmra.mxu0 %vm3368_vm4, %v8894_v58  ;;  %v9218_v4 = vpop.f32.mrf.mxu1 }
 0x3df   :  { %4325 = vmatprep.mubr.bf16.mxu0 %v10226_v53  ;;  %4560 = vmatpush1.bf16.msra.mxu1 %v9006_v57 }
 0x3e0   :  { %v9225_v44 = vpop.f32.mrf.mxu1 }
 0x3e2   :  { %5884 = vmatmul.mubr.msk.bf16.gmra.mxu1 %vm3368_vm4, %v8909_v60  ;;  %v9229_v33 = vpop.f32.mrf.mxu1 }
 0x3e3   :  { %4408 = vmatprep.mubr.bf16.mxu1 %v10226_v53 }
 0x3e6   :  { %5879 = vmatmul.mubr.msk.bf16.gmra.mxu0 %vm3368_vm4, %v8909_v60 }
 0x3e7   :  { %4471 = vmatprep.mubr.bf16.mxu0 %v10226_v53 }
 0x3ea   :  { %5885 = vmatmul.mubr.msk.bf16.gmra.mxu1 %vm3368_vm4, %v9040_v8 }
 0x3eb   :  { %4577 = vmatprep.mubr.bf16.mxu1 %v10226_v53 }
 0x3ee   :  { %5887 = vmatmul.mubr.msk.bf16.vlgmr.msra.gmra.mxu0 %vm3368_vm4, %v10231_v11 }
 0x3ef   :  { %4481 = vmatprep.mubr.bf16.mxu0 %v10226_v53 }
 0x3f2   :  { %5893 = vmatmul.mubr.msk.bf16.vlgmr.msra.gmra.mxu1 %vm3368_vm4, %v8861_v7  ;;  %v3226_v7 = vsel %vm3017_vm3, %v3210_v43, %v3212_v30 }
 0x3f3   :  { %4587 = vmatprep.mubr.bf16.mxu1 %v10226_v53 }
 0x3f6   :  { %5888 = vmatmul.mubr.msk.bf16.gmra.mxu0 %vm3368_vm4, %v10237_v35 }
 0x3f7   :  { %4491 = vmatprep.mubr.bf16.mxu0 %v10226_v53 }
 0x3fa   :  { %5894 = vmatmul.mubr.msk.bf16.gmra.mxu1 %vm3368_vm4, %v8894_v58  ;;  %v3254_v58 = vmax.f32 %v10245_v6, %v3226_v7 }
 0x3fb   :  { %4597 = vmatprep.mubr.bf16.mxu1 %v10226_v53 }
 0x3fc   :  { %v3268_v31 = vadd.f32 %v8780_v16, %v3254_v58 }
 0x3fe   :  { %5889 = vmatmul.mubr.msk.bf16.gmra.mxu0 %vm3368_vm4, %v8915_v50  ;;  %v3253_v50 = vmax.f32 %v10246_v56, %v3225_v13  ;;  %v3282_v59 = vmax.f32 %v3268_v31, 0.0 }
 0x3ff   :  { %4501 = vmatprep.mubr.bf16.mxu0 %v10226_v53 }
 0x402   :  { %5895 = vmatmul.mubr.msk.bf16.gmra.mxu1 %vm3368_vm4, %v8909_v60  ;;  %v3267_v60 = vadd.f32 %v8780_v16, %v3253_v50  ;;  %v9232_v16 = vpop.f32.mrf.mxu1 }
 0x403   :  { %4607 = vmatprep.mubr.bf16.mxu1 %v10226_v53 }
 0x404   :  { %v3281_v55 = vmax.f32 %v3267_v60, 0.0 }
 0x406   :  { %5890 = vmatmul.mubr.msk.bf16.gmra.mxu0 %vm3368_vm4, %v9035_v46  ;;  %v3289_v26 = vpack.c.bf16 %v3282_v59, %v3281_v55 }
 0x407   :  { %4511 = vmatprep.mubr.bf16.mxu0 %v10226_v53 }
 0x40a   :  { %5896 = vmatmul.mubr.msk.bf16.gmra.mxu1 %vm3368_vm4, %v9040_v8 }
 0x40b   :  { %4617 = vmatprep.mubr.bf16.mxu1 %v10226_v53  ;;  %v9234_v53 = vpop.f32.mrf.mxu1 }
 0x40d   :  { %v9236_v46 = vpop.f32.mrf.mxu1 }
 0x40e   :  { %v3425_v11 = vpop.f32.mrf.mxu0  ;;  %5891 = vmatmul.mubr.msk.bf16.gmra.mxu0 %vm3368_vm4, %v9121_v28 }
 0x40f   :  { %v9238_v8 = vpop.f32.mrf.mxu1  ;;  %v3585_v63 = vadd.f32 %v9184_v47, %v3425_v11 }
 0x410   :  { %v3427_v35 = vpop.f32.mrf.mxu0 }
 0x411   :  { %v9242_v45 = vpop.f32.mrf.mxu1  ;;  %v3587_v42 = vadd.f32 %v9189_v0, %v3427_v35 }
 0x412   :  { %v3429_v57 = vpop.f32.mrf.mxu0  ;;  %5897 = vmatmul.mubr.msk.bf16.gmra.mxu1 %vm3368_vm4, %v3289_v26 }
 0x413   :  { %v9248_v29 = vpop.f32.mrf.mxu1  ;;  %v3589_v48 = vadd.f32 %v9194_v23, %v3429_v57 }
 0x414   :  { %v3431_v37 = vpop.f32.mrf.mxu0 }
 0x415   :  { %v3620_v39 = vpop.f32.mrf.mxu1  ;;  %v3591_v56 = vadd.f32 %v9199_v1, %v3431_v37 }
 0x416   :  { %v3435_v22 = vpop.f32.mrf.mxu0 }
 0x417   :  { %v3595_v0 = vadd.f32 %v9204_v62, %v3435_v22 }
 0x418   :  { %v3437_v38 = vpop.f32.mrf.mxu0 }
 0x419   :  { %v3597_v23 = vadd.f32 %v9211_v54, %v3437_v38 }
 0x41a   :  { %v3439_v32 = vpop.f32.mrf.mxu0 }
 0x41b   :  { %v3599_v57 = vadd.f32 %v9218_v4, %v3439_v32 }
 0x41c   :  { %v3441_v36 = vpop.f32.mrf.mxu0 }
 0x41d   :  { %v3601_v62 = vadd.f32 %v9225_v44, %v3441_v36 }
 0x41e   :  { %v3445_v12 = vpop.f32.mrf.mxu0 }
 0x41f   :  { %v3605_v38 = vadd.f32 %v9229_v33, %v3445_v12 }
 0x420   :  { %v3447_v21 = vpop.f32.mrf.mxu0 }
 0x421   :  { %v3607_v4 = vadd.f32 %v9232_v16, %v3447_v21 }
 0x422   :  { %v9240_v24 = vpop.f32.mrf.mxu0 }
 0x423   :  { %v3609_v44 = vadd.f32 %v9234_v53, %v9240_v24 }
 0x424   :  { %v9244_v25 = vpop.f32.mrf.mxu0 }
 0x425   :  { %v3611_v12 = vadd.f32 %v9236_v46, %v9244_v25 }
 0x426   :  { %v9246_v27 = vpop.f32.mrf.mxu0 }
 0x428   :  { %v9250_v51 = vpop.f32.mrf.mxu0 }
 0x42a   :  { %v9252_v61 = vpop.f32.mrf.mxu0 }
 0x42c   :  { %v3461_v40 = vpop.f32.mrf.mxu0 }
 0x42d   :  { %v9254_v19 = vadd.f32 %v3620_v39, %v3461_v40 }
 0x42e   :  { %v3465_v14 = vpop.f32.mrf.mxu0 }
 0x430   :  { %v3467_v2 = vpop.f32.mrf.mxu0 }
 0x432   :  { %v3469_v3 = vpop.f32.mrf.mxu0  ;;  %v3624_v5 = vpop.f32.mrf.mxu1 }
 0x433   :  { %v9256_v49 = vadd.f32 %v3624_v5, %v3465_v14 }
 0x434   :  { %v3471_v20 = vpop.f32.mrf.mxu0  ;;  %v3626_v41 = vpop.f32.mrf.mxu1 }
 0x435   :  { %v9259_v9 = vadd.f32 %v3626_v41, %v3467_v2 }
 0x436   :  { %v3628_v15 = vpop.f32.mrf.mxu1  ;;  %v3743_v10 = vpop.f32.mrf.mxu0 }
 0x437   :  { %v9262_v28 = vadd.f32 %v3628_v15, %v3469_v3  ;;  %v3792_v18 = vadd.f32 %v3743_v10, %v3585_v63 }
 0x438   :  { %v3630_v34 = vpop.f32.mrf.mxu1  ;;  %v3745_v17 = vpop.f32.mrf.mxu0 }
 0x439   :  { %v9265_v52 = vadd.f32 %v3630_v34, %v3471_v20  ;;  %v3793_v30 = vadd.f32 %v3745_v17, %v3587_v42 }
 0x43a   :  { %v3747_v43 = vpop.f32.mrf.mxu0  ;;  %v3922_v7 = vpop.f32.mrf.mxu1 }
 0x43b   :  { %v3794_v13 = vadd.f32 %v3747_v43, %v3589_v48  ;;  %v9267_v47 = vadd.f32 %v3922_v7, %v3792_v18  ;;  %v3615_v48 = vadd.f32 %v9238_v8, %v9246_v27  ;;  %v3617_v7 = vadd.f32 %v9242_v45, %v9250_v51 }
 0x43c   :  { %v3749_v6 = vpop.f32.mrf.mxu0  ;;  %v3924_v58 = vpop.f32.mrf.mxu1 }
 0x43d   :  { %v9271_v50 = vadd.f32 %v3924_v58, %v3793_v30  ;;  %v3795_v59 = vadd.f32 %v3749_v6, %v3591_v56  ;;  %v3619_v58 = vadd.f32 %v9248_v29, %v9252_v61 }
 0x43e   :  { %v3753_v31 = vpop.f32.mrf.mxu0  ;;  %v3926_v60 = vpop.f32.mrf.mxu1 }
 0x43f   :  { %v3796_v55 = vadd.f32 %v3753_v31, %v3595_v0  ;;  %v9274_v11 = vadd.f32 %v3926_v60, %v3794_v13 }
 0x440   :  { %v3755_v26 = vpop.f32.mrf.mxu0  ;;  %v3928_v35 = vpop.f32.mrf.mxu1 }
 0x441   :  { %v3797_v39 = vadd.f32 %v3755_v26, %v3597_v23  ;;  %v9277_v40 = vadd.f32 %v3928_v35, %v3795_v59 }
 0x442   :  { %v3757_v1 = vpop.f32.mrf.mxu0  ;;  %v3932_v37 = vpop.f32.mrf.mxu1 }
 0x443   :  { %v3798_v22 = vadd.f32 %v3757_v1, %v3599_v57  ;;  %v9280_v14 = vadd.f32 %v3932_v37, %v3796_v55 }
 0x444   :  { %v3759_v2 = vpop.f32.mrf.mxu0  ;;  %v3934_v54 = vpop.f32.mrf.mxu1 }
 0x445   :  { %v3799_v3 = vadd.f32 %v3759_v2, %v3601_v62  ;;  %v9283_v5 = vadd.f32 %v3934_v54, %v3797_v39 }
 0x446   :  { %v3763_v20 = vpop.f32.mrf.mxu0  ;;  %v3936_v41 = vpop.f32.mrf.mxu1 }
 0x447   :  { %v3800_v32 = vadd.f32 %v3763_v20, %v3605_v38  ;;  %v9286_v63 = vadd.f32 %v3936_v41, %v3798_v22 }
 0x448   :  { %v3765_v15 = vpop.f32.mrf.mxu0  ;;  %v3938_v10 = vpop.f32.mrf.mxu1 }
 0x449   :  { %v3801_v36 = vadd.f32 %v3765_v15, %v3607_v4  ;;  %v9290_v42 = vadd.f32 %v3938_v10, %v3799_v3 }
 0x44a   :  { %v3767_v18 = vpop.f32.mrf.mxu0  ;;  %v3942_v33 = vpop.f32.mrf.mxu1 }
 0x44b   :  { %v3802_v34 = vadd.f32 %v3767_v18, %v3609_v44  ;;  %v9294_v17 = vadd.f32 %v3942_v33, %v3800_v32 }
 0x44c   :  { %v3769_v16 = vpop.f32.mrf.mxu0  ;;  %v3944_v21 = vpop.f32.mrf.mxu1 }
 0x44d   :  { %v3803_v30 = vadd.f32 %v3769_v16, %v3611_v12  ;;  %v9298_v43 = vadd.f32 %v3944_v21, %v3801_v36 }
 0x44e   :  { %v3773_v53 = vpop.f32.mrf.mxu0  ;;  %v3946_v24 = vpop.f32.mrf.mxu1 }
 0x44f   :  { %v3804_v13 = vadd.f32 %v3773_v53, %v3615_v48  ;;  %v9302_v6 = vadd.f32 %v3946_v24, %v3802_v34  ;;  %v9914_v34 = vmov 0.0   ;;  %v6294_v24 = vld [vmem:[%s9843_s5 + $0x38] sm:$0xff]  }
 0x450   :  { %v3775_v46 = vpop.f32.mrf.mxu0  ;;  %v3948_v25 = vpop.f32.mrf.mxu1  ;;  %6034 = vmatprep.subr.bf16.mxu0 %v9914_v34  ;;  %6048 = vmatprep.subr.bf16.mxu1 %v9914_v34 }
 0x451   :  { %v3805_v56 = vadd.f32 %v3775_v46, %v3617_v7  ;;  %v9306_v0 = vadd.f32 %v3948_v25, %v3803_v30  ;;  %v6295_v30 = vld [vmem:[%s9843_s5 + $0x20] sm:$0xff]  }
 0x452   :  { %v3777_v8 = vpop.f32.mrf.mxu0  ;;  %v3952_v27 = vpop.f32.mrf.mxu1  ;;  %6049 = vmatpush3.bf16.msra.mxu1 %v6295_v30 }
 0x453   :  { %v3806_v31 = vadd.f32 %v3777_v8, %v3619_v58  ;;  %v9308_v60 = vadd.f32 %v3952_v27, %v3804_v13  ;;  %6050 = vmatprep.subr.bf16.mxu1 %v9914_v34 }
 0x454   :  { %v3779_v23 = vpop.f32.mrf.mxu0  ;;  %v3954_v59 = vpop.f32.mrf.mxu1 }
 0x455   :  { %v3807_v45 = vadd.f32 %v3779_v23, %v9254_v19  ;;  %v9311_v51 = vadd.f32 %v3954_v59, %v3805_v56 }
 0x456   :  { %v3783_v55 = vpop.f32.mrf.mxu0  ;;  %v3956_v26 = vpop.f32.mrf.mxu1 }
 0x457   :  { %v3808_v35 = vadd.f32 %v3783_v55, %v9256_v49  ;;  %v9314_v57 = vadd.f32 %v3956_v26, %v3806_v31 }
 0x458   :  { %v3785_v29 = vpop.f32.mrf.mxu0  ;;  %v3958_v61 = vpop.f32.mrf.mxu1 }
 0x459   :  { %v3809_v39 = vadd.f32 %v3785_v29, %v9259_v9  ;;  %v9317_v1 = vadd.f32 %v3958_v61, %v3807_v45 }
 0x45a   :  { %v3787_v37 = vpop.f32.mrf.mxu0  ;;  %v3962_v62 = vpop.f32.mrf.mxu1 }
 0x45b   :  { %v3810_v22 = vadd.f32 %v3787_v37, %v9262_v28  ;;  %v9320_v2 = vadd.f32 %v3962_v62, %v3808_v35 }
 0x45c   :  { %v3789_v19 = vpop.f32.mrf.mxu0  ;;  %v3964_v54 = vpop.f32.mrf.mxu1 }
 0x45d   :  { %v3811_v38 = vadd.f32 %v3789_v19, %v9265_v52  ;;  %v9323_v3 = vadd.f32 %v3964_v54, %v3809_v39 }
 0x45e   :  { %v3966_v49 = vpop.f32.mrf.mxu1  ;;  %v4101_v20 = vpop.f32.mrf.mxu0 }
 0x45f   :  { %v9325_v41 = vadd.f32 %v3966_v49, %v3810_v22  ;;  %v9328_v9 = vadd.f32 %v4101_v20, %v9267_v47 }
 0x460   :  { %v3968_v4 = vpop.f32.mrf.mxu1  ;;  %v4103_v32 = vpop.f32.mrf.mxu0 }
 0x461   :  { %v9330_v15 = vadd.f32 %v3968_v4, %v3811_v38  ;;  %v9333_v28 = vadd.f32 %v4103_v32, %v9271_v50  ;;  %v6292_v50 = vld [vmem:[%s9843_s5 + $0x48] sm:$0xff]  }
 0x462   :  { %v4105_v10 = vpop.f32.mrf.mxu0  ;;  %v9335_v44 = vpop.f32.mrf.mxu1  ;;  %6035 = vmatpush3.bf16.msra.mxu0 %v6292_v50 }
 0x463   :  { %v9338_v52 = vadd.f32 %v4105_v10, %v9274_v11  ;;  %6036 = vmatprep.subr.bf16.mxu0 %v9914_v34 }
 0x464   :  { %v4107_v36 = vpop.f32.mrf.mxu0  ;;  %v9340_v18 = vpop.f32.mrf.mxu1 }
 0x465   :  { %v9343_v33 = vadd.f32 %v4107_v36, %v9277_v40  ;;  %v6293_v40 = vld [vmem:[%s9843_s5 + $0x40] sm:$0xff]  }
 0x466   :  { %v4111_v47 = vpop.f32.mrf.mxu0  ;;  %v9345_v12 = vpop.f32.mrf.mxu1  ;;  %6037 = vmatpush3.bf16.msra.mxu0 %v6293_v40 }
 0x467   :  { %v9353_v11 = vadd.f32 %v4111_v47, %v9280_v14  ;;  %6038 = vmatprep.subr.bf16.mxu0 %v9914_v34 }
 0x468   :  { %v4113_v16 = vpop.f32.mrf.mxu0  ;;  %v9355_v21 = vpop.f32.mrf.mxu1 }
 0x469   :  { %v9361_v48 = vadd.f32 %v4113_v16, %v9283_v5 }
 0x46a   :  { %v4115_v53 = vpop.f32.mrf.mxu0  ;;  %v9367_v14 = vpop.f32.mrf.mxu1  ;;  %6039 = vmatpush3.bf16.msra.mxu0 %v6294_v24 }
 0x46b   :  { %v9373_v7 = vadd.f32 %v4115_v53, %v9286_v63  ;;  %6040 = vmatprep.subr.bf16.mxu0 %v9914_v34 }
 0x46c   :  { %v4117_v13 = vpop.f32.mrf.mxu0  ;;  %v9375_v5 = vpop.f32.mrf.mxu1 }
 0x46d   :  { %v9379_v46 = vadd.f32 %v4117_v13, %v9290_v42 }
 0x46e   :  { %v4121_v25 = vpop.f32.mrf.mxu0  ;;  %v9382_v58 = vpop.f32.mrf.mxu1 }
 0x46f   :  { %v9385_v56 = vadd.f32 %v4121_v25, %v9294_v17 }
 0x470   :  { %v4123_v63 = vpop.f32.mrf.mxu0  ;;  %v9387_v8 = vpop.f32.mrf.mxu1 }
 0x471   :  { %v9390_v27 = vadd.f32 %v4123_v63, %v9298_v43 }
 0x472   :  { %v4125_v31 = vpop.f32.mrf.mxu0  ;;  %v9393_v42 = vpop.f32.mrf.mxu1 }
 0x473   :  { %10247 = vst [vmem:[#allocation4_spill] sm:$0xff] %v9390_v27  ;;  %v9396_v23 = vadd.f32 %v4125_v31, %v9302_v6 }
 0x474   :  { %v4127_v59 = vpop.f32.mrf.mxu0  ;;  %v9398_v45 = vpop.f32.mrf.mxu1 }
 0x475   :  { %10248 = vst [vmem:[#allocation77_spill] sm:$0xff] %v9396_v23  ;;  %v9401_v17 = vadd.f32 %v4127_v59, %v9306_v0 }
 0x476   :  { %v4131_v55 = vpop.f32.mrf.mxu0  ;;  %v9403_v26 = vpop.f32.mrf.mxu1 }
 0x477   :  { %10249 = vst [vmem:[#allocation13_spill] sm:$0xff] %v9401_v17  ;;  %v9406_v43 = vadd.f32 %v4131_v55, %v9308_v60 }
 0x478   :  { %v4133_v35 = vpop.f32.mrf.mxu0  ;;  %v9408_v29 = vpop.f32.mrf.mxu1 }
 0x479   :  { %10250 = vst [vmem:[#allocation75_spill] sm:$0xff] %v9406_v43  ;;  %v9411_v61 = vadd.f32 %v4133_v35, %v9311_v51 }
 0x47a   :  { %v4135_v6 = vpop.f32.mrf.mxu0  ;;  %v9413_v39 = vpop.f32.mrf.mxu1 }
 0x47b   :  { %10251 = vst [vmem:[#allocation22_spill] sm:$0xff] %v9411_v61  ;;  %v9416_v37 = vadd.f32 %v4135_v6, %v9314_v57 }
 0x47c   :  { %v4137_v0 = vpop.f32.mrf.mxu0  ;;  %v9418_v62 = vpop.f32.mrf.mxu1 }
 0x47d   :  { %10252 = vst [vmem:[#allocation79_spill] sm:$0xff] %v9416_v37  ;;  %v9421_v22 = vadd.f32 %v4137_v0, %v9317_v1 }
 0x47e   :  { %v4141_v60 = vpop.f32.mrf.mxu0  ;;  %v9423_v19 = vpop.f32.mrf.mxu1 }
 0x47f   :  { %10253 = vst [vmem:[#allocation54_spill] sm:$0xff] %v9421_v22  ;;  %10254 = vst [vmem:[#allocation26_spill] sm:$0xff] %v9423_v19  ;;  %v9426_v54 = vadd.f32 %v4141_v60, %v9320_v2 }
 0x480   :  { %v4143_v51 = vpop.f32.mrf.mxu0  ;;  %v9428_v38 = vpop.f32.mrf.mxu1 }
 0x481   :  { %10255 = vst [vmem:[#allocation81_spill] sm:$0xff] %v9426_v54  ;;  %10256 = vst [vmem:[#allocation78_spill] sm:$0xff] %v9428_v38  ;;  %v9431_v49 = vadd.f32 %v4143_v51, %v9323_v3 }
 0x482   :  { %v4145_v57 = vpop.f32.mrf.mxu0  ;;  %v9433_v20 = vpop.f32.mrf.mxu1 }
 0x483   :  { %10257 = vst [vmem:[#allocation18_spill] sm:$0xff] %v9431_v49  ;;  %10258 = vst [vmem:[#allocation10_spill] sm:$0xff] %v9433_v20  ;;  %v9436_v4 = vadd.f32 %v4145_v57, %v9325_v41 }
 0x484   :  { %v4147_v1 = vpop.f32.mrf.mxu0  ;;  %v9438_v32 = vpop.f32.mrf.mxu1 }
 0x485   :  { %10259 = vst [vmem:[#allocation56_spill] sm:$0xff] %v9436_v4  ;;  %10260 = vst [vmem:[#allocation59_spill] sm:$0xff] %v9438_v32  ;;  %v9441_v10 = vadd.f32 %v4147_v1, %v9330_v15 }
 0x486   :  { %v9443_v2 = vpop.f32.mrf.mxu1  ;;  %v4287_v36 = vpop.f32.mrf.mxu0 }
 0x487   :  { %10261 = vst [vmem:[#allocation83_spill] sm:$0xff] %v9441_v10  ;;  %10262 = vst [vmem:[#allocation80_spill] sm:$0xff] %v9443_v2 }
 0x488   :  { %v9445_v47 = vpop.f32.mrf.mxu1  ;;  %v4289_v50 = vpop.f32.mrf.mxu0 }
 0x489   :  { %10263 = vst [vmem:[#allocation82_spill] sm:$0xff] %v9445_v47 }
 0x48a   :  { %v4291_v3 = vpop.f32.mrf.mxu0  ;;  %v4370_v16 = vpop.f32.mrf.mxu1 }
 0x48c   :  { %v4293_v40 = vpop.f32.mrf.mxu0  ;;  %v4372_v30 = vpop.f32.mrf.mxu1 }
 0x48e   :  { %v4297_v53 = vpop.f32.mrf.mxu0  ;;  %v4374_v24 = vpop.f32.mrf.mxu1 }
 0x490   :  { %v4299_v41 = vpop.f32.mrf.mxu0  ;;  %v4376_v13 = vpop.f32.mrf.mxu1 }
 0x492   :  { %v4301_v25 = vpop.f32.mrf.mxu0  ;;  %v4380_v63 = vpop.f32.mrf.mxu1 }
 0x494   :  { %v9447_v31 = vpop.f32.mrf.mxu0  ;;  %v4382_v15 = vpop.f32.mrf.mxu1 }
 0x496   :  { %v9449_v59 = vpop.f32.mrf.mxu0  ;;  %v9451_v55 = vpop.f32.mrf.mxu1 }
 0x498   :  { %v9453_v35 = vpop.f32.mrf.mxu0  ;;  %v9455_v6 = vpop.f32.mrf.mxu1 }
 0x49a   :  { %v9457_v0 = vpop.f32.mrf.mxu0  ;;  %v9459_v60 = vpop.f32.mrf.mxu1 }
 0x49c   :  { %v9461_v51 = vpop.f32.mrf.mxu0  ;;  %v9463_v57 = vpop.f32.mrf.mxu1 }
 0x49e   :  { %v9465_v1 = vpop.f32.mrf.mxu0  ;;  %v9467_v34 = vpop.f32.mrf.mxu1 }
 0x4a0   :  { %v9469_v10 = vpop.f32.mrf.mxu0  ;;  %v9471_v4 = vpop.f32.mrf.mxu1 }
 0x4a2   :  { %v9473_v49 = vpop.f32.mrf.mxu0  ;;  %v9475_v54 = vpop.f32.mrf.mxu1 }
 0x4a3   :  { %10264 = vst [vmem:[#allocation6_spill] sm:$0xff] %v9473_v49 }
 0x4a4   :  { %v9477_v22 = vpop.f32.mrf.mxu0  ;;  %v9479_v47 = vpop.f32.mrf.mxu1 }
 0x4a5   :  { %10265 = vst [vmem:[#allocation85_spill] sm:$0xff] %v9477_v22  ;;  %10266 = vst [vmem:[#allocation20_spill] sm:$0xff] %v9479_v47  ;;  %v4288_v22 = vadd.f32 %v4287_v36, %v9335_v44  ;;  %v4294_v44 = vadd.f32 %v4293_v40, %v9355_v21 }
 0x4a6   :  { %v9481_v37 = vpop.f32.mrf.mxu0  ;;  %v9483_v2 = vpop.f32.mrf.mxu1 }
 0x4a7   :  { %10267 = vst [vmem:[#allocation84_spill] sm:$0xff] %v9481_v37  ;;  %10268 = vst [vmem:[#allocation32_spill] sm:$0xff] %v9483_v2  ;;  %v4290_v37 = vadd.f32 %v4289_v50, %v9340_v18  ;;  %v4419_v2 = vadd.f32 %v4370_v16, %v4288_v22  ;;  %v4298_v18 = vadd.f32 %v4297_v53, %v9367_v14  ;;  %v10276_v16 = vmov 0.0  }
 0x4a8   :  { %v9485_v61 = vpop.f32.mrf.mxu0  ;;  %v9487_v32 = vpop.f32.mrf.mxu1  ;;  %6044 = vmatprep.mubr.msk.bf16.mxu0 %vm6387_vm5, %v10276_v16  ;;  %6058 = vmatprep.mubr.msk.bf16.mxu1 %vm6387_vm5, %v10276_v16 }
 0x4a9   :  { %10269 = vst [vmem:[#allocation87_spill] sm:$0xff] %v9485_v61  ;;  %10270 = vst [vmem:[#allocation5_spill] sm:$0xff] %v9487_v32  ;;  %v4292_v32 = vadd.f32 %v4291_v3, %v9345_v12  ;;  %v4422_v12 = vadd.f32 %v4376_v13, %v4294_v44  ;;  %v4300_v3 = vadd.f32 %v4299_v41, %v9375_v5 }
 0x4aa   :  { %v9489_v43 = vpop.f32.mrf.mxu0  ;;  %v9491_v20 = vpop.f32.mrf.mxu1 }
 0x4ab   :  { %10271 = vst [vmem:[#allocation37_spill] sm:$0xff] %v9489_v43  ;;  %10272 = vst [vmem:[#allocation89_spill] sm:$0xff] %v9491_v20  ;;  %v4420_v43 = vadd.f32 %v4372_v30, %v4290_v37  ;;  %v4421_v36 = vadd.f32 %v4374_v24, %v4292_v32  ;;  %v4304_v30 = vadd.f32 %v9447_v31, %v9387_v8 }
 0x4ac   :  { %v9493_v17 = vpop.f32.mrf.mxu0  ;;  %v9495_v38 = vpop.f32.mrf.mxu1  ;;  %v4308_v8 = vadd.f32 %v9449_v59, %v9393_v42 }
 0x4ad   :  { %10273 = vst [vmem:[#allocation86_spill] sm:$0xff] %v9493_v17  ;;  %10274 = vst [vmem:[#allocation25_spill] sm:$0xff] %v9495_v38  ;;  %v6296_v17 = vld [vmem:[%s9843_s5 + $0x30] sm:$0xff]   ;;  %v4426_v31 = vadd.f32 %v9455_v6, %v4304_v30 }
 0x4ae   :  { %v9498_v23 = vpop.f32.mrf.mxu1  ;;  %v4473_v47 = vpop.f32.mrf.mxu0  ;;  %6041 = vmatpush3.bf16.msra.mxu0 %v6296_v17 }
 0x4af   :  { %10275 = vst [vmem:[#allocation48_spill] sm:$0xff] %v9498_v23  ;;  %v4522_v19 = vadd.f32 %v4473_v47, %v4419_v2  ;;  %6042 = vmatprep.subr.bf16.mxu0 %v10276_v16 }
 0x4b0   :  { %v9501_v49 = vpop.f32.mrf.mxu1  ;;  %v4475_v61 = vpop.f32.mrf.mxu0 }
 0x4b1   :  { %v4523_v23 = vadd.f32 %v4475_v61, %v4420_v43  ;;  %v4423_v43 = vadd.f32 %v4380_v63, %v4298_v18  ;;  %v6299_v63 = vld [vmem:[%s9843_s5 + $0x10] sm:$0xff]  }
 0x4b2   :  { %v4477_v38 = vpop.f32.mrf.mxu0  ;;  %v4579_v20 = vpop.f32.mrf.mxu1 }
 0x4b3   :  { %v4628_v27 = vadd.f32 %v4579_v20, %v4522_v19  ;;  %v4524_v37 = vadd.f32 %v4477_v38, %v4421_v36  ;;  %v6297_v19 = vld [vmem:[%s9843_s5 + $0x18] sm:$0xff]   ;;  %v4302_v38 = vadd.f32 %v4301_v25, %v9382_v58 }
 0x4b4   :  { %v4479_v22 = vpop.f32.mrf.mxu0  ;;  %v4581_v50 = vpop.f32.mrf.mxu1  ;;  %6051 = vmatpush3.bf16.msra.mxu1 %v6297_v19 }
 0x4b5   :  { %v9511_v2 = vmax.f32 %v9328_v9, %v4628_v27  ;;  %v9513_v47 = vadd.f32 %v4581_v50, %v4523_v23  ;;  %v4525_v61 = vadd.f32 %v4479_v22, %v4422_v12  ;;  %v4424_v23 = vadd.f32 %v4382_v15, %v4300_v3  ;;  %6052 = vmatprep.subr.bf16.mxu1 %v10276_v16 }
 0x4b6   :  { %v4483_v21 = vpop.f32.mrf.mxu0  ;;  %v4583_v32 = vpop.f32.mrf.mxu1  ;;  %v4425_v41 = vadd.f32 %v9451_v55, %v4302_v38  ;;  %v4310_v22 = vadd.f32 %v9453_v35, %v9398_v45  ;;  %v4427_v50 = vadd.f32 %v9459_v60, %v4308_v8  ;;  %v4312_v45 = vadd.f32 %v9457_v0, %v9403_v26 }
 0x4b7   :  { %v4650_v14 = vmax.f32 %v9333_v28, %v9513_v47  ;;  %v4630_v17 = vadd.f32 %v4583_v32, %v4524_v37  ;;  %v4526_v20 = vadd.f32 %v4483_v21, %v4423_v43  ;;  %v4314_v26 = vadd.f32 %v9461_v51, %v9408_v29  ;;  %v6302_v29 = vld [vmem:[%s9843_s5] sm:$0xff]   ;;  %v10288_v47 = vld [vmem:[#allocation5_spill] sm:$0xff] }
 0x4b8   :  { %v4485_v9 = vpop.f32.mrf.mxu0  ;;  %v4585_v27 = vpop.f32.mrf.mxu1  ;;  %6053 = vmatpush3.bf16.msra.mxu1 %v6299_v63  ;;  %v4428_v35 = vadd.f32 %v9463_v57, %v4310_v22  ;;  %v4429_v43 = vadd.f32 %v9467_v34, %v4312_v45  ;;  %v10281_v63 = vld [vmem:[#allocation77_spill] sm:$0xff]  ;;  %v10287_v45 = vld [vmem:[#allocation84_spill] sm:$0xff] }
 0x4b9   :  { %v9523_v5 = vmax.f32 %v9338_v52, %v4630_v17  ;;  %v9525_v40 = vadd.f32 %v4585_v27, %v4525_v61  ;;  %v4527_v58 = vadd.f32 %v4485_v9, %v4424_v23  ;;  %v6298_v52 = vld [vmem:[%s9843_s5 + $0x28] sm:$0xff]   ;;  %6054 = vmatprep.subr.bf16.mxu1 %v10276_v16  ;;  %v4430_v51 = vadd.f32 %v9471_v4, %v4314_v26  ;;  %v10279_v4 = vld [vmem:[#allocation6_spill] sm:$0xff] }
 0x4ba   :  { %v4487_v53 = vpop.f32.mrf.mxu0  ;;  %v4589_v24 = vpop.f32.mrf.mxu1  ;;  %6043 = vmatpush3.bf16.msra.mxu0 %v6298_v52  ;;  %v4320_v23 = vadd.f32 %v9469_v10, %v9418_v62  ;;  %v10280_v62 = vld [vmem:[#allocation20_spill] sm:$0xff] }
 0x4bb   :  { %v4652_v13 = vmax.f32 %v9343_v33, %v9525_v40  ;;  %v4632_v25 = vadd.f32 %v4589_v24, %v4526_v20  ;;  %v4528_v44 = vadd.f32 %v4487_v53, %v4425_v41  ;;  %6062 = vmatprep.subr.bf16.mxu0 %v10276_v16  ;;  %v10277_v53 = vld [vmem:[#allocation4_spill] sm:$0xff]  ;;  %v10296_v40 = vld [vmem:[#allocation25_spill] sm:$0xff] }
 0x4bc   :  { %v4489_v15 = vpop.f32.mrf.mxu0  ;;  %v4591_v55 = vpop.f32.mrf.mxu1  ;;  %v4432_v10 = vadd.f32 %v10280_v62, %v4320_v23 }
 0x4bd   :  { %v9543_v36 = vmax.f32 %v9353_v11, %v4632_v25  ;;  %v4633_v18 = vadd.f32 %v4591_v55, %v4527_v58  ;;  %v4529_v42 = vadd.f32 %v4489_v15, %v4426_v31  ;;  %v6300_v11 = vld [vmem:[%s9843_s5 + $0x8] sm:$0xff]   ;;  %v10282_v15 = vld [vmem:[#allocation78_spill] sm:$0xff]  ;;  %v10283_v55 = vld [vmem:[#allocation85_spill] sm:$0xff] }
 0x4be   :  { %v4493_v12 = vpop.f32.mrf.mxu0  ;;  %v4593_v37 = vpop.f32.mrf.mxu1  ;;  %6055 = vmatpush3.bf16.msra.mxu1 %v6300_v11  ;;  %v10286_v11 = vld [vmem:[#allocation10_spill] sm:$0xff] }
 0x4bf   :  { %v4654_v59 = vmax.f32 %v9361_v48, %v4633_v18  ;;  %v4634_v6 = vadd.f32 %v4593_v37, %v4528_v44  ;;  %4697 = vrot.lane.b32.xlu0 %v9543_v36, %s6386_s16  ;;  %v4530_v48 = vadd.f32 %v4493_v12, %v4427_v50  ;;  %6056 = vmatprep.subr.bf16.mxu1 %v10276_v16  ;;  %v10284_v50 = vld [vmem:[#allocation32_spill] sm:$0xff] }
 0x4c0   :  { %v4495_v60 = vpop.f32.mrf.mxu0  ;;  %v4595_v3 = vpop.f32.mrf.mxu1  ;;  %v4324_v44 = vadd.f32 %v10283_v55, %v10282_v15 }
 0x4c1   :  { %v9564_v21 = vmax.f32 %v9373_v7, %v4634_v6  ;;  %v4635_v32 = vadd.f32 %v4595_v3, %v4529_v42  ;;  %4699 = vrot.lane.b32.xlu1 %v4654_v59, %s6386_s16  ;;  %v4531_v61 = vadd.f32 %v4495_v60, %v4428_v35  ;;  %v4318_v7 = vadd.f32 %v9465_v1, %v9413_v39  ;;  %v10285_v42 = vld [vmem:[#allocation13_spill] sm:$0xff] }
 0x4c2   :  { %v4497_v0 = vpop.f32.mrf.mxu0  ;;  %v4599_v57 = vpop.f32.mrf.mxu1  ;;  %6057 = vmatpush3.bf16.msra.mxu1 %v6302_v29  ;;  %v4328_v35 = vadd.f32 %v10287_v45, %v10286_v11 }
 0x4c3   :  { %v4656_v17 = vmax.f32 %v9379_v46, %v4635_v32  ;;  %v4636_v19 = vadd.f32 %v4599_v57, %v4530_v48  ;;  %4701 = vrot.lane.b32.xlu0 %v9564_v21, %s6386_s16  ;;  %v4532_v27 = vadd.f32 %v4497_v0, %v4429_v43  ;;  %v4431_v39 = vadd.f32 %v9475_v54, %v4318_v7  ;;  %v10289_v48 = vld [vmem:[#allocation75_spill] sm:$0xff] }
 0x4c4   :  { %v4499_v38 = vpop.f32.mrf.mxu0  ;;  %v4601_v9 = vpop.f32.mrf.mxu1  ;;  %6076 = vmatprep.subr.bf16.mxu1 %v10276_v16  ;;  %v10290_v0 = vld [vmem:[#allocation59_spill] sm:$0xff] }
 0x4c5   :  { %v9581_v34 = vmax.f32 %v9385_v56, %v4636_v19  ;;  %v4637_v46 = vadd.f32 %v4601_v9, %v4531_v61  ;;  %4703 = vrot.lane.b32.xlu1 %v4656_v17, %s6386_s16  ;;  %v4533_v30 = vadd.f32 %v4499_v38, %v4430_v51  ;;  %v10278_v56 = vld [vmem:[#allocation26_spill] sm:$0xff]  ;;  %v10291_v57 = vld [vmem:[#allocation87_spill] sm:$0xff]  ;;  %v10292_v19 = vld [vmem:[#allocation89_spill] sm:$0xff] }
 0x4c6   :  { %v4503_v1 = vpop.f32.mrf.mxu0  ;;  %v4603_v20 = vpop.f32.mrf.mxu1  ;;  %v4322_v58 = vadd.f32 %v10279_v4, %v10278_v56  ;;  %v4330_v43 = vadd.f32 %v10291_v57, %v10290_v0  ;;  %v4435_v7 = vadd.f32 %v10292_v19, %v4328_v35  ;;  %v10293_v9 = vld [vmem:[#allocation22_spill] sm:$0xff]  ;;  %v10304_v35 = vld [vmem:[#allocation56_spill] sm:$0xff] }
 0x4c7   :  { %v4658_v24 = vmax.f32 %v10277_v53, %v4637_v46  ;;  %v4638_v41 = vadd.f32 %v4603_v20, %v4532_v27  ;;  %4689 = vrot.lane.b32.xlu0 %v9511_v2, %s6386_s16  ;;  %v4534_v54 = vadd.f32 %v4503_v1, %v4431_v39  ;;  %v10294_v27 = vld [vmem:[#allocation80_spill] sm:$0xff]  ;;  %v10295_v46 = vld [vmem:[#allocation37_spill] sm:$0xff]  ;;  %v10297_v20 = vld [vmem:[#allocation79_spill] sm:$0xff] }
 0x4c8   :  { %v4505_v25 = vpop.f32.mrf.mxu0  ;;  %v4605_v52 = vpop.f32.mrf.mxu1  ;;  %v4433_v12 = vadd.f32 %v10284_v50, %v4322_v58  ;;  %v4332_v23 = vadd.f32 %v10295_v46, %v10294_v27  ;;  %v10299_v56 = vld [vmem:[#allocation86_spill] sm:$0xff]  ;;  %v6301_v46 = vld [vmem:[%s9843_s5 + $0x70] sm:$0xff]  }
 0x4c9   :  { %v9595_v8 = vmax.f32 %v10281_v63, %v4638_v41  ;;  %v4639_v31 = vadd.f32 %v4605_v52, %v4533_v30  ;;  %4691 = vrot.lane.b32.xlu1 %v4650_v14, %s6386_s16  ;;  %v4535_v37 = vadd.f32 %v4505_v25, %v4432_v10  ;;  %v4434_v14 = vadd.f32 %v10288_v47, %v4324_v44  ;;  %v10298_v41 = vld [vmem:[#allocation82_spill] sm:$0xff]  ;;  %v10300_v52 = vld [vmem:[#allocation48_spill] sm:$0xff] }
 0x4ca   :  { %v4507_v18 = vpop.f32.mrf.mxu0  ;;  %v4609_v22 = vpop.f32.mrf.mxu1  ;;  %v4334_v4 = vadd.f32 %v10299_v56, %v10298_v41  ;;  %v4437_v62 = vadd.f32 %v10300_v52, %v4332_v23  ;;  %v9663_v0 = vld [vmem:[%s9844_s4] ss:$0 sm:$0xff] }
 0x4cb   :  { %v4660_v59 = vmax.f32 %v10285_v42, %v4639_v31  ;;  %v4640_v6 = vadd.f32 %v4609_v22, %v4534_v54  ;;  %4693 = vrot.lane.b32.xlu0 %v9523_v5, %s6386_s16  ;;  %v4536_v3 = vadd.f32 %v4507_v18, %v4433_v12  ;;  %v10301_v54 = vld [vmem:[#allocation54_spill] sm:$0xff] }
 0x4cc   :  { %v4509_v60 = vpop.f32.mrf.mxu0  ;;  %v4611_v28 = vpop.f32.mrf.mxu1  ;;  %v4438_v44 = vadd.f32 %v9501_v49, %v4334_v4  ;;  %v10303_v42 = vld [vmem:[#allocation18_spill] sm:$0xff] }
 0x4cd   :  { %v9611_v32 = vmax.f32 %v10289_v48, %v4640_v6  ;;  %v4641_v26 = vadd.f32 %v4611_v28, %v4535_v37  ;;  %4695 = vrot.lane.b32.xlu1 %v4652_v13, %s6386_s16  ;;  %v4537_v38 = vadd.f32 %v4509_v60, %v4434_v14  ;;  %v4436_v13 = vadd.f32 %v10296_v40, %v4330_v43  ;;  %v10305_v28 = vld [vmem:[#allocation83_spill] sm:$0xff]  ;;  %v6304_v4 = vld [vmem:[%s9843_s5 + $0x60] sm:$0xff]  }
 0x4ce   :  { %v4513_v61 = vpop.f32.mrf.mxu0  ;;  %v4613_v17 = vpop.f32.mrf.mxu1 }
 0x4cf   :  { %v4662_v29 = vmax.f32 %v10293_v9, %v4641_v26  ;;  %v4642_v51 = vadd.f32 %v4613_v17, %v4536_v3  ;;  %4705 = vrot.lane.b32.xlu0 %v9581_v34, %s6386_s16  ;;  %v4538_v1 = vadd.f32 %v4513_v61, %v4435_v7 }
 0x4d0   :  { %v4515_v39 = vpop.f32.mrf.mxu0  ;;  %v4615_v33 = vpop.f32.mrf.mxu1 }
 0x4d1   :  { %v9627_v30 = vmax.f32 %v10297_v20, %v4642_v51  ;;  %v4643_v53 = vadd.f32 %v4615_v33, %v4537_v38  ;;  %4707 = vrot.lane.b32.xlu1 %v4658_v24, %s6386_s16  ;;  %v4539_v10 = vadd.f32 %v4515_v39, %v4436_v13  ;;  %v10302_v24 = vld [vmem:[#allocation81_spill] sm:$0xff] }
 0x4d2   :  { %v4517_v58 = vpop.f32.mrf.mxu0  ;;  %v4619_v25 = vpop.f32.mrf.mxu1 }
 0x4d3   :  { %v4664_v63 = vmax.f32 %v10301_v54, %v4643_v53  ;;  %v4644_v31 = vadd.f32 %v4619_v25, %v4538_v1  ;;  %4709 = vrot.lane.b32.xlu0 %v9595_v8, %s6386_s16  ;;  %v4540_v18 = vadd.f32 %v4517_v58, %v4437_v62  ;;  %v6305_v58 = vld [vmem:[%s9843_s5 + $0x98] sm:$0xff]  }
 0x4d4   :  { %v4519_v15 = vpop.f32.mrf.mxu0  ;;  %v4621_v55 = vpop.f32.mrf.mxu1 }
 0x4d5   :  { %v9638_v22 = vmax.f32 %v10302_v24, %v4644_v31  ;;  %v4645_v50 = vadd.f32 %v4621_v55, %v4539_v10  ;;  %4711 = vrot.lane.b32.xlu1 %v4660_v59, %s6386_s16  ;;  %v4541_v37 = vadd.f32 %v4519_v15, %v4438_v44  ;;  %v6306_v31 = vld [vmem:[%s9843_s5 + $0x58] sm:$0xff]   ;;  %v6307_v15 = vld [vmem:[%s9843_s5 + $0x90] sm:$0xff]  }
 0x4d6   :  { %v4623_v12 = vpop.f32.mrf.mxu1  ;;  %v6308_v24 = vld [vmem:[%s9843_s5 + $0x50] sm:$0xff]  }
 0x4d7   :  { %v4666_v6 = vmax.f32 %v10303_v42, %v4645_v50  ;;  %v4646_v11 = vadd.f32 %v4623_v12, %v4540_v18  ;;  %4713 = vrot.lane.b32.xlu0 %v9611_v32, %s6386_s16  ;;  %v6309_v50 = vld [vmem:[%s9843_s5 + $0x88] sm:$0xff]  }
 0x4d8   :  { %v4625_v45 = vpop.f32.mrf.mxu1 }
 0x4d9   :  { %v9645_v60 = vmax.f32 %v10304_v35, %v4646_v11  ;;  %v4647_v49 = vadd.f32 %v4625_v45, %v4541_v37  ;;  %4715 = vrot.lane.b32.xlu1 %v4662_v29, %s6386_s16 }
 0x4db   :  { %v4668_v47 = vmax.f32 %v10305_v28, %v4647_v49  ;;  %4717 = vrot.lane.b32.xlu0 %v9627_v30, %s6386_s16  ;;  %v6310_v49 = vld [vmem:[%s9843_s5 + $0x80] sm:$0xff]  }
 0x4dc   :  { %v6311_v28 = vld [vmem:[%s9843_s5 + $0xc0] sm:$0xff]  }
 0x4dd   :  { %4719 = vrot.lane.b32.xlu1 %v4664_v63, %s6386_s16 }
 0x4df   :  { %4721 = vrot.lane.b32.xlu0 %v9638_v22, %s6386_s16 }
 0x4e1   :  { %4723 = vrot.lane.b32.xlu1 %v4666_v6, %s6386_s16 }
 0x4e3   :  { %4725 = vrot.lane.b32.xlu0 %v9645_v60, %s6386_s16 }
 0x4e5   :  { %4727 = vrot.lane.b32.xlu1 %v4668_v47, %s6386_s16 }
 0x531   :  { %v4698_v59 = vpop.permute.xlu0 %4697 }
 0x533   :  { %v4700_v14 = vpop.permute.xlu1 %4699 }
 0x534   :  { %v4732_v3 = vsel %vm4729_vm6, %v4698_v59, %v4700_v14 }
 0x535   :  { %v4752_v48 = vmax.f32 %v9543_v36, %v4732_v3  ;;  %v4702_v26 = vpop.permute.xlu0 %4701  ;;  %v6313_v3 = vld [vmem:[%s9843_s5 + $0xb8] sm:$0xff]  }
 0x537   :  { %v4704_v57 = vpop.permute.xlu1 %4703  ;;  %v4768_v61 = vadd.f32 %v9663_v0, %v4752_v48 }
 0x538   :  { %v4733_v43 = vsel %vm4729_vm6, %v4702_v26, %v4704_v57 }
 0x539   :  { %v4753_v17 = vmax.f32 %v9564_v21, %v4733_v43  ;;  %v4690_v19 = vpop.permute.xlu0 %4689  ;;  %v4778_v36 = vmax.f32 %v4768_v61, 0.0 }
 0x53b   :  { %v4769_v7 = vadd.f32 %v9663_v0, %v4753_v17  ;;  %v4692_v38 = vpop.permute.xlu1 %4691 }
 0x53c   :  { %v4730_v9 = vsel %vm4729_vm6, %v4690_v19, %v4692_v38  ;;  %v6314_v19 = vld [vmem:[%s9843_s5 + $0xb0] sm:$0xff]  }
 0x53d   :  { %v4779_v29 = vmax.f32 %v4769_v7, 0.0  ;;  %v4750_v51 = vmax.f32 %v9511_v2, %v4730_v9  ;;  %v4694_v27 = vpop.permute.xlu0 %4693  ;;  %v6303_v2 = vld [vmem:[%s9843_s5 + $0x68] sm:$0xff]  }
 0x53f   :  { %v4787_v23 = vpack.c.bf16 %v4779_v29, %v4778_v36  ;;  %v4696_v39 = vpop.permute.xlu1 %4695  ;;  %v4766_v33 = vadd.f32 %v9663_v0, %v4750_v51  ;;  %v6315_v36 = vld [vmem:[%s9843_s5 + $0xa8] sm:$0xff]  }
 0x540   :  { %v4731_v21 = vsel %vm4729_vm6, %v4694_v27, %v4696_v39  ;;  %v6318_v39 = vld [vmem:[%s9845_s7 + $0x30] sm:$0xff]  }
 0x541   :  { %v4751_v40 = vmax.f32 %v9523_v5, %v4731_v21  ;;  %v4706_v13 = vpop.permute.xlu0 %4705  ;;  %6045 = vmatmul.mubr.msk.bf16.vlgmr.msra.gmra.mxu0 %vm4842_vm7, %v4787_v23  ;;  %v4776_v53 = vmax.f32 %v4766_v33, 0.0  ;;  %v6319_v21 = vld [vmem:[%s9845_s7 + $0x28] sm:$0xff]   ;;  %v6320_v33 = vld [vmem:[%s9845_s7 + $0x20] sm:$0xff]  }
 0x542   :  { %6063 = vmatpush3.bf16.msra.mxu0 %v6301_v46  ;;  %6072 = vmatprep.mubr.msk.bf16.mxu0 %vm6387_vm5, %v10276_v16 }
 0x543   :  { %v4767_v1 = vadd.f32 %v9663_v0, %v4751_v40  ;;  %v4708_v20 = vpop.permute.xlu1 %4707  ;;  %6064 = vmatprep.subr.bf16.mxu0 %v10276_v16  ;;  %v6321_v40 = vld [vmem:[%s9845_s7 + $0x18] sm:$0xff]  }
 0x544   :  { %v4734_v5 = vsel %vm4729_vm6, %v4706_v13, %v4708_v20  ;;  %v6322_v13 = vld [vmem:[%s9845_s7 + $0x10] sm:$0xff]   ;;  %v6325_v20 = vld [vmem:[%s9846_s9 + $0x28] ss:$0 sps:$4 sm:$0x33]  }
 0x545   :  { %v4777_v41 = vmax.f32 %v4767_v1, 0.0  ;;  %v4710_v56 = vpop.permute.xlu0 %4709  ;;  %v4754_v10 = vmax.f32 %v9581_v34, %v4734_v5  ;;  %v6324_v1 = vld [vmem:[%s9845_s7] sm:$0xff]  }
 0x546   :  { %6065 = vmatpush3.bf16.msra.mxu0 %v6303_v2  ;;  %v6323_v2 = vld [vmem:[%s9845_s7 + $0x8] sm:$0xff]  }
 0x547   :  { %v4786_v25 = vpack.c.bf16 %v4777_v41, %v4776_v53  ;;  %v4712_v52 = vpop.permute.xlu1 %4711  ;;  %6066 = vmatprep.subr.bf16.mxu0 %v10276_v16  ;;  %v4770_v34 = vadd.f32 %v9663_v0, %v4754_v10  ;;  %v5408_v53 = vsel %vm3384_vm2, %v6325_v20, 0  ;;  %v6326_v41 = vld [vmem:[%s9846_s9 + $0x20] sm:$0xff]  }
 0x548   :  { %v4735_v62 = vsel %vm4729_vm6, %v4710_v56, %v4712_v52  ;;  %v6327_v56 = vld [vmem:[%s9846_s9 + $0x18] sm:$0xff]  }
 0x549   :  { %v4755_v54 = vmax.f32 %v9595_v8, %v4735_v62  ;;  %v4714_v63 = vpop.permute.xlu0 %4713  ;;  %6059 = vmatmul.mubr.msk.bf16.vlgmr.msra.gmra.mxu1 %vm4842_vm7, %v4786_v25  ;;  %v4780_v6 = vmax.f32 %v4770_v34, 0.0 }
 0x54a   :  { %6067 = vmatpush3.bf16.msra.mxu0 %v6304_v4  ;;  %6077 = vmatpush3.bf16.msra.mxu1 %v6305_v58 }
 0x54b   :  { %v4771_v55 = vadd.f32 %v9663_v0, %v4755_v54  ;;  %v4716_v44 = vpop.permute.xlu1 %4715  ;;  %6068 = vmatprep.subr.bf16.mxu0 %v10276_v16  ;;  %6078 = vmatprep.subr.bf16.mxu1 %v10276_v16 }
 0x54c   :  { %6086 = vmatprep.mubr.msk.bf16.mxu1 %vm6387_vm5, %v10276_v16  ;;  %v4736_v18 = vsel %vm4729_vm6, %v4714_v63, %v4716_v44 }
 0x54d   :  { %v4718_v8 = vpop.permute.xlu0 %4717  ;;  %v4781_v12 = vmax.f32 %v4771_v55, 0.0  ;;  %v4756_v11 = vmax.f32 %v9611_v32, %v4736_v18 }
 0x54e   :  { %6069 = vmatpush3.bf16.msra.mxu0 %v6306_v31  ;;  %6079 = vmatpush3.bf16.msra.mxu1 %v6307_v15 }
 0x54f   :  { %v4720_v37 = vpop.permute.xlu1 %4719  ;;  %6070 = vmatprep.subr.bf16.mxu0 %v10276_v16  ;;  %6080 = vmatprep.subr.bf16.mxu1 %v10276_v16  ;;  %v4788_v47 = vpack.c.bf16 %v4781_v12, %v4780_v6  ;;  %v4772_v32 = vadd.f32 %v9663_v0, %v4756_v11 }
 0x550   :  { %v4737_v42 = vsel %vm4729_vm6, %v4718_v8, %v4720_v37 }
 0x551   :  { %v4757_v45 = vmax.f32 %v9627_v30, %v4737_v42  ;;  %v4722_v35 = vpop.permute.xlu0 %4721  ;;  %v6312_v30 = vld [vmem:[%s9843_s5 + $0x78] sm:$0xff]   ;;  %v4782_v61 = vmax.f32 %v4772_v32, 0.0 }
 0x552   :  { %6071 = vmatpush3.bf16.msra.mxu0 %v6308_v24  ;;  %6081 = vmatpush3.bf16.msra.mxu1 %v6309_v50 }
 0x553   :  { %v4773_v59 = vadd.f32 %v9663_v0, %v4757_v45  ;;  %v4724_v14 = vpop.permute.xlu1 %4723  ;;  %6082 = vmatprep.subr.bf16.mxu1 %v10276_v16  ;;  %6090 = vmatprep.subr.bf16.mxu0 %v10276_v16  ;;  %v5969_v45 = vld [vmem:[%s9847_s6] ss:$0 sm:$0xff] }
 0x554   :  { %v4738_v17 = vsel %vm4729_vm6, %v4722_v35, %v4724_v14 }
 0x555   :  { %6073 = vmatmul.mubr.msk.bf16.vlgmr.msra.gmra.mxu0 %vm4842_vm7, %v4788_v47  ;;  %v4783_v48 = vmax.f32 %v4773_v59, 0.0  ;;  %v4726_v26 = vpop.permute.xlu0 %4725  ;;  %v4758_v9 = vmax.f32 %v9638_v22, %v4738_v17  ;;  %v6316_v22 = vld [vmem:[%s9843_s5 + $0xa0] sm:$0xff]  }
 0x556   :  { %6083 = vmatpush3.bf16.msra.mxu1 %v6310_v49  ;;  %6091 = vmatpush3.bf16.msra.mxu0 %v6311_v28 }
 0x557   :  { %v4728_v57 = vpop.permute.xlu1 %4727  ;;  %6084 = vmatprep.subr.bf16.mxu1 %v10276_v16  ;;  %6092 = vmatprep.subr.bf16.mxu0 %v10276_v16  ;;  %v4789_v7 = vpack.c.bf16 %v4783_v48, %v4782_v61  ;;  %v5970_v61 = vld [vmem:[%s9848_s8] ss:$0 sm:$0xff] }
 0x558   :  { %v4739_v43 = vsel %vm4729_vm6, %v4726_v26, %v4728_v57  ;;  %6100 = vmatprep.mubr.msk.bf16.mxu0 %vm6387_vm5, %v10276_v16  ;;  %v6328_v26 = vld [vmem:[%s9846_s9 + $0x10] sm:$0xff]   ;;  %v6329_v57 = vld [vmem:[%s9846_s9 + $0x8] sm:$0xff]  }
 0x559   :  { %v4759_v38 = vmax.f32 %v9645_v60, %v4739_v43  ;;  %v4774_v60 = vadd.f32 %v9663_v0, %v4758_v9  ;;  %v6330_v43 = vld [vmem:[%s9846_s9] sm:$0xff]  }
 0x55a   :  { %6085 = vmatpush3.bf16.msra.mxu1 %v6312_v30  ;;  %6093 = vmatpush3.bf16.msra.mxu0 %v6313_v3 }
 0x55b   :  { %6094 = vmatprep.subr.bf16.mxu0 %v10276_v16  ;;  %6104 = vmatprep.subr.bf16.mxu1 %v10276_v16  ;;  %v4775_v29 = vadd.f32 %v9663_v0, %v4759_v38  ;;  %v4784_v27 = vmax.f32 %v4774_v60, 0.0  ;;  %v6317_v0 = vld [vmem:[%s9845_s7 + $0x38] ss:$0 sps:$4 sm:$0xff]  }
 0x55c   :  { %v5307_v23 = vsel %vm5305_vm8, %v6317_v0, 0 }
 0x55d   :  { %6087 = vmatmul.mubr.msk.bf16.vlgmr.msra.gmra.mxu1 %vm4842_vm7, %v4789_v7  ;;  %v4785_v51 = vmax.f32 %v4775_v29, 0.0 }
 0x55e   :  { %6095 = vmatpush3.bf16.msra.mxu0 %v6314_v19  ;;  %6120 = vmatprep.mubr.msk.bf16.mxu1 %vm6387_vm5, %v10276_v16 }
 0x55f   :  { %6096 = vmatprep.subr.bf16.mxu0 %v10276_v16  ;;  %v4790_v46 = vpack.c.bf16 %v4785_v51, %v4784_v27  ;;  %6105 = vmatpush3.bf16.msra.mxu1 %v5307_v23 }
 0x560   :  { %6106 = vmatprep.subr.bf16.mxu1 %v10276_v16 }
 0x562   :  { %6097 = vmatpush3.bf16.msra.mxu0 %v6315_v36 }
 0x563   :  { %6098 = vmatprep.subr.bf16.mxu0 %v10276_v16  ;;  %6107 = vmatpush3.bf16.msra.mxu1 %v6318_v39 }
 0x564   :  { %6108 = vmatprep.subr.bf16.mxu1 %v10276_v16 }
 0x566   :  { %6099 = vmatpush3.bf16.msra.mxu0 %v6316_v22 }
 0x567   :  { %6124 = vmatprep.subr.bf16.mxu0 %v10276_v16  ;;  %6109 = vmatpush3.bf16.msra.mxu1 %v6319_v21 }
 0x568   :  { %6110 = vmatprep.subr.bf16.mxu1 %v10276_v16 }
 0x569   :  { %6101 = vmatmul.mubr.msk.bf16.vlgmr.msra.gmra.mxu0 %vm4842_vm7, %v4790_v46 }
 0x56a   :  { %6136 = vmatprep.mubr.msk.bf16.mxu0 %vm6387_vm5, %v10276_v16  ;;  %6125 = vmatpush3.bf16.msra.mxu0 %v5408_v53 }
 0x56b   :  { %6111 = vmatpush3.bf16.msra.mxu1 %v6320_v33  ;;  %6126 = vmatprep.subr.bf16.mxu0 %v10276_v16 }
 0x56c   :  { %6112 = vmatprep.subr.bf16.mxu1 %v10276_v16 }
 0x56e   :  { %6127 = vmatpush3.bf16.msra.mxu0 %v6326_v41 }
 0x56f   :  { %6113 = vmatpush3.bf16.msra.mxu1 %v6321_v40  ;;  %6128 = vmatprep.subr.bf16.mxu0 %v10276_v16 }
 0x570   :  { %6114 = vmatprep.subr.bf16.mxu1 %v10276_v16 }
 0x572   :  { %6129 = vmatpush3.bf16.msra.mxu0 %v6327_v56 }
 0x573   :  { %6115 = vmatpush3.bf16.msra.mxu1 %v6322_v13  ;;  %6130 = vmatprep.subr.bf16.mxu0 %v10276_v16 }
 0x574   :  { %6116 = vmatprep.subr.bf16.mxu1 %v10276_v16 }
 0x576   :  { %6131 = vmatpush3.bf16.msra.mxu0 %v6328_v26 }
 0x577   :  { %6117 = vmatpush3.bf16.msra.mxu1 %v6323_v2  ;;  %6132 = vmatprep.subr.bf16.mxu0 %v10276_v16 }
 0x578   :  { %6118 = vmatprep.subr.bf16.mxu1 %v10276_v16 }
 0x57a   :  { %6133 = vmatpush3.bf16.msra.mxu0 %v6329_v57 }
 0x57b   :  { %6119 = vmatpush3.bf16.msra.mxu1 %v6324_v1  ;;  %6134 = vmatprep.subr.bf16.mxu0 %v10276_v16  ;;  %v5980_v16 = vld [vmem:[%s9849_s10] ss:$0 sm:$0xff] }
 0x57e   :  { %6135 = vmatpush3.bf16.msra.mxu0 %v6330_v43 }
 0x601   :  { %v4880_v5 = vpop.f32.mrf.mxu0 }
 0x603   :  { %v6046_v4 = vpop.f32.mrf.mxu0 }
 0x605   :  { %v4883_v58 = vpop.f32.mrf.mxu0 }
 0x607   :  { %v6047_v25 = vpop.f32.mrf.mxu0 }
 0x609   :  { %v4954_v52 = vpop.f32.mrf.mxu1 }
 0x60a   :  { %v4955_v24 = vadd.f32 %v4954_v52, %v4880_v5 }
 0x60b   :  { %v6060_v62 = vpop.f32.mrf.mxu1 }
 0x60d   :  { %v4957_v10 = vpop.f32.mrf.mxu1 }
 0x60e   :  { %v4958_v12 = vadd.f32 %v4957_v10, %v4883_v58 }
 0x60f   :  { %v6061_v54 = vpop.f32.mrf.mxu1 }
 0x615   :  { %v5039_v63 = vpop.f32.mrf.mxu0 }
 0x616   :  { %v5046_v50 = vadd.f32 %v5039_v63, %v4955_v24 }
 0x617   :  { %v6074_v31 = vpop.f32.mrf.mxu0 }
 0x619   :  { %v5042_v15 = vpop.f32.mrf.mxu0 }
 0x61a   :  { %v5047_v6 = vadd.f32 %v5042_v15, %v4958_v12 }
 0x61b   :  { %v6075_v55 = vpop.f32.mrf.mxu0 }
 0x61d   :  { %v5126_v44 = vpop.f32.mrf.mxu1 }
 0x61e   :  { %v5133_v37 = vadd.f32 %v5126_v44, %v5046_v50 }
 0x61f   :  { %v6088_v34 = vpop.f32.mrf.mxu1 }
 0x621   :  { %v5129_v8 = vpop.f32.mrf.mxu1 }
 0x622   :  { %v5134_v49 = vadd.f32 %v5129_v8, %v5047_v6 }
 0x623   :  { %v6089_v18 = vpop.f32.mrf.mxu1 }
 0x629   :  { %v5213_v42 = vpop.f32.mrf.mxu0 }
 0x62a   :  { %v5220_v11 = vadd.f32 %v5213_v42, %v5133_v37 }
 0x62b   :  { %v6102_v35 = vpop.f32.mrf.mxu0 }
 0x62c   :  { %v5229_v47 = vadd.f32 %v5969_v45, %v5220_v11 }
 0x62d   :  { %v5216_v28 = vpop.f32.mrf.mxu0 }
 0x62e   :  { %v5221_v59 = vadd.f32 %v5216_v28, %v5134_v49  ;;  %v5231_v30 = vmax.f32 %v5229_v47, 0.0 }
 0x62f   :  { %v6103_v14 = vpop.f32.mrf.mxu0 }
 0x630   :  { %v5230_v32 = vadd.f32 %v5969_v45, %v5221_v59 }
 0x632   :  { %v5232_v3 = vmax.f32 %v5230_v32, 0.0 }
 0x634   :  { %v5233_v48 = vpack.c.bf16 %v5232_v3, %v5231_v30 }
 0x636   :  { %6121 = vmatmul.mubr.msk.bf16.vlgmr.msra.gmra.mxu1 %vm5301_vm9, %v5233_v48 }
 0x6f6   :  { %v5343_v17 = vpop.f32.mrf.mxu1 }
 0x6f7   :  { %v5344_v7 = vadd.f32 %v5970_v61, %v5343_v17 }
 0x6f8   :  { %v6122_v19 = vpop.f32.mrf.mxu1 }
 0x6f9   :  { %v5350_v29 = vmax.f32 %v5344_v7, 0.0 }
 0x6fa   :  { %v5346_v38 = vpop.f32.mrf.mxu1 }
 0x6fb   :  { %v5347_v9 = vadd.f32 %v5970_v61, %v5346_v38 }
 0x6fc   :  { %v6123_v36 = vpop.f32.mrf.mxu1 }
 0x6fd   :  { %v5351_v60 = vmax.f32 %v5347_v9, 0.0 }
 0x6ff   :  { %v5352_v22 = vpack.c.bf16 %v5351_v60, %v5350_v29 }
 0x701   :  { %6137 = vmatmul.mubr.msk.bf16.vlgmr.msra.gmra.mxu0 %vm3368_vm4, %v5352_v22 }
 0x7c1   :  { %v5444_v51 = vpop.f32.mrf.mxu0 }
 0x7c2   :  { %v5445_v27 = vadd.f32 %v5980_v16, %v5444_v51 }
 0x7c3   :  { %v6138_v46 = vpop.f32.mrf.mxu0 }
 0x7c4   :  { %5451 = vst [vmem:[%s9850_s11] sm:$0xff] %v5445_v27 }
 0x7c5   :  { %v5447_v0 = vpop.f32.mrf.mxu0 }
 0x7c6   :  { %v5448_v23 = vadd.f32 %v5980_v16, %v5447_v0 }
 0x7c7   :  { %v6139_v39 = vpop.f32.mrf.mxu0 }
 0x7c8   :  { %5452 = vst [vmem:[%s9850_s11 + $0x8] sm:$0xff] %v5448_v23 }

</bundles_post_ra>
